<compile_context>
chip_gen: v7x
topology: tpu7x:2x2x1
jax: 0.10.0
libtpu: 0.0.40
codegen_flags: <defaults>
</compile_context>

<pallas_src>
import functools

import jax
import jax.numpy as jnp
import numpy as np
from jax.experimental import pallas as pl
from jax.experimental.pallas import tpu as pltpu

_EPSILON = 1e-6
# 11 x 4-ary iterations == 22 bisection bits on a width-1 bracket: enough to
# recover the sparsemax support exactly (20-22 bits is the float32 safe floor)
# at half the serial depth of a binary search.
_QUAD_ITERS = 11


def _memory_wrap_kernel(x_ref, mem_ref, ynT_ref, w1x_ref, w1m_ref, b1_ref,
                        w2_ref, b2_ref, out_ref, relu_ref):
    wdt = mem_ref.dtype                      # resident (weight) dtype: bf16/f32
    x = x_ref[...].astype(jnp.float32)                                   # (bt, d)

    # --- cosine similarity against pre-normalized, pre-transposed memory -----
    xn = x * jax.lax.rsqrt(jnp.sum(x * x, axis=1, keepdims=True) + _EPSILON)
    sim = jnp.dot(xn.astype(wdt), ynT_ref[...],
                  preferred_element_type=jnp.float32)                    # (bt, m)
    # sparsemax is shift-invariant: sparsemax(sim - 1) == sparsemax(sim), so
    # z = -dist = sim - 1 is never materialized.

    # --- sparsemax(sim, dim=1): tau via 4-ary section search ------------------
    # tau* solves sum_j max(sim_j - tau, 0) == 1 (monotone decreasing in tau),
    # bracketed by [max(sim) - 1, max(sim)].
    s_max = jnp.max(sim, axis=1, keepdims=True)                          # (bt, 1)
    lo, hi = s_max - 1.0, s_max

    def _quad_step(_, carry):
        lo_, hi_ = carry
        w = hi_ - lo_
        m1 = lo_ + 0.25 * w
        m2 = lo_ + 0.50 * w
        m3 = lo_ + 0.75 * w
        # three independent reductions -> ILP across XLU/VPU
        f1 = jnp.sum(jnp.maximum(sim - m1, 0.0), axis=1, keepdims=True) < 1.0
        f2 = jnp.sum(jnp.maximum(sim - m2, 0.0), axis=1, keepdims=True) < 1.0
        f3 = jnp.sum(jnp.maximum(sim - m3, 0.0), axis=1, keepdims=True) < 1.0
        new_lo = jnp.where(f1, lo_, jnp.where(f2, m1, jnp.where(f3, m2, m3)))
        new_hi = jnp.where(f1, m1, jnp.where(f2, m2, jnp.where(f3, m3, hi_)))
        return new_lo, new_hi

    lo, hi = jax.lax.fori_loop(0, _QUAD_ITERS, _quad_step, (lo, hi), unroll=True)
    tau0 = 0.5 * (lo + hi)

    # Exact support-based refinement: matches the sort/cumsum sparsemax up to
    # float32 rounding once the support set is recovered.
    support = (sim > tau0).astype(jnp.float32)
    ks = jnp.maximum(jnp.sum(support, axis=1, keepdims=True), 1.0)
    tau = (jnp.sum(sim * support, axis=1, keepdims=True) - 1.0) / ks
    cw = jnp.maximum(sim - tau, 0.0)                                     # (bt, m)

    # --- memory vector + MLP classifier ---------------------------------------
    # cat([x, mv], 1) @ W1  ==  x @ W1[:d] + mv @ W1[d:]   (concat-free)
    mv = jnp.dot(cw.astype(wdt), mem_ref[...],
                 preferred_element_type=jnp.float32)                     # (bt, d)
    hidden = (jnp.dot(x.astype(wdt), w1x_ref[...],
                      preferred_element_type=jnp.float32)
              + jnp.dot(mv.astype(wdt), w1m_ref[...],
                        preferred_element_type=jnp.float32)
              + b1_ref[...])
    relu = jnp.maximum(hidden, 0.0)                                      # (bt, Hp)
    out = (jnp.dot(relu.astype(wdt), w2_ref[...],
                   preferred_element_type=jnp.float32) + b2_ref[...])    # (bt, Op)

    out_ref[...] = out.astype(out_ref.dtype)
    relu_ref[...] = relu.astype(relu_ref.dtype)


def _round_up(v, k):
    return ((v + k - 1) // k) * k


def _cdiv(a, b):
    return (a + b - 1) // b


@functools.partial(
    jax.jit,
    static_argnames=("block_b", "resident_dtype", "relu_dtype",
                     "single_buffer_residents"))
def _memory_wrap_forward(encoder_output, memory_set, w1, b1, w2, b2, *,
                         block_b, resident_dtype, relu_dtype,
                         single_buffer_residents):
    b, d = encoder_output.shape
    m, _ = memory_set.shape
    two_d, hidden = w1.shape
    out_dim = w2.shape[1]
    assert two_d == 2 * d, "fc1 expects concat([encoder_output, memory_vector])"

    # Hoisted resident operands: normalize memory rows once, pre-transpose to
    # (d, m) so the cosine matmul needs no in-kernel transpose.
    yn = memory_set * jax.lax.rsqrt(
        jnp.sum(memory_set * memory_set, axis=1, keepdims=True) + _EPSILON)
    ynT = yn.T.astype(resident_dtype)                                    # (d, m)
    mem_r = memory_set.astype(resident_dtype)                            # (m, d)

    # Split fc1 so the concat never materializes inside the kernel.
    w1x, w1m = w1[:d], w1[d:]

    # Lane-dense (128-multiple) output dims; near-equal 8-aligned batch tiles
    # with >= 2 grid steps when the batch allows it (v7x has 2 TensorCores).
    h_pad = _round_up(hidden, 128)
    o_pad = _round_up(out_dim, 128)
    n_tiles = max(_cdiv(b, block_b), 2 if b >= 16 else 1)
    bt = _round_up(_cdiv(b, n_tiles), 8)
    grid_n = _cdiv(b, bt)
    b_pad = grid_n * bt

    x_p = jnp.pad(encoder_output.astype(jnp.float32), ((0, b_pad - b), (0, 0)))
    w1x_p = jnp.pad(w1x, ((0, 0), (0, h_pad - hidden))).astype(resident_dtype)
    w1m_p = jnp.pad(w1m, ((0, 0), (0, h_pad - hidden))).astype(resident_dtype)
    b1_p = jnp.pad(b1, (0, h_pad - hidden)).reshape(1, h_pad).astype(jnp.float32)
    w2_p = jnp.pad(w2, ((0, h_pad - hidden),
                        (0, o_pad - out_dim))).astype(resident_dtype)
    b2_p = jnp.pad(b2, (0, o_pad - out_dim)).reshape(1, o_pad).astype(jnp.float32)

    const = lambda i: (0, 0)    # resident operands: same block every grid step
    row = lambda i: (i, 0)      # batch-tiled operands

    def const_spec(shape):
        if single_buffer_residents:
            # Resident operands never change block index -> single-buffer them
            # (halves their VMEM footprint; matters on v7x's 64 MiB).
            return pl.BlockSpec(shape, const, pipeline_mode=pl.Buffered(1))
        return pl.BlockSpec(shape, const)

    # VMEM budget: residents x buffer_count, double-buffered batch tiles,
    # kernel-internal temporaries, 25% + 8 MiB headroom, capped at 85% of the
    # physical VMEM of the device being compiled for.
    rbytes = jnp.dtype(resident_dtype).itemsize
    relu_bytes = jnp.dtype(relu_dtype).itemsize
    res_buf = 1 if single_buffer_residents else 2
    resident = (rbytes * (2 * m * d + 2 * d * h_pad + h_pad * o_pad)
                + 4 * (h_pad + o_pad))
    tiles = 2 * bt * (4 * d + 4 * o_pad + relu_bytes * h_pad)
    temps = 4 * bt * (d + 6 * m + 2 * h_pad + o_pad)
    budget = int(1.25 * (res_buf * resident + tiles + temps)) + (8 << 20)
    try:
        vmem_cap = pltpu.get_tpu_info().vmem_capacity_bytes
    except Exception:                     # info query unavailable -> be conservative
        vmem_cap = 64 << 20
    vmem_limit = int(min(max(budget, 32 << 20), int(0.85 * vmem_cap)))

    out_p, relu_p = pl.pallas_call(
        _memory_wrap_kernel,
        grid=(grid_n,),
        in_specs=[
            pl.BlockSpec((bt, d), row),        # encoder_output tile
            const_spec((m, d)),                # memory_set (resident)
            const_spec((d, m)),                # normalized memory^T (resident)
            const_spec((d, h_pad)),            # W1[:d, :]
            const_spec((d, h_pad)),            # W1[d:, :]
            const_spec((1, h_pad)),            # b1
            const_spec((h_pad, o_pad)),        # W2
            const_spec((1, o_pad)),            # b2
        ],
        out_specs=(pl.BlockSpec((bt, o_pad), row),
                   pl.BlockSpec((bt, h_pad), row)),
        out_shape=(jax.ShapeDtypeStruct((b_pad, o_pad), jnp.float32),
                   jax.ShapeDtypeStruct((b_pad, h_pad), relu_dtype)),
        compiler_params=pltpu.CompilerParams(
            dimension_semantics=("parallel",),
            vmem_limit_bytes=vmem_limit),
    )(x_p, mem_r, ynT, w1x_p, w1m_p, b1_p, w2_p, b2_p)

    # TODO(synk): if d % 128 == 0 the two fc1 dots could be fused into a single
    # (bt, 2d) x (2d, h_pad) matmul via a lane-block concat (skipped here:
    # arbitrary d would force an in-kernel relayout).
    return out_p[:b, :out_dim], relu_p[:b, :hidden]


_SINGLE_BUFFER_OK = None   # memoized: does pipeline_mode=Buffered(1) lower here?


def memory_wrap_forward(encoder_output, memory_set, w1, b1, w2, b2, *,
                        block_b=512, resident_dtype=jnp.bfloat16,
                        relu_dtype=jnp.float32):
    """MemoryWrapLayer forward.  Weights in [in, out] layout:
    w1: (2d, hidden), b1: (hidden,), w2: (hidden, out), b2: (out,).
    Returns (output, relu).  resident_dtype=jnp.bfloat16 (default) stores the
    matmul operands in bf16 with f32 accumulation; use jnp.float32 for strict
    PyTorch-parity numerics."""
    global _SINGLE_BUFFER_OK
    kw = dict(block_b=block_b, resident_dtype=resident_dtype,
              relu_dtype=relu_dtype)
    if _SINGLE_BUFFER_OK is not False:
        try:
            out = _memory_wrap_forward(encoder_output, memory_set, w1, b1, w2,
                                       b2, single_buffer_residents=True, **kw)
            _SINGLE_BUFFER_OK = True
            return out
        except Exception:
            # pipeline_mode=pl.Buffered(1) unsupported by this jax/Mosaic build
            # -> fall back to default double-buffered residents.
            _SINGLE_BUFFER_OK = False
    return _memory_wrap_forward(encoder_output, memory_set, w1, b1, w2, b2,
                                single_buffer_residents=False, **kw)


# ------------------------------ pure-JAX reference ------------------------------
def _sparsemax_ref(z):
    z_sorted = jnp.sort(z, axis=1)[:, ::-1]
    k = jnp.arange(1, z.shape[1] + 1, dtype=jnp.float32)[None, :]
    cumsum = jnp.cumsum(z_sorted, axis=1)
    support = (1.0 + k * z_sorted > cumsum).astype(jnp.float32)
    ks = jnp.sum(support, axis=1, keepdims=True)
    tau = (jnp.sum(z_sorted * support, axis=1, keepdims=True) - 1.0) / ks
    return jnp.maximum(z - tau, 0.0)


def _forward_ref(x, mem, w1, b1, w2, b2):
    xn = x / jnp.sqrt(jnp.sum(x * x, axis=1, keepdims=True) + _EPSILON)
    yn = mem / jnp.sqrt(jnp.sum(mem * mem, axis=1, keepdims=True) + _EPSILON)
    dist = 1.0 - xn @ yn.T
    cw = _sparsemax_ref(-dist)
    mv = cw @ mem
    fi = jnp.concatenate([x, mv], axis=1)
    h = fi @ w1 + b1[None, :]
    r = jnp.maximum(h, 0.0)
    o = r @ w2 + b2[None, :]
    return o, r


if __name__ == "__main__":
    # Small shapes consistent with the module: batch=2, encoder_output_dim=32,
    # m=8 memory samples, output_dim=8; MLP dims [2d, 4d, out] = [64, 128, 8].
    b, d, m, out_dim = 2, 32, 8, 8
    hidden = 4 * d

    key = jax.random.PRNGKey(0)
    kx, km, kw1, kb1, kw2, kb2, kx2 = jax.random.split(key, 7)

    encoder_output = jax.random.normal(kx, (b, d), dtype=jnp.float32)
    memory_set = jax.random.normal(km, (m, d), dtype=jnp.float32)

    # Deterministic init mimicking torch.nn.Linear default (uniform ±1/sqrt(fan_in)),
    # stored as [in, out] so the kernel computes y = x @ W + b.
    lim1 = 1.0 / np.sqrt(2 * d)
    lim2 = 1.0 / np.sqrt(hidden)
    w1 = jax.random.uniform(kw1, (2 * d, hidden), jnp.float32, -lim1, lim1)
    b1 = jax.random.uniform(kb1, (hidden,), jnp.float32, -lim1, lim1)
    w2 = jax.random.uniform(kw2, (hidden, out_dim), jnp.float32, -lim2, lim2)
    b2 = jax.random.uniform(kb2, (out_dim,), jnp.float32, -lim2, lim2)

    ref_out, ref_relu = _forward_ref(encoder_output, memory_set, w1, b1, w2, b2)

    # 1) strict-parity path (f32 residents): must match the reference tightly.
    out, relu = memory_wrap_forward(encoder_output, memory_set, w1, b1, w2, b2,
                                    resident_dtype=jnp.float32)
    out, relu = jax.block_until_ready((out, relu))
    np.testing.assert_allclose(np.asarray(out), np.asarray(ref_out),
                               rtol=1e-4, atol=1e-4)
    np.testing.assert_allclose(np.asarray(relu), np.asarray(ref_relu),
                               rtol=1e-4, atol=1e-4)

    # 2) multi-tile path (b=20 -> 2 grid steps, near-equal 8-aligned tiles).
    x_big = jax.random.normal(kx2, (20, d), dtype=jnp.float32)
    ref_out_b, ref_relu_b = _forward_ref(x_big, memory_set, w1, b1, w2, b2)
    out_b, relu_b = memory_wrap_forward(x_big, memory_set, w1, b1, w2, b2,
                                        resident_dtype=jnp.float32)
    out_b, relu_b = jax.block_until_ready((out_b, relu_b))
    np.testing.assert_allclose(np.asarray(out_b), np.asarray(ref_out_b),
                               rtol=1e-4, atol=1e-4)
    np.testing.assert_allclose(np.asarray(relu_b), np.asarray(ref_relu_b),
                               rtol=1e-4, atol=1e-4)

    # 3) default fast path (bf16 residents, f32 accumulation): looser tolerance.
    out16, relu16 = memory_wrap_forward(encoder_output, memory_set, w1, b1, w2, b2)
    out16, relu16 = jax.block_until_ready((out16, relu16))
    np.testing.assert_allclose(np.asarray(out16), np.asarray(ref_out),
                               rtol=5e-2, atol=5e-2)
    np.testing.assert_allclose(np.asarray(relu16), np.asarray(ref_relu),
                               rtol=5e-2, atol=5e-2)

    print("KERNEL_OK")
</pallas_src>

<mosaic_0001>
module attributes {stable_mosaic.version = 11 : i64} {
  func.func @_memory_wrap_kernel(%arg0: i32, %arg1: memref<8x32xf32, #tpu.memory_space<vmem>>, %arg2: memref<8x32xf32, #tpu.memory_space<vmem>>, %arg3: memref<32x8xf32, #tpu.memory_space<vmem>>, %arg4: memref<32x128xf32, #tpu.memory_space<vmem>>, %arg5: memref<32x128xf32, #tpu.memory_space<vmem>>, %arg6: memref<1x128xf32, #tpu.memory_space<vmem>>, %arg7: memref<128x128xf32, #tpu.memory_space<vmem>>, %arg8: memref<1x128xf32, #tpu.memory_space<vmem>>, %arg9: memref<8x128xf32, #tpu.memory_space<vmem>>, %arg10: memref<8x128xf32, #tpu.memory_space<vmem>>) attributes {dimension_semantics = [#tpu.dimension_semantics<parallel>], iteration_bounds = array<i64: 1>, scalar_prefetch = 0 : i64, scratch_operands = 0 : i64, tpu.core_type = #tpu.core_type<tc>, window_params = [{transform_indices = @transform_0, window_bounds = array<i64: 8, 32>}, {pipeline_mode = #tpu.pipeline_mode<synchronous>, transform_indices = @transform_1, window_bounds = array<i64: 8, 32>}, {pipeline_mode = #tpu.pipeline_mode<synchronous>, transform_indices = @transform_2, window_bounds = array<i64: 32, 8>}, {pipeline_mode = #tpu.pipeline_mode<synchronous>, transform_indices = @transform_3, window_bounds = array<i64: 32, 128>}, {pipeline_mode = #tpu.pipeline_mode<synchronous>, transform_indices = @transform_4, window_bounds = array<i64: 32, 128>}, {pipeline_mode = #tpu.pipeline_mode<synchronous>, transform_indices = @transform_5, window_bounds = array<i64: 1, 128>}, {pipeline_mode = #tpu.pipeline_mode<synchronous>, transform_indices = @transform_6, window_bounds = array<i64: 128, 128>}, {pipeline_mode = #tpu.pipeline_mode<synchronous>, transform_indices = @transform_7, window_bounds = array<i64: 1, 128>}, {transform_indices = @transform_8, window_bounds = array<i64: 8, 128>}, {transform_indices = @transform_9, window_bounds = array<i64: 8, 128>}]} {
    %c0 = arith.constant 0 : index
    %c0_0 = arith.constant 0 : index
    %0 = vector.load %arg1[%c0, %c0_0] : memref<8x32xf32, #tpu.memory_space<vmem>>, vector<8x32xf32>
    %1 = arith.mulf %0, %0 : vector<8x32xf32>
    %cst = arith.constant dense<0.000000e+00> : vector<8xf32>
    %2 = vector.multi_reduction <add>, %1, %cst [1] : vector<8x32xf32> to vector<8xf32>
    %3 = vector.shape_cast %2 : vector<8xf32> to vector<8x1xf32>
    %cst_1 = arith.constant 9.99999997E-7 : f32
    %4 = vector.broadcast %cst_1 : f32 to vector<8x1xf32>
    %5 = arith.addf %3, %4 : vector<8x1xf32>
    %6 = math.rsqrt %5 : vector<8x1xf32>
    %7 = vector.broadcast %6 : vector<8x1xf32> to vector<8x32xf32>
    %8 = arith.mulf %0, %7 : vector<8x32xf32>
    %c0_2 = arith.constant 0 : index
    %c0_3 = arith.constant 0 : index
    %9 = vector.load %arg3[%c0_2, %c0_3] : memref<32x8xf32, #tpu.memory_space<vmem>>, vector<32x8xf32>
    %cst_4 = arith.constant dense<0.000000e+00> : vector<8x8xf32>
    %10 = tpu.matmul %8, %9, %cst_4 {dimension_numbers = #tpu.dot_dimension_numbers<[1], [0], [0], [1], [0, 0, 1, 1], [], []>} : vector<8x32xf32>, vector<32x8xf32>, vector<8x8xf32> -> vector<8x8xf32>
    %cst_5 = arith.constant dense<0xFF800000> : vector<8xf32>
    %11 = vector.multi_reduction <maximumf>, %10, %cst_5 [1] : vector<8x8xf32> to vector<8xf32>
    %12 = vector.shape_cast %11 : vector<8xf32> to vector<8x1xf32>
    %cst_6 = arith.constant 1.000000e+00 : f32
    %13 = vector.broadcast %cst_6 : f32 to vector<8x1xf32>
    %14 = arith.subf %12, %13 : vector<8x1xf32>
    %c0_i32 = arith.constant 0 : i32
    %15 = arith.subf %12, %14 : vector<8x1xf32>
    %cst_7 = arith.constant 2.500000e-01 : f32
    %16 = vector.broadcast %cst_7 : f32 to vector<8x1xf32>
    %17 = arith.mulf %16, %15 : vector<8x1xf32>
    %18 = arith.addf %14, %17 : vector<8x1xf32>
    %cst_8 = arith.constant 5.000000e-01 : f32
    %19 = vector.broadcast %cst_8 : f32 to vector<8x1xf32>
    %20 = arith.mulf %19, %15 : vector<8x1xf32>
    %21 = arith.addf %14, %20 : vector<8x1xf32>
    %cst_9 = arith.constant 7.500000e-01 : f32
    %22 = vector.broadcast %cst_9 : f32 to vector<8x1xf32>
    %23 = arith.mulf %22, %15 : vector<8x1xf32>
    %24 = arith.addf %14, %23 : vector<8x1xf32>
    %25 = vector.broadcast %18 : vector<8x1xf32> to vector<8x8xf32>
    %26 = arith.subf %10, %25 : vector<8x8xf32>
    %cst_10 = arith.constant 0.000000e+00 : f32
    %27 = vector.broadcast %cst_10 : f32 to vector<8x8xf32>
    %28 = arith.maximumf %26, %27 : vector<8x8xf32>
    %cst_11 = arith.constant dense<0.000000e+00> : vector<8xf32>
    %29 = vector.multi_reduction <add>, %28, %cst_11 [1] : vector<8x8xf32> to vector<8xf32>
    %30 = vector.shape_cast %29 : vector<8xf32> to vector<8x1xf32>
    %cst_12 = arith.constant 1.000000e+00 : f32
    %31 = vector.broadcast %cst_12 : f32 to vector<8x1xf32>
    %32 = arith.cmpf olt, %30, %31 : vector<8x1xf32>
    %33 = vector.broadcast %21 : vector<8x1xf32> to vector<8x8xf32>
    %34 = arith.subf %10, %33 : vector<8x8xf32>
    %cst_13 = arith.constant 0.000000e+00 : f32
    %35 = vector.broadcast %cst_13 : f32 to vector<8x8xf32>
    %36 = arith.maximumf %34, %35 : vector<8x8xf32>
    %cst_14 = arith.constant dense<0.000000e+00> : vector<8xf32>
    %37 = vector.multi_reduction <add>, %36, %cst_14 [1] : vector<8x8xf32> to vector<8xf32>
    %38 = vector.shape_cast %37 : vector<8xf32> to vector<8x1xf32>
    %cst_15 = arith.constant 1.000000e+00 : f32
    %39 = vector.broadcast %cst_15 : f32 to vector<8x1xf32>
    %40 = arith.cmpf olt, %38, %39 : vector<8x1xf32>
    %41 = vector.broadcast %24 : vector<8x1xf32> to vector<8x8xf32>
    %42 = arith.subf %10, %41 : vector<8x8xf32>
    %cst_16 = arith.constant 0.000000e+00 : f32
    %43 = vector.broadcast %cst_16 : f32 to vector<8x8xf32>
    %44 = arith.maximumf %42, %43 : vector<8x8xf32>
    %cst_17 = arith.constant dense<0.000000e+00> : vector<8xf32>
    %45 = vector.multi_reduction <add>, %44, %cst_17 [1] : vector<8x8xf32> to vector<8xf32>
    %46 = vector.shape_cast %45 : vector<8xf32> to vector<8x1xf32>
    %cst_18 = arith.constant 1.000000e+00 : f32
    %47 = vector.broadcast %cst_18 : f32 to vector<8x1xf32>
    %48 = arith.cmpf olt, %46, %47 : vector<8x1xf32>
    %49 = arith.select %48, %21, %24 : vector<8x1xi1>, vector<8x1xf32>
    %50 = arith.select %40, %18, %49 : vector<8x1xi1>, vector<8x1xf32>
    %51 = arith.select %32, %14, %50 : vector<8x1xi1>, vector<8x1xf32>
    %52 = arith.select %48, %24, %12 : vector<8x1xi1>, vector<8x1xf32>
    %53 = arith.select %40, %21, %52 : vector<8x1xi1>, vector<8x1xf32>
    %54 = arith.select %32, %18, %53 : vector<8x1xi1>, vector<8x1xf32>
    %c1_i32 = arith.constant 1 : i32
    %55 = arith.subf %54, %51 : vector<8x1xf32>
    %cst_19 = arith.constant 2.500000e-01 : f32
    %56 = vector.broadcast %cst_19 : f32 to vector<8x1xf32>
    %57 = arith.mulf %56, %55 : vector<8x1xf32>
    %58 = arith.addf %51, %57 : vector<8x1xf32>
    %cst_20 = arith.constant 5.000000e-01 : f32
    %59 = vector.broadcast %cst_20 : f32 to vector<8x1xf32>
    %60 = arith.mulf %59, %55 : vector<8x1xf32>
    %61 = arith.addf %51, %60 : vector<8x1xf32>
    %cst_21 = arith.constant 7.500000e-01 : f32
    %62 = vector.broadcast %cst_21 : f32 to vector<8x1xf32>
    %63 = arith.mulf %62, %55 : vector<8x1xf32>
    %64 = arith.addf %51, %63 : vector<8x1xf32>
    %65 = vector.broadcast %58 : vector<8x1xf32> to vector<8x8xf32>
    %66 = arith.subf %10, %65 : vector<8x8xf32>
    %cst_22 = arith.constant 0.000000e+00 : f32
    %67 = vector.broadcast %cst_22 : f32 to vector<8x8xf32>
    %68 = arith.maximumf %66, %67 : vector<8x8xf32>
    %cst_23 = arith.constant dense<0.000000e+00> : vector<8xf32>
    %69 = vector.multi_reduction <add>, %68, %cst_23 [1] : vector<8x8xf32> to vector<8xf32>
    %70 = vector.shape_cast %69 : vector<8xf32> to vector<8x1xf32>
    %cst_24 = arith.constant 1.000000e+00 : f32
    %71 = vector.broadcast %cst_24 : f32 to vector<8x1xf32>
    %72 = arith.cmpf olt, %70, %71 : vector<8x1xf32>
    %73 = vector.broadcast %61 : vector<8x1xf32> to vector<8x8xf32>
    %74 = arith.subf %10, %73 : vector<8x8xf32>
    %cst_25 = arith.constant 0.000000e+00 : f32
    %75 = vector.broadcast %cst_25 : f32 to vector<8x8xf32>
    %76 = arith.maximumf %74, %75 : vector<8x8xf32>
    %cst_26 = arith.constant dense<0.000000e+00> : vector<8xf32>
    %77 = vector.multi_reduction <add>, %76, %cst_26 [1] : vector<8x8xf32> to vector<8xf32>
    %78 = vector.shape_cast %77 : vector<8xf32> to vector<8x1xf32>
    %cst_27 = arith.constant 1.000000e+00 : f32
    %79 = vector.broadcast %cst_27 : f32 to vector<8x1xf32>
    %80 = arith.cmpf olt, %78, %79 : vector<8x1xf32>
    %81 = vector.broadcast %64 : vector<8x1xf32> to vector<8x8xf32>
    %82 = arith.subf %10, %81 : vector<8x8xf32>
    %cst_28 = arith.constant 0.000000e+00 : f32
    %83 = vector.broadcast %cst_28 : f32 to vector<8x8xf32>
    %84 = arith.maximumf %82, %83 : vector<8x8xf32>
    %cst_29 = arith.constant dense<0.000000e+00> : vector<8xf32>
    %85 = vector.multi_reduction <add>, %84, %cst_29 [1] : vector<8x8xf32> to vector<8xf32>
    %86 = vector.shape_cast %85 : vector<8xf32> to vector<8x1xf32>
    %cst_30 = arith.constant 1.000000e+00 : f32
    %87 = vector.broadcast %cst_30 : f32 to vector<8x1xf32>
    %88 = arith.cmpf olt, %86, %87 : vector<8x1xf32>
    %89 = arith.select %88, %61, %64 : vector<8x1xi1>, vector<8x1xf32>
    %90 = arith.select %80, %58, %89 : vector<8x1xi1>, vector<8x1xf32>
    %91 = arith.select %72, %51, %90 : vector<8x1xi1>, vector<8x1xf32>
    %92 = arith.select %88, %64, %54 : vector<8x1xi1>, vector<8x1xf32>
    %93 = arith.select %80, %61, %92 : vector<8x1xi1>, vector<8x1xf32>
    %94 = arith.select %72, %58, %93 : vector<8x1xi1>, vector<8x1xf32>
    %c2_i32 = arith.constant 2 : i32
    %95 = arith.subf %94, %91 : vector<8x1xf32>
    %cst_31 = arith.constant 2.500000e-01 : f32
    %96 = vector.broadcast %cst_31 : f32 to vector<8x1xf32>
    %97 = arith.mulf %96, %95 : vector<8x1xf32>
    %98 = arith.addf %91, %97 : vector<8x1xf32>
    %cst_32 = arith.constant 5.000000e-01 : f32
    %99 = vector.broadcast %cst_32 : f32 to vector<8x1xf32>
    %100 = arith.mulf %99, %95 : vector<8x1xf32>
    %101 = arith.addf %91, %100 : vector<8x1xf32>
    %cst_33 = arith.constant 7.500000e-01 : f32
    %102 = vector.broadcast %cst_33 : f32 to vector<8x1xf32>
    %103 = arith.mulf %102, %95 : vector<8x1xf32>
    %104 = arith.addf %91, %103 : vector<8x1xf32>
    %105 = vector.broadcast %98 : vector<8x1xf32> to vector<8x8xf32>
    %106 = arith.subf %10, %105 : vector<8x8xf32>
    %cst_34 = arith.constant 0.000000e+00 : f32
    %107 = vector.broadcast %cst_34 : f32 to vector<8x8xf32>
    %108 = arith.maximumf %106, %107 : vector<8x8xf32>
    %cst_35 = arith.constant dense<0.000000e+00> : vector<8xf32>
    %109 = vector.multi_reduction <add>, %108, %cst_35 [1] : vector<8x8xf32> to vector<8xf32>
    %110 = vector.shape_cast %109 : vector<8xf32> to vector<8x1xf32>
    %cst_36 = arith.constant 1.000000e+00 : f32
    %111 = vector.broadcast %cst_36 : f32 to vector<8x1xf32>
    %112 = arith.cmpf olt, %110, %111 : vector<8x1xf32>
    %113 = vector.broadcast %101 : vector<8x1xf32> to vector<8x8xf32>
    %114 = arith.subf %10, %113 : vector<8x8xf32>
    %cst_37 = arith.constant 0.000000e+00 : f32
    %115 = vector.broadcast %cst_37 : f32 to vector<8x8xf32>
    %116 = arith.maximumf %114, %115 : vector<8x8xf32>
    %cst_38 = arith.constant dense<0.000000e+00> : vector<8xf32>
    %117 = vector.multi_reduction <add>, %116, %cst_38 [1] : vector<8x8xf32> to vector<8xf32>
    %118 = vector.shape_cast %117 : vector<8xf32> to vector<8x1xf32>
    %cst_39 = arith.constant 1.000000e+00 : f32
    %119 = vector.broadcast %cst_39 : f32 to vector<8x1xf32>
    %120 = arith.cmpf olt, %118, %119 : vector<8x1xf32>
    %121 = vector.broadcast %104 : vector<8x1xf32> to vector<8x8xf32>
    %122 = arith.subf %10, %121 : vector<8x8xf32>
    %cst_40 = arith.constant 0.000000e+00 : f32
    %123 = vector.broadcast %cst_40 : f32 to vector<8x8xf32>
    %124 = arith.maximumf %122, %123 : vector<8x8xf32>
    %cst_41 = arith.constant dense<0.000000e+00> : vector<8xf32>
    %125 = vector.multi_reduction <add>, %124, %cst_41 [1] : vector<8x8xf32> to vector<8xf32>
    %126 = vector.shape_cast %125 : vector<8xf32> to vector<8x1xf32>
    %cst_42 = arith.constant 1.000000e+00 : f32
    %127 = vector.broadcast %cst_42 : f32 to vector<8x1xf32>
    %128 = arith.cmpf olt, %126, %127 : vector<8x1xf32>
    %129 = arith.select %128, %101, %104 : vector<8x1xi1>, vector<8x1xf32>
    %130 = arith.select %120, %98, %129 : vector<8x1xi1>, vector<8x1xf32>
    %131 = arith.select %112, %91, %130 : vector<8x1xi1>, vector<8x1xf32>
    %132 = arith.select %128, %104, %94 : vector<8x1xi1>, vector<8x1xf32>
    %133 = arith.select %120, %101, %132 : vector<8x1xi1>, vector<8x1xf32>
    %134 = arith.select %112, %98, %133 : vector<8x1xi1>, vector<8x1xf32>
    %c3_i32 = arith.constant 3 : i32
    %135 = arith.subf %134, %131 : vector<8x1xf32>
    %cst_43 = arith.constant 2.500000e-01 : f32
    %136 = vector.broadcast %cst_43 : f32 to vector<8x1xf32>
    %137 = arith.mulf %136, %135 : vector<8x1xf32>
    %138 = arith.addf %131, %137 : vector<8x1xf32>
    %cst_44 = arith.constant 5.000000e-01 : f32
    %139 = vector.broadcast %cst_44 : f32 to vector<8x1xf32>
    %140 = arith.mulf %139, %135 : vector<8x1xf32>
    %141 = arith.addf %131, %140 : vector<8x1xf32>
    %cst_45 = arith.constant 7.500000e-01 : f32
    %142 = vector.broadcast %cst_45 : f32 to vector<8x1xf32>
    %143 = arith.mulf %142, %135 : vector<8x1xf32>
    %144 = arith.addf %131, %143 : vector<8x1xf32>
    %145 = vector.broadcast %138 : vector<8x1xf32> to vector<8x8xf32>
    %146 = arith.subf %10, %145 : vector<8x8xf32>
    %cst_46 = arith.constant 0.000000e+00 : f32
    %147 = vector.broadcast %cst_46 : f32 to vector<8x8xf32>
    %148 = arith.maximumf %146, %147 : vector<8x8xf32>
    %cst_47 = arith.constant dense<0.000000e+00> : vector<8xf32>
    %149 = vector.multi_reduction <add>, %148, %cst_47 [1] : vector<8x8xf32> to vector<8xf32>
    %150 = vector.shape_cast %149 : vector<8xf32> to vector<8x1xf32>
    %cst_48 = arith.constant 1.000000e+00 : f32
    %151 = vector.broadcast %cst_48 : f32 to vector<8x1xf32>
    %152 = arith.cmpf olt, %150, %151 : vector<8x1xf32>
    %153 = vector.broadcast %141 : vector<8x1xf32> to vector<8x8xf32>
    %154 = arith.subf %10, %153 : vector<8x8xf32>
    %cst_49 = arith.constant 0.000000e+00 : f32
    %155 = vector.broadcast %cst_49 : f32 to vector<8x8xf32>
    %156 = arith.maximumf %154, %155 : vector<8x8xf32>
    %cst_50 = arith.constant dense<0.000000e+00> : vector<8xf32>
    %157 = vector.multi_reduction <add>, %156, %cst_50 [1] : vector<8x8xf32> to vector<8xf32>
    %158 = vector.shape_cast %157 : vector<8xf32> to vector<8x1xf32>
    %cst_51 = arith.constant 1.000000e+00 : f32
    %159 = vector.broadcast %cst_51 : f32 to vector<8x1xf32>
    %160 = arith.cmpf olt, %158, %159 : vector<8x1xf32>
    %161 = vector.broadcast %144 : vector<8x1xf32> to vector<8x8xf32>
    %162 = arith.subf %10, %161 : vector<8x8xf32>
    %cst_52 = arith.constant 0.000000e+00 : f32
    %163 = vector.broadcast %cst_52 : f32 to vector<8x8xf32>
    %164 = arith.maximumf %162, %163 : vector<8x8xf32>
    %cst_53 = arith.constant dense<0.000000e+00> : vector<8xf32>
    %165 = vector.multi_reduction <add>, %164, %cst_53 [1] : vector<8x8xf32> to vector<8xf32>
    %166 = vector.shape_cast %165 : vector<8xf32> to vector<8x1xf32>
    %cst_54 = arith.constant 1.000000e+00 : f32
    %167 = vector.broadcast %cst_54 : f32 to vector<8x1xf32>
    %168 = arith.cmpf olt, %166, %167 : vector<8x1xf32>
    %169 = arith.select %168, %141, %144 : vector<8x1xi1>, vector<8x1xf32>
    %170 = arith.select %160, %138, %169 : vector<8x1xi1>, vector<8x1xf32>
    %171 = arith.select %152, %131, %170 : vector<8x1xi1>, vector<8x1xf32>
    %172 = arith.select %168, %144, %134 : vector<8x1xi1>, vector<8x1xf32>
    %173 = arith.select %160, %141, %172 : vector<8x1xi1>, vector<8x1xf32>
    %174 = arith.select %152, %138, %173 : vector<8x1xi1>, vector<8x1xf32>
    %c4_i32 = arith.constant 4 : i32
    %175 = arith.subf %174, %171 : vector<8x1xf32>
    %cst_55 = arith.constant 2.500000e-01 : f32
    %176 = vector.broadcast %cst_55 : f32 to vector<8x1xf32>
    %177 = arith.mulf %176, %175 : vector<8x1xf32>
    %178 = arith.addf %171, %177 : vector<8x1xf32>
    %cst_56 = arith.constant 5.000000e-01 : f32
    %179 = vector.broadcast %cst_56 : f32 to vector<8x1xf32>
    %180 = arith.mulf %179, %175 : vector<8x1xf32>
    %181 = arith.addf %171, %180 : vector<8x1xf32>
    %cst_57 = arith.constant 7.500000e-01 : f32
    %182 = vector.broadcast %cst_57 : f32 to vector<8x1xf32>
    %183 = arith.mulf %182, %175 : vector<8x1xf32>
    %184 = arith.addf %171, %183 : vector<8x1xf32>
    %185 = vector.broadcast %178 : vector<8x1xf32> to vector<8x8xf32>
    %186 = arith.subf %10, %185 : vector<8x8xf32>
    %cst_58 = arith.constant 0.000000e+00 : f32
    %187 = vector.broadcast %cst_58 : f32 to vector<8x8xf32>
    %188 = arith.maximumf %186, %187 : vector<8x8xf32>
    %cst_59 = arith.constant dense<0.000000e+00> : vector<8xf32>
    %189 = vector.multi_reduction <add>, %188, %cst_59 [1] : vector<8x8xf32> to vector<8xf32>
    %190 = vector.shape_cast %189 : vector<8xf32> to vector<8x1xf32>
    %cst_60 = arith.constant 1.000000e+00 : f32
    %191 = vector.broadcast %cst_60 : f32 to vector<8x1xf32>
    %192 = arith.cmpf olt, %190, %191 : vector<8x1xf32>
    %193 = vector.broadcast %181 : vector<8x1xf32> to vector<8x8xf32>
    %194 = arith.subf %10, %193 : vector<8x8xf32>
    %cst_61 = arith.constant 0.000000e+00 : f32
    %195 = vector.broadcast %cst_61 : f32 to vector<8x8xf32>
    %196 = arith.maximumf %194, %195 : vector<8x8xf32>
    %cst_62 = arith.constant dense<0.000000e+00> : vector<8xf32>
    %197 = vector.multi_reduction <add>, %196, %cst_62 [1] : vector<8x8xf32> to vector<8xf32>
    %198 = vector.shape_cast %197 : vector<8xf32> to vector<8x1xf32>
    %cst_63 = arith.constant 1.000000e+00 : f32
    %199 = vector.broadcast %cst_63 : f32 to vector<8x1xf32>
    %200 = arith.cmpf olt, %198, %199 : vector<8x1xf32>
    %201 = vector.broadcast %184 : vector<8x1xf32> to vector<8x8xf32>
    %202 = arith.subf %10, %201 : vector<8x8xf32>
    %cst_64 = arith.constant 0.000000e+00 : f32
    %203 = vector.broadcast %cst_64 : f32 to vector<8x8xf32>
    %204 = arith.maximumf %202, %203 : vector<8x8xf32>
    %cst_65 = arith.constant dense<0.000000e+00> : vector<8xf32>
    %205 = vector.multi_reduction <add>, %204, %cst_65 [1] : vector<8x8xf32> to vector<8xf32>
    %206 = vector.shape_cast %205 : vector<8xf32> to vector<8x1xf32>
    %cst_66 = arith.constant 1.000000e+00 : f32
    %207 = vector.broadcast %cst_66 : f32 to vector<8x1xf32>
    %208 = arith.cmpf olt, %206, %207 : vector<8x1xf32>
    %209 = arith.select %208, %181, %184 : vector<8x1xi1>, vector<8x1xf32>
    %210 = arith.select %200, %178, %209 : vector<8x1xi1>, vector<8x1xf32>
    %211 = arith.select %192, %171, %210 : vector<8x1xi1>, vector<8x1xf32>
    %212 = arith.select %208, %184, %174 : vector<8x1xi1>, vector<8x1xf32>
    %213 = arith.select %200, %181, %212 : vector<8x1xi1>, vector<8x1xf32>
    %214 = arith.select %192, %178, %213 : vector<8x1xi1>, vector<8x1xf32>
    %c5_i32 = arith.constant 5 : i32
    %215 = arith.subf %214, %211 : vector<8x1xf32>
    %cst_67 = arith.constant 2.500000e-01 : f32
    %216 = vector.broadcast %cst_67 : f32 to vector<8x1xf32>
    %217 = arith.mulf %216, %215 : vector<8x1xf32>
    %218 = arith.addf %211, %217 : vector<8x1xf32>
    %cst_68 = arith.constant 5.000000e-01 : f32
    %219 = vector.broadcast %cst_68 : f32 to vector<8x1xf32>
    %220 = arith.mulf %219, %215 : vector<8x1xf32>
    %221 = arith.addf %211, %220 : vector<8x1xf32>
    %cst_69 = arith.constant 7.500000e-01 : f32
    %222 = vector.broadcast %cst_69 : f32 to vector<8x1xf32>
    %223 = arith.mulf %222, %215 : vector<8x1xf32>
    %224 = arith.addf %211, %223 : vector<8x1xf32>
    %225 = vector.broadcast %218 : vector<8x1xf32> to vector<8x8xf32>
    %226 = arith.subf %10, %225 : vector<8x8xf32>
    %cst_70 = arith.constant 0.000000e+00 : f32
    %227 = vector.broadcast %cst_70 : f32 to vector<8x8xf32>
    %228 = arith.maximumf %226, %227 : vector<8x8xf32>
    %cst_71 = arith.constant dense<0.000000e+00> : vector<8xf32>
    %229 = vector.multi_reduction <add>, %228, %cst_71 [1] : vector<8x8xf32> to vector<8xf32>
    %230 = vector.shape_cast %229 : vector<8xf32> to vector<8x1xf32>
    %cst_72 = arith.constant 1.000000e+00 : f32
    %231 = vector.broadcast %cst_72 : f32 to vector<8x1xf32>
    %232 = arith.cmpf olt, %230, %231 : vector<8x1xf32>
    %233 = vector.broadcast %221 : vector<8x1xf32> to vector<8x8xf32>
    %234 = arith.subf %10, %233 : vector<8x8xf32>
    %cst_73 = arith.constant 0.000000e+00 : f32
    %235 = vector.broadcast %cst_73 : f32 to vector<8x8xf32>
    %236 = arith.maximumf %234, %235 : vector<8x8xf32>
    %cst_74 = arith.constant dense<0.000000e+00> : vector<8xf32>
    %237 = vector.multi_reduction <add>, %236, %cst_74 [1] : vector<8x8xf32> to vector<8xf32>
    %238 = vector.shape_cast %237 : vector<8xf32> to vector<8x1xf32>
    %cst_75 = arith.constant 1.000000e+00 : f32
    %239 = vector.broadcast %cst_75 : f32 to vector<8x1xf32>
    %240 = arith.cmpf olt, %238, %239 : vector<8x1xf32>
    %241 = vector.broadcast %224 : vector<8x1xf32> to vector<8x8xf32>
    %242 = arith.subf %10, %241 : vector<8x8xf32>
    %cst_76 = arith.constant 0.000000e+00 : f32
    %243 = vector.broadcast %cst_76 : f32 to vector<8x8xf32>
    %244 = arith.maximumf %242, %243 : vector<8x8xf32>
    %cst_77 = arith.constant dense<0.000000e+00> : vector<8xf32>
    %245 = vector.multi_reduction <add>, %244, %cst_77 [1] : vector<8x8xf32> to vector<8xf32>
    %246 = vector.shape_cast %245 : vector<8xf32> to vector<8x1xf32>
    %cst_78 = arith.constant 1.000000e+00 : f32
    %247 = vector.broadcast %cst_78 : f32 to vector<8x1xf32>
    %248 = arith.cmpf olt, %246, %247 : vector<8x1xf32>
    %249 = arith.select %248, %221, %224 : vector<8x1xi1>, vector<8x1xf32>
    %250 = arith.select %240, %218, %249 : vector<8x1xi1>, vector<8x1xf32>
    %251 = arith.select %232, %211, %250 : vector<8x1xi1>, vector<8x1xf32>
    %252 = arith.select %248, %224, %214 : vector<8x1xi1>, vector<8x1xf32>
    %253 = arith.select %240, %221, %252 : vector<8x1xi1>, vector<8x1xf32>
    %254 = arith.select %232, %218, %253 : vector<8x1xi1>, vector<8x1xf32>
    %c6_i32 = arith.constant 6 : i32
    %255 = arith.subf %254, %251 : vector<8x1xf32>
    %cst_79 = arith.constant 2.500000e-01 : f32
    %256 = vector.broadcast %cst_79 : f32 to vector<8x1xf32>
    %257 = arith.mulf %256, %255 : vector<8x1xf32>
    %258 = arith.addf %251, %257 : vector<8x1xf32>
    %cst_80 = arith.constant 5.000000e-01 : f32
    %259 = vector.broadcast %cst_80 : f32 to vector<8x1xf32>
    %260 = arith.mulf %259, %255 : vector<8x1xf32>
    %261 = arith.addf %251, %260 : vector<8x1xf32>
    %cst_81 = arith.constant 7.500000e-01 : f32
    %262 = vector.broadcast %cst_81 : f32 to vector<8x1xf32>
    %263 = arith.mulf %262, %255 : vector<8x1xf32>
    %264 = arith.addf %251, %263 : vector<8x1xf32>
    %265 = vector.broadcast %258 : vector<8x1xf32> to vector<8x8xf32>
    %266 = arith.subf %10, %265 : vector<8x8xf32>
    %cst_82 = arith.constant 0.000000e+00 : f32
    %267 = vector.broadcast %cst_82 : f32 to vector<8x8xf32>
    %268 = arith.maximumf %266, %267 : vector<8x8xf32>
    %cst_83 = arith.constant dense<0.000000e+00> : vector<8xf32>
    %269 = vector.multi_reduction <add>, %268, %cst_83 [1] : vector<8x8xf32> to vector<8xf32>
    %270 = vector.shape_cast %269 : vector<8xf32> to vector<8x1xf32>
    %cst_84 = arith.constant 1.000000e+00 : f32
    %271 = vector.broadcast %cst_84 : f32 to vector<8x1xf32>
    %272 = arith.cmpf olt, %270, %271 : vector<8x1xf32>
    %273 = vector.broadcast %261 : vector<8x1xf32> to vector<8x8xf32>
    %274 = arith.subf %10, %273 : vector<8x8xf32>
    %cst_85 = arith.constant 0.000000e+00 : f32
    %275 = vector.broadcast %cst_85 : f32 to vector<8x8xf32>
    %276 = arith.maximumf %274, %275 : vector<8x8xf32>
    %cst_86 = arith.constant dense<0.000000e+00> : vector<8xf32>
    %277 = vector.multi_reduction <add>, %276, %cst_86 [1] : vector<8x8xf32> to vector<8xf32>
    %278 = vector.shape_cast %277 : vector<8xf32> to vector<8x1xf32>
    %cst_87 = arith.constant 1.000000e+00 : f32
    %279 = vector.broadcast %cst_87 : f32 to vector<8x1xf32>
    %280 = arith.cmpf olt, %278, %279 : vector<8x1xf32>
    %281 = vector.broadcast %264 : vector<8x1xf32> to vector<8x8xf32>
    %282 = arith.subf %10, %281 : vector<8x8xf32>
    %cst_88 = arith.constant 0.000000e+00 : f32
    %283 = vector.broadcast %cst_88 : f32 to vector<8x8xf32>
    %284 = arith.maximumf %282, %283 : vector<8x8xf32>
    %cst_89 = arith.constant dense<0.000000e+00> : vector<8xf32>
    %285 = vector.multi_reduction <add>, %284, %cst_89 [1] : vector<8x8xf32> to vector<8xf32>
    %286 = vector.shape_cast %285 : vector<8xf32> to vector<8x1xf32>
    %cst_90 = arith.constant 1.000000e+00 : f32
    %287 = vector.broadcast %cst_90 : f32 to vector<8x1xf32>
    %288 = arith.cmpf olt, %286, %287 : vector<8x1xf32>
    %289 = arith.select %288, %261, %264 : vector<8x1xi1>, vector<8x1xf32>
    %290 = arith.select %280, %258, %289 : vector<8x1xi1>, vector<8x1xf32>
    %291 = arith.select %272, %251, %290 : vector<8x1xi1>, vector<8x1xf32>
    %292 = arith.select %288, %264, %254 : vector<8x1xi1>, vector<8x1xf32>
    %293 = arith.select %280, %261, %292 : vector<8x1xi1>, vector<8x1xf32>
    %294 = arith.select %272, %258, %293 : vector<8x1xi1>, vector<8x1xf32>
    %c7_i32 = arith.constant 7 : i32
    %295 = arith.subf %294, %291 : vector<8x1xf32>
    %cst_91 = arith.constant 2.500000e-01 : f32
    %296 = vector.broadcast %cst_91 : f32 to vector<8x1xf32>
    %297 = arith.mulf %296, %295 : vector<8x1xf32>
    %298 = arith.addf %291, %297 : vector<8x1xf32>
    %cst_92 = arith.constant 5.000000e-01 : f32
    %299 = vector.broadcast %cst_92 : f32 to vector<8x1xf32>
    %300 = arith.mulf %299, %295 : vector<8x1xf32>
    %301 = arith.addf %291, %300 : vector<8x1xf32>
    %cst_93 = arith.constant 7.500000e-01 : f32
    %302 = vector.broadcast %cst_93 : f32 to vector<8x1xf32>
    %303 = arith.mulf %302, %295 : vector<8x1xf32>
    %304 = arith.addf %291, %303 : vector<8x1xf32>
    %305 = vector.broadcast %298 : vector<8x1xf32> to vector<8x8xf32>
    %306 = arith.subf %10, %305 : vector<8x8xf32>
    %cst_94 = arith.constant 0.000000e+00 : f32
    %307 = vector.broadcast %cst_94 : f32 to vector<8x8xf32>
    %308 = arith.maximumf %306, %307 : vector<8x8xf32>
    %cst_95 = arith.constant dense<0.000000e+00> : vector<8xf32>
    %309 = vector.multi_reduction <add>, %308, %cst_95 [1] : vector<8x8xf32> to vector<8xf32>
    %310 = vector.shape_cast %309 : vector<8xf32> to vector<8x1xf32>
    %cst_96 = arith.constant 1.000000e+00 : f32
    %311 = vector.broadcast %cst_96 : f32 to vector<8x1xf32>
    %312 = arith.cmpf olt, %310, %311 : vector<8x1xf32>
    %313 = vector.broadcast %301 : vector<8x1xf32> to vector<8x8xf32>
    %314 = arith.subf %10, %313 : vector<8x8xf32>
    %cst_97 = arith.constant 0.000000e+00 : f32
    %315 = vector.broadcast %cst_97 : f32 to vector<8x8xf32>
    %316 = arith.maximumf %314, %315 : vector<8x8xf32>
    %cst_98 = arith.constant dense<0.000000e+00> : vector<8xf32>
    %317 = vector.multi_reduction <add>, %316, %cst_98 [1] : vector<8x8xf32> to vector<8xf32>
    %318 = vector.shape_cast %317 : vector<8xf32> to vector<8x1xf32>
    %cst_99 = arith.constant 1.000000e+00 : f32
    %319 = vector.broadcast %cst_99 : f32 to vector<8x1xf32>
    %320 = arith.cmpf olt, %318, %319 : vector<8x1xf32>
    %321 = vector.broadcast %304 : vector<8x1xf32> to vector<8x8xf32>
    %322 = arith.subf %10, %321 : vector<8x8xf32>
    %cst_100 = arith.constant 0.000000e+00 : f32
    %323 = vector.broadcast %cst_100 : f32 to vector<8x8xf32>
    %324 = arith.maximumf %322, %323 : vector<8x8xf32>
    %cst_101 = arith.constant dense<0.000000e+00> : vector<8xf32>
    %325 = vector.multi_reduction <add>, %324, %cst_101 [1] : vector<8x8xf32> to vector<8xf32>
    %326 = vector.shape_cast %325 : vector<8xf32> to vector<8x1xf32>
    %cst_102 = arith.constant 1.000000e+00 : f32
    %327 = vector.broadcast %cst_102 : f32 to vector<8x1xf32>
    %328 = arith.cmpf olt, %326, %327 : vector<8x1xf32>
    %329 = arith.select %328, %301, %304 : vector<8x1xi1>, vector<8x1xf32>
    %330 = arith.select %320, %298, %329 : vector<8x1xi1>, vector<8x1xf32>
    %331 = arith.select %312, %291, %330 : vector<8x1xi1>, vector<8x1xf32>
    %332 = arith.select %328, %304, %294 : vector<8x1xi1>, vector<8x1xf32>
    %333 = arith.select %320, %301, %332 : vector<8x1xi1>, vector<8x1xf32>
    %334 = arith.select %312, %298, %333 : vector<8x1xi1>, vector<8x1xf32>
    %c8_i32 = arith.constant 8 : i32
    %335 = arith.subf %334, %331 : vector<8x1xf32>
    %cst_103 = arith.constant 2.500000e-01 : f32
    %336 = vector.broadcast %cst_103 : f32 to vector<8x1xf32>
    %337 = arith.mulf %336, %335 : vector<8x1xf32>
    %338 = arith.addf %331, %337 : vector<8x1xf32>
    %cst_104 = arith.constant 5.000000e-01 : f32
    %339 = vector.broadcast %cst_104 : f32 to vector<8x1xf32>
    %340 = arith.mulf %339, %335 : vector<8x1xf32>
    %341 = arith.addf %331, %340 : vector<8x1xf32>
    %cst_105 = arith.constant 7.500000e-01 : f32
    %342 = vector.broadcast %cst_105 : f32 to vector<8x1xf32>
    %343 = arith.mulf %342, %335 : vector<8x1xf32>
    %344 = arith.addf %331, %343 : vector<8x1xf32>
    %345 = vector.broadcast %338 : vector<8x1xf32> to vector<8x8xf32>
    %346 = arith.subf %10, %345 : vector<8x8xf32>
    %cst_106 = arith.constant 0.000000e+00 : f32
    %347 = vector.broadcast %cst_106 : f32 to vector<8x8xf32>
    %348 = arith.maximumf %346, %347 : vector<8x8xf32>
    %cst_107 = arith.constant dense<0.000000e+00> : vector<8xf32>
    %349 = vector.multi_reduction <add>, %348, %cst_107 [1] : vector<8x8xf32> to vector<8xf32>
    %350 = vector.shape_cast %349 : vector<8xf32> to vector<8x1xf32>
    %cst_108 = arith.constant 1.000000e+00 : f32
    %351 = vector.broadcast %cst_108 : f32 to vector<8x1xf32>
    %352 = arith.cmpf olt, %350, %351 : vector<8x1xf32>
    %353 = vector.broadcast %341 : vector<8x1xf32> to vector<8x8xf32>
    %354 = arith.subf %10, %353 : vector<8x8xf32>
    %cst_109 = arith.constant 0.000000e+00 : f32
    %355 = vector.broadcast %cst_109 : f32 to vector<8x8xf32>
    %356 = arith.maximumf %354, %355 : vector<8x8xf32>
    %cst_110 = arith.constant dense<0.000000e+00> : vector<8xf32>
    %357 = vector.multi_reduction <add>, %356, %cst_110 [1] : vector<8x8xf32> to vector<8xf32>
    %358 = vector.shape_cast %357 : vector<8xf32> to vector<8x1xf32>
    %cst_111 = arith.constant 1.000000e+00 : f32
    %359 = vector.broadcast %cst_111 : f32 to vector<8x1xf32>
    %360 = arith.cmpf olt, %358, %359 : vector<8x1xf32>
    %361 = vector.broadcast %344 : vector<8x1xf32> to vector<8x8xf32>
    %362 = arith.subf %10, %361 : vector<8x8xf32>
    %cst_112 = arith.constant 0.000000e+00 : f32
    %363 = vector.broadcast %cst_112 : f32 to vector<8x8xf32>
    %364 = arith.maximumf %362, %363 : vector<8x8xf32>
    %cst_113 = arith.constant dense<0.000000e+00> : vector<8xf32>
    %365 = vector.multi_reduction <add>, %364, %cst_113 [1] : vector<8x8xf32> to vector<8xf32>
    %366 = vector.shape_cast %365 : vector<8xf32> to vector<8x1xf32>
    %cst_114 = arith.constant 1.000000e+00 : f32
    %367 = vector.broadcast %cst_114 : f32 to vector<8x1xf32>
    %368 = arith.cmpf olt, %366, %367 : vector<8x1xf32>
    %369 = arith.select %368, %341, %344 : vector<8x1xi1>, vector<8x1xf32>
    %370 = arith.select %360, %338, %369 : vector<8x1xi1>, vector<8x1xf32>
    %371 = arith.select %352, %331, %370 : vector<8x1xi1>, vector<8x1xf32>
    %372 = arith.select %368, %344, %334 : vector<8x1xi1>, vector<8x1xf32>
    %373 = arith.select %360, %341, %372 : vector<8x1xi1>, vector<8x1xf32>
    %374 = arith.select %352, %338, %373 : vector<8x1xi1>, vector<8x1xf32>
    %c9_i32 = arith.constant 9 : i32
    %375 = arith.subf %374, %371 : vector<8x1xf32>
    %cst_115 = arith.constant 2.500000e-01 : f32
    %376 = vector.broadcast %cst_115 : f32 to vector<8x1xf32>
    %377 = arith.mulf %376, %375 : vector<8x1xf32>
    %378 = arith.addf %371, %377 : vector<8x1xf32>
    %cst_116 = arith.constant 5.000000e-01 : f32
    %379 = vector.broadcast %cst_116 : f32 to vector<8x1xf32>
    %380 = arith.mulf %379, %375 : vector<8x1xf32>
    %381 = arith.addf %371, %380 : vector<8x1xf32>
    %cst_117 = arith.constant 7.500000e-01 : f32
    %382 = vector.broadcast %cst_117 : f32 to vector<8x1xf32>
    %383 = arith.mulf %382, %375 : vector<8x1xf32>
    %384 = arith.addf %371, %383 : vector<8x1xf32>
    %385 = vector.broadcast %378 : vector<8x1xf32> to vector<8x8xf32>
    %386 = arith.subf %10, %385 : vector<8x8xf32>
    %cst_118 = arith.constant 0.000000e+00 : f32
    %387 = vector.broadcast %cst_118 : f32 to vector<8x8xf32>
    %388 = arith.maximumf %386, %387 : vector<8x8xf32>
    %cst_119 = arith.constant dense<0.000000e+00> : vector<8xf32>
    %389 = vector.multi_reduction <add>, %388, %cst_119 [1] : vector<8x8xf32> to vector<8xf32>
    %390 = vector.shape_cast %389 : vector<8xf32> to vector<8x1xf32>
    %cst_120 = arith.constant 1.000000e+00 : f32
    %391 = vector.broadcast %cst_120 : f32 to vector<8x1xf32>
    %392 = arith.cmpf olt, %390, %391 : vector<8x1xf32>
    %393 = vector.broadcast %381 : vector<8x1xf32> to vector<8x8xf32>
    %394 = arith.subf %10, %393 : vector<8x8xf32>
    %cst_121 = arith.constant 0.000000e+00 : f32
    %395 = vector.broadcast %cst_121 : f32 to vector<8x8xf32>
    %396 = arith.maximumf %394, %395 : vector<8x8xf32>
    %cst_122 = arith.constant dense<0.000000e+00> : vector<8xf32>
    %397 = vector.multi_reduction <add>, %396, %cst_122 [1] : vector<8x8xf32> to vector<8xf32>
    %398 = vector.shape_cast %397 : vector<8xf32> to vector<8x1xf32>
    %cst_123 = arith.constant 1.000000e+00 : f32
    %399 = vector.broadcast %cst_123 : f32 to vector<8x1xf32>
    %400 = arith.cmpf olt, %398, %399 : vector<8x1xf32>
    %401 = vector.broadcast %384 : vector<8x1xf32> to vector<8x8xf32>
    %402 = arith.subf %10, %401 : vector<8x8xf32>
    %cst_124 = arith.constant 0.000000e+00 : f32
    %403 = vector.broadcast %cst_124 : f32 to vector<8x8xf32>
    %404 = arith.maximumf %402, %403 : vector<8x8xf32>
    %cst_125 = arith.constant dense<0.000000e+00> : vector<8xf32>
    %405 = vector.multi_reduction <add>, %404, %cst_125 [1] : vector<8x8xf32> to vector<8xf32>
    %406 = vector.shape_cast %405 : vector<8xf32> to vector<8x1xf32>
    %cst_126 = arith.constant 1.000000e+00 : f32
    %407 = vector.broadcast %cst_126 : f32 to vector<8x1xf32>
    %408 = arith.cmpf olt, %406, %407 : vector<8x1xf32>
    %409 = arith.select %408, %381, %384 : vector<8x1xi1>, vector<8x1xf32>
    %410 = arith.select %400, %378, %409 : vector<8x1xi1>, vector<8x1xf32>
    %411 = arith.select %392, %371, %410 : vector<8x1xi1>, vector<8x1xf32>
    %412 = arith.select %408, %384, %374 : vector<8x1xi1>, vector<8x1xf32>
    %413 = arith.select %400, %381, %412 : vector<8x1xi1>, vector<8x1xf32>
    %414 = arith.select %392, %378, %413 : vector<8x1xi1>, vector<8x1xf32>
    %c10_i32 = arith.constant 10 : i32
    %415 = arith.subf %414, %411 : vector<8x1xf32>
    %cst_127 = arith.constant 2.500000e-01 : f32
    %416 = vector.broadcast %cst_127 : f32 to vector<8x1xf32>
    %417 = arith.mulf %416, %415 : vector<8x1xf32>
    %418 = arith.addf %411, %417 : vector<8x1xf32>
    %cst_128 = arith.constant 5.000000e-01 : f32
    %419 = vector.broadcast %cst_128 : f32 to vector<8x1xf32>
    %420 = arith.mulf %419, %415 : vector<8x1xf32>
    %421 = arith.addf %411, %420 : vector<8x1xf32>
    %cst_129 = arith.constant 7.500000e-01 : f32
    %422 = vector.broadcast %cst_129 : f32 to vector<8x1xf32>
    %423 = arith.mulf %422, %415 : vector<8x1xf32>
    %424 = arith.addf %411, %423 : vector<8x1xf32>
    %425 = vector.broadcast %418 : vector<8x1xf32> to vector<8x8xf32>
    %426 = arith.subf %10, %425 : vector<8x8xf32>
    %cst_130 = arith.constant 0.000000e+00 : f32
    %427 = vector.broadcast %cst_130 : f32 to vector<8x8xf32>
    %428 = arith.maximumf %426, %427 : vector<8x8xf32>
    %cst_131 = arith.constant dense<0.000000e+00> : vector<8xf32>
    %429 = vector.multi_reduction <add>, %428, %cst_131 [1] : vector<8x8xf32> to vector<8xf32>
    %430 = vector.shape_cast %429 : vector<8xf32> to vector<8x1xf32>
    %cst_132 = arith.constant 1.000000e+00 : f32
    %431 = vector.broadcast %cst_132 : f32 to vector<8x1xf32>
    %432 = arith.cmpf olt, %430, %431 : vector<8x1xf32>
    %433 = vector.broadcast %421 : vector<8x1xf32> to vector<8x8xf32>
    %434 = arith.subf %10, %433 : vector<8x8xf32>
    %cst_133 = arith.constant 0.000000e+00 : f32
    %435 = vector.broadcast %cst_133 : f32 to vector<8x8xf32>
    %436 = arith.maximumf %434, %435 : vector<8x8xf32>
    %cst_134 = arith.constant dense<0.000000e+00> : vector<8xf32>
    %437 = vector.multi_reduction <add>, %436, %cst_134 [1] : vector<8x8xf32> to vector<8xf32>
    %438 = vector.shape_cast %437 : vector<8xf32> to vector<8x1xf32>
    %cst_135 = arith.constant 1.000000e+00 : f32
    %439 = vector.broadcast %cst_135 : f32 to vector<8x1xf32>
    %440 = arith.cmpf olt, %438, %439 : vector<8x1xf32>
    %441 = vector.broadcast %424 : vector<8x1xf32> to vector<8x8xf32>
    %442 = arith.subf %10, %441 : vector<8x8xf32>
    %cst_136 = arith.constant 0.000000e+00 : f32
    %443 = vector.broadcast %cst_136 : f32 to vector<8x8xf32>
    %444 = arith.maximumf %442, %443 : vector<8x8xf32>
    %cst_137 = arith.constant dense<0.000000e+00> : vector<8xf32>
    %445 = vector.multi_reduction <add>, %444, %cst_137 [1] : vector<8x8xf32> to vector<8xf32>
    %446 = vector.shape_cast %445 : vector<8xf32> to vector<8x1xf32>
    %cst_138 = arith.constant 1.000000e+00 : f32
    %447 = vector.broadcast %cst_138 : f32 to vector<8x1xf32>
    %448 = arith.cmpf olt, %446, %447 : vector<8x1xf32>
    %449 = arith.select %448, %421, %424 : vector<8x1xi1>, vector<8x1xf32>
    %450 = arith.select %440, %418, %449 : vector<8x1xi1>, vector<8x1xf32>
    %451 = arith.select %432, %411, %450 : vector<8x1xi1>, vector<8x1xf32>
    %452 = arith.select %448, %424, %414 : vector<8x1xi1>, vector<8x1xf32>
    %453 = arith.select %440, %421, %452 : vector<8x1xi1>, vector<8x1xf32>
    %454 = arith.select %432, %418, %453 : vector<8x1xi1>, vector<8x1xf32>
    %455 = arith.addf %451, %454 : vector<8x1xf32>
    %cst_139 = arith.constant 5.000000e-01 : f32
    %456 = vector.broadcast %cst_139 : f32 to vector<8x1xf32>
    %457 = arith.mulf %456, %455 : vector<8x1xf32>
    %458 = vector.broadcast %457 : vector<8x1xf32> to vector<8x8xf32>
    %459 = arith.cmpf ogt, %10, %458 : vector<8x8xf32>
    %460 = arith.extui %459 : vector<8x8xi1> to vector<8x8xi32>
    %461 = arith.sitofp %460 : vector<8x8xi32> to vector<8x8xf32>
    %cst_140 = arith.constant dense<0.000000e+00> : vector<8xf32>
    %462 = vector.multi_reduction <add>, %461, %cst_140 [1] : vector<8x8xf32> to vector<8xf32>
    %463 = vector.shape_cast %462 : vector<8xf32> to vector<8x1xf32>
    %cst_141 = arith.constant 1.000000e+00 : f32
    %464 = vector.broadcast %cst_141 : f32 to vector<8x1xf32>
    %465 = arith.maximumf %463, %464 : vector<8x1xf32>
    %466 = arith.mulf %10, %461 : vector<8x8xf32>
    %cst_142 = arith.constant dense<0.000000e+00> : vector<8xf32>
    %467 = vector.multi_reduction <add>, %466, %cst_142 [1] : vector<8x8xf32> to vector<8xf32>
    %468 = vector.shape_cast %467 : vector<8xf32> to vector<8x1xf32>
    %cst_143 = arith.constant 1.000000e+00 : f32
    %469 = vector.broadcast %cst_143 : f32 to vector<8x1xf32>
    %470 = arith.subf %468, %469 : vector<8x1xf32>
    %471 = arith.divf %470, %465 : vector<8x1xf32>
    %472 = vector.broadcast %471 : vector<8x1xf32> to vector<8x8xf32>
    %473 = arith.subf %10, %472 : vector<8x8xf32>
    %cst_144 = arith.constant 0.000000e+00 : f32
    %474 = vector.broadcast %cst_144 : f32 to vector<8x8xf32>
    %475 = arith.maximumf %473, %474 : vector<8x8xf32>
    %c0_145 = arith.constant 0 : index
    %c0_146 = arith.constant 0 : index
    %476 = vector.load %arg2[%c0_145, %c0_146] : memref<8x32xf32, #tpu.memory_space<vmem>>, vector<8x32xf32>
    %cst_147 = arith.constant dense<0.000000e+00> : vector<8x32xf32>
    %477 = tpu.matmul %475, %476, %cst_147 {dimension_numbers = #tpu.dot_dimension_numbers<[1], [0], [0], [1], [0, 0, 1, 1], [], []>} : vector<8x8xf32>, vector<8x32xf32>, vector<8x32xf32> -> vector<8x32xf32>
    %c0_148 = arith.constant 0 : index
    %c0_149 = arith.constant 0 : index
    %478 = vector.load %arg4[%c0_148, %c0_149] : memref<32x128xf32, #tpu.memory_space<vmem>>, vector<32x128xf32>
    %cst_150 = arith.constant dense<0.000000e+00> : vector<8x128xf32>
    %479 = tpu.matmul %0, %478, %cst_150 {dimension_numbers = #tpu.dot_dimension_numbers<[1], [0], [0], [1], [0, 0, 1, 1], [], []>} : vector<8x32xf32>, vector<32x128xf32>, vector<8x128xf32> -> vector<8x128xf32>
    %c0_151 = arith.constant 0 : index
    %c0_152 = arith.constant 0 : index
    %480 = vector.load %arg5[%c0_151, %c0_152] : memref<32x128xf32, #tpu.memory_space<vmem>>, vector<32x128xf32>
    %cst_153 = arith.constant dense<0.000000e+00> : vector<8x128xf32>
    %481 = tpu.matmul %477, %480, %cst_153 {dimension_numbers = #tpu.dot_dimension_numbers<[1], [0], [0], [1], [0, 0, 1, 1], [], []>} : vector<8x32xf32>, vector<32x128xf32>, vector<8x128xf32> -> vector<8x128xf32>
    %482 = arith.addf %479, %481 : vector<8x128xf32>
    %c0_154 = arith.constant 0 : index
    %c0_155 = arith.constant 0 : index
    %483 = vector.load %arg6[%c0_154, %c0_155] : memref<1x128xf32, #tpu.memory_space<vmem>>, vector<1x128xf32>
    %484 = vector.broadcast %483 : vector<1x128xf32> to vector<8x128xf32>
    %485 = arith.addf %482, %484 : vector<8x128xf32>
    %cst_156 = arith.constant 0.000000e+00 : f32
    %486 = vector.broadcast %cst_156 : f32 to vector<8x128xf32>
    %487 = arith.maximumf %485, %486 : vector<8x128xf32>
    %c0_157 = arith.constant 0 : index
    %c0_158 = arith.constant 0 : index
    %488 = vector.load %arg7[%c0_157, %c0_158] : memref<128x128xf32, #tpu.memory_space<vmem>>, vector<128x128xf32>
    %cst_159 = arith.constant dense<0.000000e+00> : vector<8x128xf32>
    %489 = tpu.matmul %487, %488, %cst_159 {dimension_numbers = #tpu.dot_dimension_numbers<[1], [0], [0], [1], [0, 0, 1, 1], [], []>} : vector<8x128xf32>, vector<128x128xf32>, vector<8x128xf32> -> vector<8x128xf32>
    %c0_160 = arith.constant 0 : index
    %c0_161 = arith.constant 0 : index
    %490 = vector.load %arg8[%c0_160, %c0_161] : memref<1x128xf32, #tpu.memory_space<vmem>>, vector<1x128xf32>
    %491 = vector.broadcast %490 : vector<1x128xf32> to vector<8x128xf32>
    %492 = arith.addf %489, %491 : vector<8x128xf32>
    %c0_162 = arith.constant 0 : index
    %c0_163 = arith.constant 0 : index
    %493 = vector.load %arg9[%c0_162, %c0_163] : memref<8x128xf32, #tpu.memory_space<vmem>>, vector<8x128xf32>
    tpu.vector_store %arg9[%c0_162, %c0_163], %492 {strides = array<i32>} : memref<8x128xf32, #tpu.memory_space<vmem>>, vector<8x128xf32>,
    %c0_164 = arith.constant 0 : index
    %c0_165 = arith.constant 0 : index
    %494 = vector.load %arg10[%c0_164, %c0_165] : memref<8x128xf32, #tpu.memory_space<vmem>>, vector<8x128xf32>
    tpu.vector_store %arg10[%c0_164, %c0_165], %487 {strides = array<i32>} : memref<8x128xf32, #tpu.memory_space<vmem>>, vector<8x128xf32>,
    return
  }
  func.func @transform_0(%arg0: i32) -> (i32, i32) {
    %c0_i32 = arith.constant 0 : i32
    %c0_i32_0 = arith.constant 0 : i32
    return %arg0, %c0_i32 : i32, i32
  }
  func.func @transform_1(%arg0: i32) -> (i32, i32) {
    %c0_i32 = arith.constant 0 : i32
    %c0_i32_0 = arith.constant 0 : i32
    %c0_i32_1 = arith.constant 0 : i32
    return %c0_i32, %c0_i32_0 : i32, i32
  }
  func.func @transform_2(%arg0: i32) -> (i32, i32) {
    %c0_i32 = arith.constant 0 : i32
    %c0_i32_0 = arith.constant 0 : i32
    %c0_i32_1 = arith.constant 0 : i32
    return %c0_i32, %c0_i32_0 : i32, i32
  }
  func.func @transform_3(%arg0: i32) -> (i32, i32) {
    %c0_i32 = arith.constant 0 : i32
    %c0_i32_0 = arith.constant 0 : i32
    %c0_i32_1 = arith.constant 0 : i32
    return %c0_i32, %c0_i32_0 : i32, i32
  }
  func.func @transform_4(%arg0: i32) -> (i32, i32) {
    %c0_i32 = arith.constant 0 : i32
    %c0_i32_0 = arith.constant 0 : i32
    %c0_i32_1 = arith.constant 0 : i32
    return %c0_i32, %c0_i32_0 : i32, i32
  }
  func.func @transform_5(%arg0: i32) -> (i32, i32) {
    %c0_i32 = arith.constant 0 : i32
    %c0_i32_0 = arith.constant 0 : i32
    %c0_i32_1 = arith.constant 0 : i32
    return %c0_i32, %c0_i32_0 : i32, i32
  }
  func.func @transform_6(%arg0: i32) -> (i32, i32) {
    %c0_i32 = arith.constant 0 : i32
    %c0_i32_0 = arith.constant 0 : i32
    %c0_i32_1 = arith.constant 0 : i32
    return %c0_i32, %c0_i32_0 : i32, i32
  }
  func.func @transform_7(%arg0: i32) -> (i32, i32) {
    %c0_i32 = arith.constant 0 : i32
    %c0_i32_0 = arith.constant 0 : i32
    %c0_i32_1 = arith.constant 0 : i32
    return %c0_i32, %c0_i32_0 : i32, i32
  }
  func.func @transform_8(%arg0: i32) -> (i32, i32) {
    %c0_i32 = arith.constant 0 : i32
    %c0_i32_0 = arith.constant 0 : i32
    return %arg0, %c0_i32 : i32, i32
  }
  func.func @transform_9(%arg0: i32) -> (i32, i32) {
    %c0_i32 = arith.constant 0 : i32
    %c0_i32_0 = arith.constant 0 : i32
    return %arg0, %c0_i32 : i32, i32
  }
}

module attributes {stable_mosaic.version = 11 : i64} {
  func.func @_memory_wrap_kernel(%arg0: i32, %arg1: memref<8x32xf32, #tpu.memory_space<vmem>>, %arg2: memref<8x32xf32, #tpu.memory_space<vmem>>, %arg3: memref<32x8xf32, #tpu.memory_space<vmem>>, %arg4: memref<32x128xf32, #tpu.memory_space<vmem>>, %arg5: memref<32x128xf32, #tpu.memory_space<vmem>>, %arg6: memref<1x128xf32, #tpu.memory_space<vmem>>, %arg7: memref<128x128xf32, #tpu.memory_space<vmem>>, %arg8: memref<1x128xf32, #tpu.memory_space<vmem>>, %arg9: memref<8x128xf32, #tpu.memory_space<vmem>>, %arg10: memref<8x128xf32, #tpu.memory_space<vmem>>) attributes {dimension_semantics = [#tpu.dimension_semantics<parallel>], iteration_bounds = array<i64: 1>, scalar_prefetch = 0 : i64, scratch_operands = 0 : i64, tpu.core_type = #tpu.core_type<tc>, window_params = [{transform_indices = @transform_0, window_bounds = array<i64: 8, 32>}, {pipeline_mode = #tpu.pipeline_mode<synchronous>, transform_indices = @transform_1, window_bounds = array<i64: 8, 32>}, {pipeline_mode = #tpu.pipeline_mode<synchronous>, transform_indices = @transform_2, window_bounds = array<i64: 32, 8>}, {pipeline_mode = #tpu.pipeline_mode<synchronous>, transform_indices = @transform_3, window_bounds = array<i64: 32, 128>}, {pipeline_mode = #tpu.pipeline_mode<synchronous>, transform_indices = @transform_4, window_bounds = array<i64: 32, 128>}, {pipeline_mode = #tpu.pipeline_mode<synchronous>, transform_indices = @transform_5, window_bounds = array<i64: 1, 128>}, {pipeline_mode = #tpu.pipeline_mode<synchronous>, transform_indices = @transform_6, window_bounds = array<i64: 128, 128>}, {pipeline_mode = #tpu.pipeline_mode<synchronous>, transform_indices = @transform_7, window_bounds = array<i64: 1, 128>}, {transform_indices = @transform_8, window_bounds = array<i64: 8, 128>}, {transform_indices = @transform_9, window_bounds = array<i64: 8, 128>}]} {
    %c0 = arith.constant 0 : index
    %c0_0 = arith.constant 0 : index
    %0 = vector.load %arg1[%c0, %c0_0] : memref<8x32xf32, #tpu.memory_space<vmem>>, vector<8x32xf32>
    %1 = arith.mulf %0, %0 : vector<8x32xf32>
    %cst = arith.constant dense<0.000000e+00> : vector<8xf32>
    %2 = vector.multi_reduction <add>, %1, %cst [1] : vector<8x32xf32> to vector<8xf32>
    %3 = vector.shape_cast %2 : vector<8xf32> to vector<8x1xf32>
    %cst_1 = arith.constant 9.99999997E-7 : f32
    %4 = vector.broadcast %cst_1 : f32 to vector<8x1xf32>
    %5 = arith.addf %3, %4 : vector<8x1xf32>
    %6 = math.rsqrt %5 : vector<8x1xf32>
    %7 = vector.broadcast %6 : vector<8x1xf32> to vector<8x32xf32>
    %8 = arith.mulf %0, %7 : vector<8x32xf32>
    %c0_2 = arith.constant 0 : index
    %c0_3 = arith.constant 0 : index
    %9 = vector.load %arg3[%c0_2, %c0_3] : memref<32x8xf32, #tpu.memory_space<vmem>>, vector<32x8xf32>
    %cst_4 = arith.constant dense<0.000000e+00> : vector<8x8xf32>
    %10 = tpu.matmul %8, %9, %cst_4 {dimension_numbers = #tpu.dot_dimension_numbers<[1], [0], [0], [1], [0, 0, 1, 1], [], []>} : vector<8x32xf32>, vector<32x8xf32>, vector<8x8xf32> -> vector<8x8xf32>
    %cst_5 = arith.constant dense<0xFF800000> : vector<8xf32>
    %11 = vector.multi_reduction <maximumf>, %10, %cst_5 [1] : vector<8x8xf32> to vector<8xf32>
    %12 = vector.shape_cast %11 : vector<8xf32> to vector<8x1xf32>
    %cst_6 = arith.constant 1.000000e+00 : f32
    %13 = vector.broadcast %cst_6 : f32 to vector<8x1xf32>
    %14 = arith.subf %12, %13 : vector<8x1xf32>
    %c0_i32 = arith.constant 0 : i32
    %15 = arith.subf %12, %14 : vector<8x1xf32>
    %cst_7 = arith.constant 2.500000e-01 : f32
    %16 = vector.broadcast %cst_7 : f32 to vector<8x1xf32>
    %17 = arith.mulf %16, %15 : vector<8x1xf32>
    %18 = arith.addf %14, %17 : vector<8x1xf32>
    %cst_8 = arith.constant 5.000000e-01 : f32
    %19 = vector.broadcast %cst_8 : f32 to vector<8x1xf32>
    %20 = arith.mulf %19, %15 : vector<8x1xf32>
    %21 = arith.addf %14, %20 : vector<8x1xf32>
    %cst_9 = arith.constant 7.500000e-01 : f32
    %22 = vector.broadcast %cst_9 : f32 to vector<8x1xf32>
    %23 = arith.mulf %22, %15 : vector<8x1xf32>
    %24 = arith.addf %14, %23 : vector<8x1xf32>
    %25 = vector.broadcast %18 : vector<8x1xf32> to vector<8x8xf32>
    %26 = arith.subf %10, %25 : vector<8x8xf32>
    %cst_10 = arith.constant 0.000000e+00 : f32
    %27 = vector.broadcast %cst_10 : f32 to vector<8x8xf32>
    %28 = arith.maximumf %26, %27 : vector<8x8xf32>
    %cst_11 = arith.constant dense<0.000000e+00> : vector<8xf32>
    %29 = vector.multi_reduction <add>, %28, %cst_11 [1] : vector<8x8xf32> to vector<8xf32>
    %30 = vector.shape_cast %29 : vector<8xf32> to vector<8x1xf32>
    %cst_12 = arith.constant 1.000000e+00 : f32
    %31 = vector.broadcast %cst_12 : f32 to vector<8x1xf32>
    %32 = arith.cmpf olt, %30, %31 : vector<8x1xf32>
    %33 = vector.broadcast %21 : vector<8x1xf32> to vector<8x8xf32>
    %34 = arith.subf %10, %33 : vector<8x8xf32>
    %cst_13 = arith.constant 0.000000e+00 : f32
    %35 = vector.broadcast %cst_13 : f32 to vector<8x8xf32>
    %36 = arith.maximumf %34, %35 : vector<8x8xf32>
    %cst_14 = arith.constant dense<0.000000e+00> : vector<8xf32>
    %37 = vector.multi_reduction <add>, %36, %cst_14 [1] : vector<8x8xf32> to vector<8xf32>
    %38 = vector.shape_cast %37 : vector<8xf32> to vector<8x1xf32>
    %cst_15 = arith.constant 1.000000e+00 : f32
    %39 = vector.broadcast %cst_15 : f32 to vector<8x1xf32>
    %40 = arith.cmpf olt, %38, %39 : vector<8x1xf32>
    %41 = vector.broadcast %24 : vector<8x1xf32> to vector<8x8xf32>
    %42 = arith.subf %10, %41 : vector<8x8xf32>
    %cst_16 = arith.constant 0.000000e+00 : f32
    %43 = vector.broadcast %cst_16 : f32 to vector<8x8xf32>
    %44 = arith.maximumf %42, %43 : vector<8x8xf32>
    %cst_17 = arith.constant dense<0.000000e+00> : vector<8xf32>
    %45 = vector.multi_reduction <add>, %44, %cst_17 [1] : vector<8x8xf32> to vector<8xf32>
    %46 = vector.shape_cast %45 : vector<8xf32> to vector<8x1xf32>
    %cst_18 = arith.constant 1.000000e+00 : f32
    %47 = vector.broadcast %cst_18 : f32 to vector<8x1xf32>
    %48 = arith.cmpf olt, %46, %47 : vector<8x1xf32>
    %49 = arith.select %48, %21, %24 : vector<8x1xi1>, vector<8x1xf32>
    %50 = arith.select %40, %18, %49 : vector<8x1xi1>, vector<8x1xf32>
    %51 = arith.select %32, %14, %50 : vector<8x1xi1>, vector<8x1xf32>
    %52 = arith.select %48, %24, %12 : vector<8x1xi1>, vector<8x1xf32>
    %53 = arith.select %40, %21, %52 : vector<8x1xi1>, vector<8x1xf32>
    %54 = arith.select %32, %18, %53 : vector<8x1xi1>, vector<8x1xf32>
    %c1_i32 = arith.constant 1 : i32
    %55 = arith.subf %54, %51 : vector<8x1xf32>
    %cst_19 = arith.constant 2.500000e-01 : f32
    %56 = vector.broadcast %cst_19 : f32 to vector<8x1xf32>
    %57 = arith.mulf %56, %55 : vector<8x1xf32>
    %58 = arith.addf %51, %57 : vector<8x1xf32>
    %cst_20 = arith.constant 5.000000e-01 : f32
    %59 = vector.broadcast %cst_20 : f32 to vector<8x1xf32>
    %60 = arith.mulf %59, %55 : vector<8x1xf32>
    %61 = arith.addf %51, %60 : vector<8x1xf32>
    %cst_21 = arith.constant 7.500000e-01 : f32
    %62 = vector.broadcast %cst_21 : f32 to vector<8x1xf32>
    %63 = arith.mulf %62, %55 : vector<8x1xf32>
    %64 = arith.addf %51, %63 : vector<8x1xf32>
    %65 = vector.broadcast %58 : vector<8x1xf32> to vector<8x8xf32>
    %66 = arith.subf %10, %65 : vector<8x8xf32>
    %cst_22 = arith.constant 0.000000e+00 : f32
    %67 = vector.broadcast %cst_22 : f32 to vector<8x8xf32>
    %68 = arith.maximumf %66, %67 : vector<8x8xf32>
    %cst_23 = arith.constant dense<0.000000e+00> : vector<8xf32>
    %69 = vector.multi_reduction <add>, %68, %cst_23 [1] : vector<8x8xf32> to vector<8xf32>
    %70 = vector.shape_cast %69 : vector<8xf32> to vector<8x1xf32>
    %cst_24 = arith.constant 1.000000e+00 : f32
    %71 = vector.broadcast %cst_24 : f32 to vector<8x1xf32>
    %72 = arith.cmpf olt, %70, %71 : vector<8x1xf32>
    %73 = vector.broadcast %61 : vector<8x1xf32> to vector<8x8xf32>
    %74 = arith.subf %10, %73 : vector<8x8xf32>
    %cst_25 = arith.constant 0.000000e+00 : f32
    %75 = vector.broadcast %cst_25 : f32 to vector<8x8xf32>
    %76 = arith.maximumf %74, %75 : vector<8x8xf32>
    %cst_26 = arith.constant dense<0.000000e+00> : vector<8xf32>
    %77 = vector.multi_reduction <add>, %76, %cst_26 [1] : vector<8x8xf32> to vector<8xf32>
    %78 = vector.shape_cast %77 : vector<8xf32> to vector<8x1xf32>
    %cst_27 = arith.constant 1.000000e+00 : f32
    %79 = vector.broadcast %cst_27 : f32 to vector<8x1xf32>
    %80 = arith.cmpf olt, %78, %79 : vector<8x1xf32>
    %81 = vector.broadcast %64 : vector<8x1xf32> to vector<8x8xf32>
    %82 = arith.subf %10, %81 : vector<8x8xf32>
    %cst_28 = arith.constant 0.000000e+00 : f32
    %83 = vector.broadcast %cst_28 : f32 to vector<8x8xf32>
    %84 = arith.maximumf %82, %83 : vector<8x8xf32>
    %cst_29 = arith.constant dense<0.000000e+00> : vector<8xf32>
    %85 = vector.multi_reduction <add>, %84, %cst_29 [1] : vector<8x8xf32> to vector<8xf32>
    %86 = vector.shape_cast %85 : vector<8xf32> to vector<8x1xf32>
    %cst_30 = arith.constant 1.000000e+00 : f32
    %87 = vector.broadcast %cst_30 : f32 to vector<8x1xf32>
    %88 = arith.cmpf olt, %86, %87 : vector<8x1xf32>
    %89 = arith.select %88, %61, %64 : vector<8x1xi1>, vector<8x1xf32>
    %90 = arith.select %80, %58, %89 : vector<8x1xi1>, vector<8x1xf32>
    %91 = arith.select %72, %51, %90 : vector<8x1xi1>, vector<8x1xf32>
    %92 = arith.select %88, %64, %54 : vector<8x1xi1>, vector<8x1xf32>
    %93 = arith.select %80, %61, %92 : vector<8x1xi1>, vector<8x1xf32>
    %94 = arith.select %72, %58, %93 : vector<8x1xi1>, vector<8x1xf32>
    %c2_i32 = arith.constant 2 : i32
    %95 = arith.subf %94, %91 : vector<8x1xf32>
    %cst_31 = arith.constant 2.500000e-01 : f32
    %96 = vector.broadcast %cst_31 : f32 to vector<8x1xf32>
    %97 = arith.mulf %96, %95 : vector<8x1xf32>
    %98 = arith.addf %91, %97 : vector<8x1xf32>
    %cst_32 = arith.constant 5.000000e-01 : f32
    %99 = vector.broadcast %cst_32 : f32 to vector<8x1xf32>
    %100 = arith.mulf %99, %95 : vector<8x1xf32>
    %101 = arith.addf %91, %100 : vector<8x1xf32>
    %cst_33 = arith.constant 7.500000e-01 : f32
    %102 = vector.broadcast %cst_33 : f32 to vector<8x1xf32>
    %103 = arith.mulf %102, %95 : vector<8x1xf32>
    %104 = arith.addf %91, %103 : vector<8x1xf32>
    %105 = vector.broadcast %98 : vector<8x1xf32> to vector<8x8xf32>
    %106 = arith.subf %10, %105 : vector<8x8xf32>
    %cst_34 = arith.constant 0.000000e+00 : f32
    %107 = vector.broadcast %cst_34 : f32 to vector<8x8xf32>
    %108 = arith.maximumf %106, %107 : vector<8x8xf32>
    %cst_35 = arith.constant dense<0.000000e+00> : vector<8xf32>
    %109 = vector.multi_reduction <add>, %108, %cst_35 [1] : vector<8x8xf32> to vector<8xf32>
    %110 = vector.shape_cast %109 : vector<8xf32> to vector<8x1xf32>
    %cst_36 = arith.constant 1.000000e+00 : f32
    %111 = vector.broadcast %cst_36 : f32 to vector<8x1xf32>
    %112 = arith.cmpf olt, %110, %111 : vector<8x1xf32>
    %113 = vector.broadcast %101 : vector<8x1xf32> to vector<8x8xf32>
    %114 = arith.subf %10, %113 : vector<8x8xf32>
    %cst_37 = arith.constant 0.000000e+00 : f32
    %115 = vector.broadcast %cst_37 : f32 to vector<8x8xf32>
    %116 = arith.maximumf %114, %115 : vector<8x8xf32>
    %cst_38 = arith.constant dense<0.000000e+00> : vector<8xf32>
    %117 = vector.multi_reduction <add>, %116, %cst_38 [1] : vector<8x8xf32> to vector<8xf32>
    %118 = vector.shape_cast %117 : vector<8xf32> to vector<8x1xf32>
    %cst_39 = arith.constant 1.000000e+00 : f32
    %119 = vector.broadcast %cst_39 : f32 to vector<8x1xf32>
    %120 = arith.cmpf olt, %118, %119 : vector<8x1xf32>
    %121 = vector.broadcast %104 : vector<8x1xf32> to vector<8x8xf32>
    %122 = arith.subf %10, %121 : vector<8x8xf32>
    %cst_40 = arith.constant 0.000000e+00 : f32
    %123 = vector.broadcast %cst_40 : f32 to vector<8x8xf32>
    %124 = arith.maximumf %122, %123 : vector<8x8xf32>
    %cst_41 = arith.constant dense<0.000000e+00> : vector<8xf32>
    %125 = vector.multi_reduction <add>, %124, %cst_41 [1] : vector<8x8xf32> to vector<8xf32>
    %126 = vector.shape_cast %125 : vector<8xf32> to vector<8x1xf32>
    %cst_42 = arith.constant 1.000000e+00 : f32
    %127 = vector.broadcast %cst_42 : f32 to vector<8x1xf32>
    %128 = arith.cmpf olt, %126, %127 : vector<8x1xf32>
    %129 = arith.select %128, %101, %104 : vector<8x1xi1>, vector<8x1xf32>
    %130 = arith.select %120, %98, %129 : vector<8x1xi1>, vector<8x1xf32>
    %131 = arith.select %112, %91, %130 : vector<8x1xi1>, vector<8x1xf32>
    %132 = arith.select %128, %104, %94 : vector<8x1xi1>, vector<8x1xf32>
    %133 = arith.select %120, %101, %132 : vector<8x1xi1>, vector<8x1xf32>
    %134 = arith.select %112, %98, %133 : vector<8x1xi1>, vector<8x1xf32>
    %c3_i32 = arith.constant 3 : i32
    %135 = arith.subf %134, %131 : vector<8x1xf32>
    %cst_43 = arith.constant 2.500000e-01 : f32
    %136 = vector.broadcast %cst_43 : f32 to vector<8x1xf32>
    %137 = arith.mulf %136, %135 : vector<8x1xf32>
    %138 = arith.addf %131, %137 : vector<8x1xf32>
    %cst_44 = arith.constant 5.000000e-01 : f32
    %139 = vector.broadcast %cst_44 : f32 to vector<8x1xf32>
    %140 = arith.mulf %139, %135 : vector<8x1xf32>
    %141 = arith.addf %131, %140 : vector<8x1xf32>
    %cst_45 = arith.constant 7.500000e-01 : f32
    %142 = vector.broadcast %cst_45 : f32 to vector<8x1xf32>
    %143 = arith.mulf %142, %135 : vector<8x1xf32>
    %144 = arith.addf %131, %143 : vector<8x1xf32>
    %145 = vector.broadcast %138 : vector<8x1xf32> to vector<8x8xf32>
    %146 = arith.subf %10, %145 : vector<8x8xf32>
    %cst_46 = arith.constant 0.000000e+00 : f32
    %147 = vector.broadcast %cst_46 : f32 to vector<8x8xf32>
    %148 = arith.maximumf %146, %147 : vector<8x8xf32>
    %cst_47 = arith.constant dense<0.000000e+00> : vector<8xf32>
    %149 = vector.multi_reduction <add>, %148, %cst_47 [1] : vector<8x8xf32> to vector<8xf32>
    %150 = vector.shape_cast %149 : vector<8xf32> to vector<8x1xf32>
    %cst_48 = arith.constant 1.000000e+00 : f32
    %151 = vector.broadcast %cst_48 : f32 to vector<8x1xf32>
    %152 = arith.cmpf olt, %150, %151 : vector<8x1xf32>
    %153 = vector.broadcast %141 : vector<8x1xf32> to vector<8x8xf32>
    %154 = arith.subf %10, %153 : vector<8x8xf32>
    %cst_49 = arith.constant 0.000000e+00 : f32
    %155 = vector.broadcast %cst_49 : f32 to vector<8x8xf32>
    %156 = arith.maximumf %154, %155 : vector<8x8xf32>
    %cst_50 = arith.constant dense<0.000000e+00> : vector<8xf32>
    %157 = vector.multi_reduction <add>, %156, %cst_50 [1] : vector<8x8xf32> to vector<8xf32>
    %158 = vector.shape_cast %157 : vector<8xf32> to vector<8x1xf32>
    %cst_51 = arith.constant 1.000000e+00 : f32
    %159 = vector.broadcast %cst_51 : f32 to vector<8x1xf32>
    %160 = arith.cmpf olt, %158, %159 : vector<8x1xf32>
    %161 = vector.broadcast %144 : vector<8x1xf32> to vector<8x8xf32>
    %162 = arith.subf %10, %161 : vector<8x8xf32>
    %cst_52 = arith.constant 0.000000e+00 : f32
    %163 = vector.broadcast %cst_52 : f32 to vector<8x8xf32>
    %164 = arith.maximumf %162, %163 : vector<8x8xf32>
    %cst_53 = arith.constant dense<0.000000e+00> : vector<8xf32>
    %165 = vector.multi_reduction <add>, %164, %cst_53 [1] : vector<8x8xf32> to vector<8xf32>
    %166 = vector.shape_cast %165 : vector<8xf32> to vector<8x1xf32>
    %cst_54 = arith.constant 1.000000e+00 : f32
    %167 = vector.broadcast %cst_54 : f32 to vector<8x1xf32>
    %168 = arith.cmpf olt, %166, %167 : vector<8x1xf32>
    %169 = arith.select %168, %141, %144 : vector<8x1xi1>, vector<8x1xf32>
    %170 = arith.select %160, %138, %169 : vector<8x1xi1>, vector<8x1xf32>
    %171 = arith.select %152, %131, %170 : vector<8x1xi1>, vector<8x1xf32>
    %172 = arith.select %168, %144, %134 : vector<8x1xi1>, vector<8x1xf32>
    %173 = arith.select %160, %141, %172 : vector<8x1xi1>, vector<8x1xf32>
    %174 = arith.select %152, %138, %173 : vector<8x1xi1>, vector<8x1xf32>
    %c4_i32 = arith.constant 4 : i32
    %175 = arith.subf %174, %171 : vector<8x1xf32>
    %cst_55 = arith.constant 2.500000e-01 : f32
    %176 = vector.broadcast %cst_55 : f32 to vector<8x1xf32>
    %177 = arith.mulf %176, %175 : vector<8x1xf32>
    %178 = arith.addf %171, %177 : vector<8x1xf32>
    %cst_56 = arith.constant 5.000000e-01 : f32
    %179 = vector.broadcast %cst_56 : f32 to vector<8x1xf32>
    %180 = arith.mulf %179, %175 : vector<8x1xf32>
    %181 = arith.addf %171, %180 : vector<8x1xf32>
    %cst_57 = arith.constant 7.500000e-01 : f32
    %182 = vector.broadcast %cst_57 : f32 to vector<8x1xf32>
    %183 = arith.mulf %182, %175 : vector<8x1xf32>
    %184 = arith.addf %171, %183 : vector<8x1xf32>
    %185 = vector.broadcast %178 : vector<8x1xf32> to vector<8x8xf32>
    %186 = arith.subf %10, %185 : vector<8x8xf32>
    %cst_58 = arith.constant 0.000000e+00 : f32
    %187 = vector.broadcast %cst_58 : f32 to vector<8x8xf32>
    %188 = arith.maximumf %186, %187 : vector<8x8xf32>
    %cst_59 = arith.constant dense<0.000000e+00> : vector<8xf32>
    %189 = vector.multi_reduction <add>, %188, %cst_59 [1] : vector<8x8xf32> to vector<8xf32>
    %190 = vector.shape_cast %189 : vector<8xf32> to vector<8x1xf32>
    %cst_60 = arith.constant 1.000000e+00 : f32
    %191 = vector.broadcast %cst_60 : f32 to vector<8x1xf32>
    %192 = arith.cmpf olt, %190, %191 : vector<8x1xf32>
    %193 = vector.broadcast %181 : vector<8x1xf32> to vector<8x8xf32>
    %194 = arith.subf %10, %193 : vector<8x8xf32>
    %cst_61 = arith.constant 0.000000e+00 : f32
    %195 = vector.broadcast %cst_61 : f32 to vector<8x8xf32>
    %196 = arith.maximumf %194, %195 : vector<8x8xf32>
    %cst_62 = arith.constant dense<0.000000e+00> : vector<8xf32>
    %197 = vector.multi_reduction <add>, %196, %cst_62 [1] : vector<8x8xf32> to vector<8xf32>
    %198 = vector.shape_cast %197 : vector<8xf32> to vector<8x1xf32>
    %cst_63 = arith.constant 1.000000e+00 : f32
    %199 = vector.broadcast %cst_63 : f32 to vector<8x1xf32>
    %200 = arith.cmpf olt, %198, %199 : vector<8x1xf32>
    %201 = vector.broadcast %184 : vector<8x1xf32> to vector<8x8xf32>
    %202 = arith.subf %10, %201 : vector<8x8xf32>
    %cst_64 = arith.constant 0.000000e+00 : f32
    %203 = vector.broadcast %cst_64 : f32 to vector<8x8xf32>
    %204 = arith.maximumf %202, %203 : vector<8x8xf32>
    %cst_65 = arith.constant dense<0.000000e+00> : vector<8xf32>
    %205 = vector.multi_reduction <add>, %204, %cst_65 [1] : vector<8x8xf32> to vector<8xf32>
    %206 = vector.shape_cast %205 : vector<8xf32> to vector<8x1xf32>
    %cst_66 = arith.constant 1.000000e+00 : f32
    %207 = vector.broadcast %cst_66 : f32 to vector<8x1xf32>
    %208 = arith.cmpf olt, %206, %207 : vector<8x1xf32>
    %209 = arith.select %208, %181, %184 : vector<8x1xi1>, vector<8x1xf32>
    %210 = arith.select %200, %178, %209 : vector<8x1xi1>, vector<8x1xf32>
    %211 = arith.select %192, %171, %210 : vector<8x1xi1>, vector<8x1xf32>
    %212 = arith.select %208, %184, %174 : vector<8x1xi1>, vector<8x1xf32>
    %213 = arith.select %200, %181, %212 : vector<8x1xi1>, vector<8x1xf32>
    %214 = arith.select %192, %178, %213 : vector<8x1xi1>, vector<8x1xf32>
    %c5_i32 = arith.constant 5 : i32
    %215 = arith.subf %214, %211 : vector<8x1xf32>
    %cst_67 = arith.constant 2.500000e-01 : f32
    %216 = vector.broadcast %cst_67 : f32 to vector<8x1xf32>
    %217 = arith.mulf %216, %215 : vector<8x1xf32>
    %218 = arith.addf %211, %217 : vector<8x1xf32>
    %cst_68 = arith.constant 5.000000e-01 : f32
    %219 = vector.broadcast %cst_68 : f32 to vector<8x1xf32>
    %220 = arith.mulf %219, %215 : vector<8x1xf32>
    %221 = arith.addf %211, %220 : vector<8x1xf32>
    %cst_69 = arith.constant 7.500000e-01 : f32
    %222 = vector.broadcast %cst_69 : f32 to vector<8x1xf32>
    %223 = arith.mulf %222, %215 : vector<8x1xf32>
    %224 = arith.addf %211, %223 : vector<8x1xf32>
    %225 = vector.broadcast %218 : vector<8x1xf32> to vector<8x8xf32>
    %226 = arith.subf %10, %225 : vector<8x8xf32>
    %cst_70 = arith.constant 0.000000e+00 : f32
    %227 = vector.broadcast %cst_70 : f32 to vector<8x8xf32>
    %228 = arith.maximumf %226, %227 : vector<8x8xf32>
    %cst_71 = arith.constant dense<0.000000e+00> : vector<8xf32>
    %229 = vector.multi_reduction <add>, %228, %cst_71 [1] : vector<8x8xf32> to vector<8xf32>
    %230 = vector.shape_cast %229 : vector<8xf32> to vector<8x1xf32>
    %cst_72 = arith.constant 1.000000e+00 : f32
    %231 = vector.broadcast %cst_72 : f32 to vector<8x1xf32>
    %232 = arith.cmpf olt, %230, %231 : vector<8x1xf32>
    %233 = vector.broadcast %221 : vector<8x1xf32> to vector<8x8xf32>
    %234 = arith.subf %10, %233 : vector<8x8xf32>
    %cst_73 = arith.constant 0.000000e+00 : f32
    %235 = vector.broadcast %cst_73 : f32 to vector<8x8xf32>
    %236 = arith.maximumf %234, %235 : vector<8x8xf32>
    %cst_74 = arith.constant dense<0.000000e+00> : vector<8xf32>
    %237 = vector.multi_reduction <add>, %236, %cst_74 [1] : vector<8x8xf32> to vector<8xf32>
    %238 = vector.shape_cast %237 : vector<8xf32> to vector<8x1xf32>
    %cst_75 = arith.constant 1.000000e+00 : f32
    %239 = vector.broadcast %cst_75 : f32 to vector<8x1xf32>
    %240 = arith.cmpf olt, %238, %239 : vector<8x1xf32>
    %241 = vector.broadcast %224 : vector<8x1xf32> to vector<8x8xf32>
    %242 = arith.subf %10, %241 : vector<8x8xf32>
    %cst_76 = arith.constant 0.000000e+00 : f32
    %243 = vector.broadcast %cst_76 : f32 to vector<8x8xf32>
    %244 = arith.maximumf %242, %243 : vector<8x8xf32>
    %cst_77 = arith.constant dense<0.000000e+00> : vector<8xf32>
    %245 = vector.multi_reduction <add>, %244, %cst_77 [1] : vector<8x8xf32> to vector<8xf32>
    %246 = vector.shape_cast %245 : vector<8xf32> to vector<8x1xf32>
    %cst_78 = arith.constant 1.000000e+00 : f32
    %247 = vector.broadcast %cst_78 : f32 to vector<8x1xf32>
    %248 = arith.cmpf olt, %246, %247 : vector<8x1xf32>
    %249 = arith.select %248, %221, %224 : vector<8x1xi1>, vector<8x1xf32>
    %250 = arith.select %240, %218, %249 : vector<8x1xi1>, vector<8x1xf32>
    %251 = arith.select %232, %211, %250 : vector<8x1xi1>, vector<8x1xf32>
    %252 = arith.select %248, %224, %214 : vector<8x1xi1>, vector<8x1xf32>
    %253 = arith.select %240, %221, %252 : vector<8x1xi1>, vector<8x1xf32>
    %254 = arith.select %232, %218, %253 : vector<8x1xi1>, vector<8x1xf32>
    %c6_i32 = arith.constant 6 : i32
    %255 = arith.subf %254, %251 : vector<8x1xf32>
    %cst_79 = arith.constant 2.500000e-01 : f32
    %256 = vector.broadcast %cst_79 : f32 to vector<8x1xf32>
    %257 = arith.mulf %256, %255 : vector<8x1xf32>
    %258 = arith.addf %251, %257 : vector<8x1xf32>
    %cst_80 = arith.constant 5.000000e-01 : f32
    %259 = vector.broadcast %cst_80 : f32 to vector<8x1xf32>
    %260 = arith.mulf %259, %255 : vector<8x1xf32>
    %261 = arith.addf %251, %260 : vector<8x1xf32>
    %cst_81 = arith.constant 7.500000e-01 : f32
    %262 = vector.broadcast %cst_81 : f32 to vector<8x1xf32>
    %263 = arith.mulf %262, %255 : vector<8x1xf32>
    %264 = arith.addf %251, %263 : vector<8x1xf32>
    %265 = vector.broadcast %258 : vector<8x1xf32> to vector<8x8xf32>
    %266 = arith.subf %10, %265 : vector<8x8xf32>
    %cst_82 = arith.constant 0.000000e+00 : f32
    %267 = vector.broadcast %cst_82 : f32 to vector<8x8xf32>
    %268 = arith.maximumf %266, %267 : vector<8x8xf32>
    %cst_83 = arith.constant dense<0.000000e+00> : vector<8xf32>
    %269 = vector.multi_reduction <add>, %268, %cst_83 [1] : vector<8x8xf32> to vector<8xf32>
    %270 = vector.shape_cast %269 : vector<8xf32> to vector<8x1xf32>
    %cst_84 = arith.constant 1.000000e+00 : f32
    %271 = vector.broadcast %cst_84 : f32 to vector<8x1xf32>
    %272 = arith.cmpf olt, %270, %271 : vector<8x1xf32>
    %273 = vector.broadcast %261 : vector<8x1xf32> to vector<8x8xf32>
    %274 = arith.subf %10, %273 : vector<8x8xf32>
    %cst_85 = arith.constant 0.000000e+00 : f32
    %275 = vector.broadcast %cst_85 : f32 to vector<8x8xf32>
    %276 = arith.maximumf %274, %275 : vector<8x8xf32>
    %cst_86 = arith.constant dense<0.000000e+00> : vector<8xf32>
    %277 = vector.multi_reduction <add>, %276, %cst_86 [1] : vector<8x8xf32> to vector<8xf32>
    %278 = vector.shape_cast %277 : vector<8xf32> to vector<8x1xf32>
    %cst_87 = arith.constant 1.000000e+00 : f32
    %279 = vector.broadcast %cst_87 : f32 to vector<8x1xf32>
    %280 = arith.cmpf olt, %278, %279 : vector<8x1xf32>
    %281 = vector.broadcast %264 : vector<8x1xf32> to vector<8x8xf32>
    %282 = arith.subf %10, %281 : vector<8x8xf32>
    %cst_88 = arith.constant 0.000000e+00 : f32
    %283 = vector.broadcast %cst_88 : f32 to vector<8x8xf32>
    %284 = arith.maximumf %282, %283 : vector<8x8xf32>
    %cst_89 = arith.constant dense<0.000000e+00> : vector<8xf32>
    %285 = vector.multi_reduction <add>, %284, %cst_89 [1] : vector<8x8xf32> to vector<8xf32>
    %286 = vector.shape_cast %285 : vector<8xf32> to vector<8x1xf32>
    %cst_90 = arith.constant 1.000000e+00 : f32
    %287 = vector.broadcast %cst_90 : f32 to vector<8x1xf32>
    %288 = arith.cmpf olt, %286, %287 : vector<8x1xf32>
    %289 = arith.select %288, %261, %264 : vector<8x1xi1>, vector<8x1xf32>
    %290 = arith.select %280, %258, %289 : vector<8x1xi1>, vector<8x1xf32>
    %291 = arith.select %272, %251, %290 : vector<8x1xi1>, vector<8x1xf32>
    %292 = arith.select %288, %264, %254 : vector<8x1xi1>, vector<8x1xf32>
    %293 = arith.select %280, %261, %292 : vector<8x1xi1>, vector<8x1xf32>
    %294 = arith.select %272, %258, %293 : vector<8x1xi1>, vector<8x1xf32>
    %c7_i32 = arith.constant 7 : i32
    %295 = arith.subf %294, %291 : vector<8x1xf32>
    %cst_91 = arith.constant 2.500000e-01 : f32
    %296 = vector.broadcast %cst_91 : f32 to vector<8x1xf32>
    %297 = arith.mulf %296, %295 : vector<8x1xf32>
    %298 = arith.addf %291, %297 : vector<8x1xf32>
    %cst_92 = arith.constant 5.000000e-01 : f32
    %299 = vector.broadcast %cst_92 : f32 to vector<8x1xf32>
    %300 = arith.mulf %299, %295 : vector<8x1xf32>
    %301 = arith.addf %291, %300 : vector<8x1xf32>
    %cst_93 = arith.constant 7.500000e-01 : f32
    %302 = vector.broadcast %cst_93 : f32 to vector<8x1xf32>
    %303 = arith.mulf %302, %295 : vector<8x1xf32>
    %304 = arith.addf %291, %303 : vector<8x1xf32>
    %305 = vector.broadcast %298 : vector<8x1xf32> to vector<8x8xf32>
    %306 = arith.subf %10, %305 : vector<8x8xf32>
    %cst_94 = arith.constant 0.000000e+00 : f32
    %307 = vector.broadcast %cst_94 : f32 to vector<8x8xf32>
    %308 = arith.maximumf %306, %307 : vector<8x8xf32>
    %cst_95 = arith.constant dense<0.000000e+00> : vector<8xf32>
    %309 = vector.multi_reduction <add>, %308, %cst_95 [1] : vector<8x8xf32> to vector<8xf32>
    %310 = vector.shape_cast %309 : vector<8xf32> to vector<8x1xf32>
    %cst_96 = arith.constant 1.000000e+00 : f32
    %311 = vector.broadcast %cst_96 : f32 to vector<8x1xf32>
    %312 = arith.cmpf olt, %310, %311 : vector<8x1xf32>
    %313 = vector.broadcast %301 : vector<8x1xf32> to vector<8x8xf32>
    %314 = arith.subf %10, %313 : vector<8x8xf32>
    %cst_97 = arith.constant 0.000000e+00 : f32
    %315 = vector.broadcast %cst_97 : f32 to vector<8x8xf32>
    %316 = arith.maximumf %314, %315 : vector<8x8xf32>
    %cst_98 = arith.constant dense<0.000000e+00> : vector<8xf32>
    %317 = vector.multi_reduction <add>, %316, %cst_98 [1] : vector<8x8xf32> to vector<8xf32>
    %318 = vector.shape_cast %317 : vector<8xf32> to vector<8x1xf32>
    %cst_99 = arith.constant 1.000000e+00 : f32
    %319 = vector.broadcast %cst_99 : f32 to vector<8x1xf32>
    %320 = arith.cmpf olt, %318, %319 : vector<8x1xf32>
    %321 = vector.broadcast %304 : vector<8x1xf32> to vector<8x8xf32>
    %322 = arith.subf %10, %321 : vector<8x8xf32>
    %cst_100 = arith.constant 0.000000e+00 : f32
    %323 = vector.broadcast %cst_100 : f32 to vector<8x8xf32>
    %324 = arith.maximumf %322, %323 : vector<8x8xf32>
    %cst_101 = arith.constant dense<0.000000e+00> : vector<8xf32>
    %325 = vector.multi_reduction <add>, %324, %cst_101 [1] : vector<8x8xf32> to vector<8xf32>
    %326 = vector.shape_cast %325 : vector<8xf32> to vector<8x1xf32>
    %cst_102 = arith.constant 1.000000e+00 : f32
    %327 = vector.broadcast %cst_102 : f32 to vector<8x1xf32>
    %328 = arith.cmpf olt, %326, %327 : vector<8x1xf32>
    %329 = arith.select %328, %301, %304 : vector<8x1xi1>, vector<8x1xf32>
    %330 = arith.select %320, %298, %329 : vector<8x1xi1>, vector<8x1xf32>
    %331 = arith.select %312, %291, %330 : vector<8x1xi1>, vector<8x1xf32>
    %332 = arith.select %328, %304, %294 : vector<8x1xi1>, vector<8x1xf32>
    %333 = arith.select %320, %301, %332 : vector<8x1xi1>, vector<8x1xf32>
    %334 = arith.select %312, %298, %333 : vector<8x1xi1>, vector<8x1xf32>
    %c8_i32 = arith.constant 8 : i32
    %335 = arith.subf %334, %331 : vector<8x1xf32>
    %cst_103 = arith.constant 2.500000e-01 : f32
    %336 = vector.broadcast %cst_103 : f32 to vector<8x1xf32>
    %337 = arith.mulf %336, %335 : vector<8x1xf32>
    %338 = arith.addf %331, %337 : vector<8x1xf32>
    %cst_104 = arith.constant 5.000000e-01 : f32
    %339 = vector.broadcast %cst_104 : f32 to vector<8x1xf32>
    %340 = arith.mulf %339, %335 : vector<8x1xf32>
    %341 = arith.addf %331, %340 : vector<8x1xf32>
    %cst_105 = arith.constant 7.500000e-01 : f32
    %342 = vector.broadcast %cst_105 : f32 to vector<8x1xf32>
    %343 = arith.mulf %342, %335 : vector<8x1xf32>
    %344 = arith.addf %331, %343 : vector<8x1xf32>
    %345 = vector.broadcast %338 : vector<8x1xf32> to vector<8x8xf32>
    %346 = arith.subf %10, %345 : vector<8x8xf32>
    %cst_106 = arith.constant 0.000000e+00 : f32
    %347 = vector.broadcast %cst_106 : f32 to vector<8x8xf32>
    %348 = arith.maximumf %346, %347 : vector<8x8xf32>
    %cst_107 = arith.constant dense<0.000000e+00> : vector<8xf32>
    %349 = vector.multi_reduction <add>, %348, %cst_107 [1] : vector<8x8xf32> to vector<8xf32>
    %350 = vector.shape_cast %349 : vector<8xf32> to vector<8x1xf32>
    %cst_108 = arith.constant 1.000000e+00 : f32
    %351 = vector.broadcast %cst_108 : f32 to vector<8x1xf32>
    %352 = arith.cmpf olt, %350, %351 : vector<8x1xf32>
    %353 = vector.broadcast %341 : vector<8x1xf32> to vector<8x8xf32>
    %354 = arith.subf %10, %353 : vector<8x8xf32>
    %cst_109 = arith.constant 0.000000e+00 : f32
    %355 = vector.broadcast %cst_109 : f32 to vector<8x8xf32>
    %356 = arith.maximumf %354, %355 : vector<8x8xf32>
    %cst_110 = arith.constant dense<0.000000e+00> : vector<8xf32>
    %357 = vector.multi_reduction <add>, %356, %cst_110 [1] : vector<8x8xf32> to vector<8xf32>
    %358 = vector.shape_cast %357 : vector<8xf32> to vector<8x1xf32>
    %cst_111 = arith.constant 1.000000e+00 : f32
    %359 = vector.broadcast %cst_111 : f32 to vector<8x1xf32>
    %360 = arith.cmpf olt, %358, %359 : vector<8x1xf32>
    %361 = vector.broadcast %344 : vector<8x1xf32> to vector<8x8xf32>
    %362 = arith.subf %10, %361 : vector<8x8xf32>
    %cst_112 = arith.constant 0.000000e+00 : f32
    %363 = vector.broadcast %cst_112 : f32 to vector<8x8xf32>
    %364 = arith.maximumf %362, %363 : vector<8x8xf32>
    %cst_113 = arith.constant dense<0.000000e+00> : vector<8xf32>
    %365 = vector.multi_reduction <add>, %364, %cst_113 [1] : vector<8x8xf32> to vector<8xf32>
    %366 = vector.shape_cast %365 : vector<8xf32> to vector<8x1xf32>
    %cst_114 = arith.constant 1.000000e+00 : f32
    %367 = vector.broadcast %cst_114 : f32 to vector<8x1xf32>
    %368 = arith.cmpf olt, %366, %367 : vector<8x1xf32>
    %369 = arith.select %368, %341, %344 : vector<8x1xi1>, vector<8x1xf32>
    %370 = arith.select %360, %338, %369 : vector<8x1xi1>, vector<8x1xf32>
    %371 = arith.select %352, %331, %370 : vector<8x1xi1>, vector<8x1xf32>
    %372 = arith.select %368, %344, %334 : vector<8x1xi1>, vector<8x1xf32>
    %373 = arith.select %360, %341, %372 : vector<8x1xi1>, vector<8x1xf32>
    %374 = arith.select %352, %338, %373 : vector<8x1xi1>, vector<8x1xf32>
    %c9_i32 = arith.constant 9 : i32
    %375 = arith.subf %374, %371 : vector<8x1xf32>
    %cst_115 = arith.constant 2.500000e-01 : f32
    %376 = vector.broadcast %cst_115 : f32 to vector<8x1xf32>
    %377 = arith.mulf %376, %375 : vector<8x1xf32>
    %378 = arith.addf %371, %377 : vector<8x1xf32>
    %cst_116 = arith.constant 5.000000e-01 : f32
    %379 = vector.broadcast %cst_116 : f32 to vector<8x1xf32>
    %380 = arith.mulf %379, %375 : vector<8x1xf32>
    %381 = arith.addf %371, %380 : vector<8x1xf32>
    %cst_117 = arith.constant 7.500000e-01 : f32
    %382 = vector.broadcast %cst_117 : f32 to vector<8x1xf32>
    %383 = arith.mulf %382, %375 : vector<8x1xf32>
    %384 = arith.addf %371, %383 : vector<8x1xf32>
    %385 = vector.broadcast %378 : vector<8x1xf32> to vector<8x8xf32>
    %386 = arith.subf %10, %385 : vector<8x8xf32>
    %cst_118 = arith.constant 0.000000e+00 : f32
    %387 = vector.broadcast %cst_118 : f32 to vector<8x8xf32>
    %388 = arith.maximumf %386, %387 : vector<8x8xf32>
    %cst_119 = arith.constant dense<0.000000e+00> : vector<8xf32>
    %389 = vector.multi_reduction <add>, %388, %cst_119 [1] : vector<8x8xf32> to vector<8xf32>
    %390 = vector.shape_cast %389 : vector<8xf32> to vector<8x1xf32>
    %cst_120 = arith.constant 1.000000e+00 : f32
    %391 = vector.broadcast %cst_120 : f32 to vector<8x1xf32>
    %392 = arith.cmpf olt, %390, %391 : vector<8x1xf32>
    %393 = vector.broadcast %381 : vector<8x1xf32> to vector<8x8xf32>
    %394 = arith.subf %10, %393 : vector<8x8xf32>
    %cst_121 = arith.constant 0.000000e+00 : f32
    %395 = vector.broadcast %cst_121 : f32 to vector<8x8xf32>
    %396 = arith.maximumf %394, %395 : vector<8x8xf32>
    %cst_122 = arith.constant dense<0.000000e+00> : vector<8xf32>
    %397 = vector.multi_reduction <add>, %396, %cst_122 [1] : vector<8x8xf32> to vector<8xf32>
    %398 = vector.shape_cast %397 : vector<8xf32> to vector<8x1xf32>
    %cst_123 = arith.constant 1.000000e+00 : f32
    %399 = vector.broadcast %cst_123 : f32 to vector<8x1xf32>
    %400 = arith.cmpf olt, %398, %399 : vector<8x1xf32>
    %401 = vector.broadcast %384 : vector<8x1xf32> to vector<8x8xf32>
    %402 = arith.subf %10, %401 : vector<8x8xf32>
    %cst_124 = arith.constant 0.000000e+00 : f32
    %403 = vector.broadcast %cst_124 : f32 to vector<8x8xf32>
    %404 = arith.maximumf %402, %403 : vector<8x8xf32>
    %cst_125 = arith.constant dense<0.000000e+00> : vector<8xf32>
    %405 = vector.multi_reduction <add>, %404, %cst_125 [1] : vector<8x8xf32> to vector<8xf32>
    %406 = vector.shape_cast %405 : vector<8xf32> to vector<8x1xf32>
    %cst_126 = arith.constant 1.000000e+00 : f32
    %407 = vector.broadcast %cst_126 : f32 to vector<8x1xf32>
    %408 = arith.cmpf olt, %406, %407 : vector<8x1xf32>
    %409 = arith.select %408, %381, %384 : vector<8x1xi1>, vector<8x1xf32>
    %410 = arith.select %400, %378, %409 : vector<8x1xi1>, vector<8x1xf32>
    %411 = arith.select %392, %371, %410 : vector<8x1xi1>, vector<8x1xf32>
    %412 = arith.select %408, %384, %374 : vector<8x1xi1>, vector<8x1xf32>
    %413 = arith.select %400, %381, %412 : vector<8x1xi1>, vector<8x1xf32>
    %414 = arith.select %392, %378, %413 : vector<8x1xi1>, vector<8x1xf32>
    %c10_i32 = arith.constant 10 : i32
    %415 = arith.subf %414, %411 : vector<8x1xf32>
    %cst_127 = arith.constant 2.500000e-01 : f32
    %416 = vector.broadcast %cst_127 : f32 to vector<8x1xf32>
    %417 = arith.mulf %416, %415 : vector<8x1xf32>
    %418 = arith.addf %411, %417 : vector<8x1xf32>
    %cst_128 = arith.constant 5.000000e-01 : f32
    %419 = vector.broadcast %cst_128 : f32 to vector<8x1xf32>
    %420 = arith.mulf %419, %415 : vector<8x1xf32>
    %421 = arith.addf %411, %420 : vector<8x1xf32>
    %cst_129 = arith.constant 7.500000e-01 : f32
    %422 = vector.broadcast %cst_129 : f32 to vector<8x1xf32>
    %423 = arith.mulf %422, %415 : vector<8x1xf32>
    %424 = arith.addf %411, %423 : vector<8x1xf32>
    %425 = vector.broadcast %418 : vector<8x1xf32> to vector<8x8xf32>
    %426 = arith.subf %10, %425 : vector<8x8xf32>
    %cst_130 = arith.constant 0.000000e+00 : f32
    %427 = vector.broadcast %cst_130 : f32 to vector<8x8xf32>
    %428 = arith.maximumf %426, %427 : vector<8x8xf32>
    %cst_131 = arith.constant dense<0.000000e+00> : vector<8xf32>
    %429 = vector.multi_reduction <add>, %428, %cst_131 [1] : vector<8x8xf32> to vector<8xf32>
    %430 = vector.shape_cast %429 : vector<8xf32> to vector<8x1xf32>
    %cst_132 = arith.constant 1.000000e+00 : f32
    %431 = vector.broadcast %cst_132 : f32 to vector<8x1xf32>
    %432 = arith.cmpf olt, %430, %431 : vector<8x1xf32>
    %433 = vector.broadcast %421 : vector<8x1xf32> to vector<8x8xf32>
    %434 = arith.subf %10, %433 : vector<8x8xf32>
    %cst_133 = arith.constant 0.000000e+00 : f32
    %435 = vector.broadcast %cst_133 : f32 to vector<8x8xf32>
    %436 = arith.maximumf %434, %435 : vector<8x8xf32>
    %cst_134 = arith.constant dense<0.000000e+00> : vector<8xf32>
    %437 = vector.multi_reduction <add>, %436, %cst_134 [1] : vector<8x8xf32> to vector<8xf32>
    %438 = vector.shape_cast %437 : vector<8xf32> to vector<8x1xf32>
    %cst_135 = arith.constant 1.000000e+00 : f32
    %439 = vector.broadcast %cst_135 : f32 to vector<8x1xf32>
    %440 = arith.cmpf olt, %438, %439 : vector<8x1xf32>
    %441 = vector.broadcast %424 : vector<8x1xf32> to vector<8x8xf32>
    %442 = arith.subf %10, %441 : vector<8x8xf32>
    %cst_136 = arith.constant 0.000000e+00 : f32
    %443 = vector.broadcast %cst_136 : f32 to vector<8x8xf32>
    %444 = arith.maximumf %442, %443 : vector<8x8xf32>
    %cst_137 = arith.constant dense<0.000000e+00> : vector<8xf32>
    %445 = vector.multi_reduction <add>, %444, %cst_137 [1] : vector<8x8xf32> to vector<8xf32>
    %446 = vector.shape_cast %445 : vector<8xf32> to vector<8x1xf32>
    %cst_138 = arith.constant 1.000000e+00 : f32
    %447 = vector.broadcast %cst_138 : f32 to vector<8x1xf32>
    %448 = arith.cmpf olt, %446, %447 : vector<8x1xf32>
    %449 = arith.select %448, %421, %424 : vector<8x1xi1>, vector<8x1xf32>
    %450 = arith.select %440, %418, %449 : vector<8x1xi1>, vector<8x1xf32>
    %451 = arith.select %432, %411, %450 : vector<8x1xi1>, vector<8x1xf32>
    %452 = arith.select %448, %424, %414 : vector<8x1xi1>, vector<8x1xf32>
    %453 = arith.select %440, %421, %452 : vector<8x1xi1>, vector<8x1xf32>
    %454 = arith.select %432, %418, %453 : vector<8x1xi1>, vector<8x1xf32>
    %455 = arith.addf %451, %454 : vector<8x1xf32>
    %cst_139 = arith.constant 5.000000e-01 : f32
    %456 = vector.broadcast %cst_139 : f32 to vector<8x1xf32>
    %457 = arith.mulf %456, %455 : vector<8x1xf32>
    %458 = vector.broadcast %457 : vector<8x1xf32> to vector<8x8xf32>
    %459 = arith.cmpf ogt, %10, %458 : vector<8x8xf32>
    %460 = arith.extui %459 : vector<8x8xi1> to vector<8x8xi32>
    %461 = arith.sitofp %460 : vector<8x8xi32> to vector<8x8xf32>
    %cst_140 = arith.constant dense<0.000000e+00> : vector<8xf32>
    %462 = vector.multi_reduction <add>, %461, %cst_140 [1] : vector<8x8xf32> to vector<8xf32>
    %463 = vector.shape_cast %462 : vector<8xf32> to vector<8x1xf32>
    %cst_141 = arith.constant 1.000000e+00 : f32
    %464 = vector.broadcast %cst_141 : f32 to vector<8x1xf32>
    %465 = arith.maximumf %463, %464 : vector<8x1xf32>
    %466 = arith.mulf %10, %461 : vector<8x8xf32>
    %cst_142 = arith.constant dense<0.000000e+00> : vector<8xf32>
    %467 = vector.multi_reduction <add>, %466, %cst_142 [1] : vector<8x8xf32> to vector<8xf32>
    %468 = vector.shape_cast %467 : vector<8xf32> to vector<8x1xf32>
    %cst_143 = arith.constant 1.000000e+00 : f32
    %469 = vector.broadcast %cst_143 : f32 to vector<8x1xf32>
    %470 = arith.subf %468, %469 : vector<8x1xf32>
    %471 = arith.divf %470, %465 : vector<8x1xf32>
    %472 = vector.broadcast %471 : vector<8x1xf32> to vector<8x8xf32>
    %473 = arith.subf %10, %472 : vector<8x8xf32>
    %cst_144 = arith.constant 0.000000e+00 : f32
    %474 = vector.broadcast %cst_144 : f32 to vector<8x8xf32>
    %475 = arith.maximumf %473, %474 : vector<8x8xf32>
    %c0_145 = arith.constant 0 : index
    %c0_146 = arith.constant 0 : index
    %476 = vector.load %arg2[%c0_145, %c0_146] : memref<8x32xf32, #tpu.memory_space<vmem>>, vector<8x32xf32>
    %cst_147 = arith.constant dense<0.000000e+00> : vector<8x32xf32>
    %477 = tpu.matmul %475, %476, %cst_147 {dimension_numbers = #tpu.dot_dimension_numbers<[1], [0], [0], [1], [0, 0, 1, 1], [], []>} : vector<8x8xf32>, vector<8x32xf32>, vector<8x32xf32> -> vector<8x32xf32>
    %c0_148 = arith.constant 0 : index
    %c0_149 = arith.constant 0 : index
    %478 = vector.load %arg4[%c0_148, %c0_149] : memref<32x128xf32, #tpu.memory_space<vmem>>, vector<32x128xf32>
    %cst_150 = arith.constant dense<0.000000e+00> : vector<8x128xf32>
    %479 = tpu.matmul %0, %478, %cst_150 {dimension_numbers = #tpu.dot_dimension_numbers<[1], [0], [0], [1], [0, 0, 1, 1], [], []>} : vector<8x32xf32>, vector<32x128xf32>, vector<8x128xf32> -> vector<8x128xf32>
    %c0_151 = arith.constant 0 : index
    %c0_152 = arith.constant 0 : index
    %480 = vector.load %arg5[%c0_151, %c0_152] : memref<32x128xf32, #tpu.memory_space<vmem>>, vector<32x128xf32>
    %cst_153 = arith.constant dense<0.000000e+00> : vector<8x128xf32>
    %481 = tpu.matmul %477, %480, %cst_153 {dimension_numbers = #tpu.dot_dimension_numbers<[1], [0], [0], [1], [0, 0, 1, 1], [], []>} : vector<8x32xf32>, vector<32x128xf32>, vector<8x128xf32> -> vector<8x128xf32>
    %482 = arith.addf %479, %481 : vector<8x128xf32>
    %c0_154 = arith.constant 0 : index
    %c0_155 = arith.constant 0 : index
    %483 = vector.load %arg6[%c0_154, %c0_155] : memref<1x128xf32, #tpu.memory_space<vmem>>, vector<1x128xf32>
    %484 = vector.broadcast %483 : vector<1x128xf32> to vector<8x128xf32>
    %485 = arith.addf %482, %484 : vector<8x128xf32>
    %cst_156 = arith.constant 0.000000e+00 : f32
    %486 = vector.broadcast %cst_156 : f32 to vector<8x128xf32>
    %487 = arith.maximumf %485, %486 : vector<8x128xf32>
    %c0_157 = arith.constant 0 : index
    %c0_158 = arith.constant 0 : index
    %488 = vector.load %arg7[%c0_157, %c0_158] : memref<128x128xf32, #tpu.memory_space<vmem>>, vector<128x128xf32>
    %cst_159 = arith.constant dense<0.000000e+00> : vector<8x128xf32>
    %489 = tpu.matmul %487, %488, %cst_159 {dimension_numbers = #tpu.dot_dimension_numbers<[1], [0], [0], [1], [0, 0, 1, 1], [], []>} : vector<8x128xf32>, vector<128x128xf32>, vector<8x128xf32> -> vector<8x128xf32>
    %c0_160 = arith.constant 0 : index
    %c0_161 = arith.constant 0 : index
    %490 = vector.load %arg8[%c0_160, %c0_161] : memref<1x128xf32, #tpu.memory_space<vmem>>, vector<1x128xf32>
    %491 = vector.broadcast %490 : vector<1x128xf32> to vector<8x128xf32>
    %492 = arith.addf %489, %491 : vector<8x128xf32>
    %c0_162 = arith.constant 0 : index
    %c0_163 = arith.constant 0 : index
    %493 = vector.load %arg9[%c0_162, %c0_163] : memref<8x128xf32, #tpu.memory_space<vmem>>, vector<8x128xf32>
    tpu.vector_store %arg9[%c0_162, %c0_163], %492 {strides = array<i32>} : memref<8x128xf32, #tpu.memory_space<vmem>>, vector<8x128xf32>,
    %c0_164 = arith.constant 0 : index
    %c0_165 = arith.constant 0 : index
    %494 = vector.load %arg10[%c0_164, %c0_165] : memref<8x128xf32, #tpu.memory_space<vmem>>, vector<8x128xf32>
    tpu.vector_store %arg10[%c0_164, %c0_165], %487 {strides = array<i32>} : memref<8x128xf32, #tpu.memory_space<vmem>>, vector<8x128xf32>,
    return
  }
  func.func @transform_0(%arg0: i32) -> (i32, i32) {
    %c0_i32 = arith.constant 0 : i32
    %c0_i32_0 = arith.constant 0 : i32
    return %arg0, %c0_i32 : i32, i32
  }
  func.func @transform_1(%arg0: i32) -> (i32, i32) {
    %c0_i32 = arith.constant 0 : i32
    %c0_i32_0 = arith.constant 0 : i32
    %c0_i32_1 = arith.constant 0 : i32
    return %c0_i32, %c0_i32_0 : i32, i32
  }
  func.func @transform_2(%arg0: i32) -> (i32, i32) {
    %c0_i32 = arith.constant 0 : i32
    %c0_i32_0 = arith.constant 0 : i32
    %c0_i32_1 = arith.constant 0 : i32
    return %c0_i32, %c0_i32_0 : i32, i32
  }
  func.func @transform_3(%arg0: i32) -> (i32, i32) {
    %c0_i32 = arith.constant 0 : i32
    %c0_i32_0 = arith.constant 0 : i32
    %c0_i32_1 = arith.constant 0 : i32
    return %c0_i32, %c0_i32_0 : i32, i32
  }
  func.func @transform_4(%arg0: i32) -> (i32, i32) {
    %c0_i32 = arith.constant 0 : i32
    %c0_i32_0 = arith.constant 0 : i32
    %c0_i32_1 = arith.constant 0 : i32
    return %c0_i32, %c0_i32_0 : i32, i32
  }
  func.func @transform_5(%arg0: i32) -> (i32, i32) {
    %c0_i32 = arith.constant 0 : i32
    %c0_i32_0 = arith.constant 0 : i32
    %c0_i32_1 = arith.constant 0 : i32
    return %c0_i32, %c0_i32_0 : i32, i32
  }
  func.func @transform_6(%arg0: i32) -> (i32, i32) {
    %c0_i32 = arith.constant 0 : i32
    %c0_i32_0 = arith.constant 0 : i32
    %c0_i32_1 = arith.constant 0 : i32
    return %c0_i32, %c0_i32_0 : i32, i32
  }
  func.func @transform_7(%arg0: i32) -> (i32, i32) {
    %c0_i32 = arith.constant 0 : i32
    %c0_i32_0 = arith.constant 0 : i32
    %c0_i32_1 = arith.constant 0 : i32
    return %c0_i32, %c0_i32_0 : i32, i32
  }
  func.func @transform_8(%arg0: i32) -> (i32, i32) {
    %c0_i32 = arith.constant 0 : i32
    %c0_i32_0 = arith.constant 0 : i32
    return %arg0, %c0_i32 : i32, i32
  }
  func.func @transform_9(%arg0: i32) -> (i32, i32) {
    %c0_i32 = arith.constant 0 : i32
    %c0_i32_0 = arith.constant 0 : i32
    return %arg0, %c0_i32 : i32, i32
  }
}

</mosaic_0001>

<bundles_post_ra>
// kernel: _memory_wrap_forward.1
= control target key start
LH: loop header
LB: loop body
LE: loop exit
PB: predicated region body
PF: predicated region fallthrough
CT: control target
= control target key end

     0   :  { %vm33_vm0 = vcmask 261120   ;;  %v986_v3 = vmov 0.0|0.0   ;;  %vm987_vm1 = vmmov 0   ;;  %v988_v7 = vmov 0.0   ;;  %s1253_s0 = inlined_call_operand.vmem [shape: f32[8,32], index: 0, kind: input, shape index: {}]   ;;  %s1254_s2 = inlined_call_operand.vmem [shape: f32[32,8], index: 2, kind: input, shape index: {}]   ;;  %s1255_s1 = inlined_call_operand.vmem [shape: f32[8,32], index: 1, kind: input, shape index: {}]   ;;  %s1256_s4 = inlined_call_operand.vmem [shape: f32[32,128], index: 4, kind: input, shape index: {}]   ;;  %s1257_s6 = inlined_call_operand.vmem [shape: f32[128,128], index: 6, kind: input, shape index: {}]   ;;  %s1258_s3 = inlined_call_operand.vmem [shape: f32[32,128], index: 3, kind: input, shape index: {}]   ;;  %s1259_s5 = inlined_call_operand.vmem [shape: f32[1,128], index: 5, kind: input, shape index: {}]   ;;  %s1260_s9 = inlined_call_operand.vmem [shape: f32[8,128], index: 9, kind: output, shape index: {1}]   ;;  %s1261_s7 = inlined_call_operand.vmem [shape: f32[1,128], index: 7, kind: input, shape index: {}]   ;;  %s1262_s8 = inlined_call_operand.vmem [shape: f32[8,128], index: 8, kind: output, shape index: {0}]  }
   0x1   :  { %v1042_v0 = vld [vmem:[%s1253_s0] sm:$0xff]  ;;  %937 = vmatprep.subr.bf16.mxu0 %v986_v3  ;;  %v41_v5 = vld [vmem:[%s1254_s2 + $0x8] sm:$0xff]  ;;  %v42_v6 = vld [vmem:[%s1254_s2 + $0x10] sm:$0xff]  ;;  %872 = vmatprep.mubr.msk.f32.mxu0 %vm987_vm1, %v988_v7  ;;  %vm117_vm2 = vcmask 64512  }
   0x2   :  { %v32_v1 = vmul.f32 %v1042_v0, %v1042_v0  ;;  %v40_v4 = vld [vmem:[%s1254_s2] sm:$0xff]  ;;  %v43_v9 = vld [vmem:[%s1254_s2 + $0x18] sm:$0xff]  ;;  %955 = vmatprep.subr.bf16.mxu1 %v986_v3  ;;  %934 = vmatprep.mubr.msk.f32.mxu1 %vm987_vm1, %v988_v7 }
   0x3   :  { %v938_v8 = vpack.c.bf16 %v41_v5, %v40_v4  ;;  %v941_v10 = vpack.c.bf16 %v43_v9, %v42_v6 }
   0x4   :  { %v34_v2 = vsel %vm33_vm0, %v32_v1, 0.0 }
   0x5   :  { %35 = vadd.xlane.f32.xlu0 %v34_v2  ;;  %939 = vmatpush3.bf16.msra.mxu0 %v938_v8 }
   0x6   :  { %940 = vmatprep.subr.bf16.mxu0 %v986_v3 }
   0x9   :  { %942 = vmatpush3.bf16.msra.mxu0 %v941_v10 }
   0xa   :  { %875 = vmatprep.subr.mxu0 %v988_v7 }
  0x92   :  { %v36_v11 = vpop.xlane.xlu0 %35 }
  0x93   :  { %v37_v12 = vadd.f32 1e-06, %v36_v11 }
  0x95   :  { %982 = vrsqrt.f32 %v37_v12 }
  0x9f   :  { %v983_v13 = vpop.eup %982 }
  0xa0   :  { %v39_v14 = vmul.f32 %v983_v13, %v1042_v0 }
  0xa2   :  { %873 = vmatmul.mubr.msk.f32.vlgmr.msra.gmra.mrb[0].mxu0 %vm33_vm0, %v39_v14 }
  0xa3   :  { %877 = vmatprep.mubr.msk.f32.mxu0 %vm987_vm1, %v988_v7 }
 0x175   :  { %v1071_v15 = vpop.f32.mrb[0].mxu0 }
 0x176   :  { %v874_v16 = vpop.f32.mrb[1].mxu0  ;;  %v118_v17 = vsel %vm117_vm2, %v1071_v15, -inf }
 0x177   :  { %119 = vmax.xlane.f32.xlu0 %v118_v17 }
 0x204   :  { %v120_v18 = vpop.xlane.xlu0 %119 }
 0x205   :  { %v822_v19 = vadd.f32 -1.0, %v120_v18 }
 0x207   :  { %v122_v20 = vsub.f32 %v120_v18, %v822_v19 }
 0x209   :  { %v123_v21 = vmul.f32 0.25, %v122_v20  ;;  %v125_v22 = vmul.f32 0.5, %v122_v20  ;;  %v127_v23 = vmul.f32 0.75, %v122_v20 }
 0x20b   :  { %v128_v24 = vadd.f32 %v822_v19, %v127_v23  ;;  %v124_v25 = vadd.f32 %v822_v19, %v123_v21  ;;  %v126_v26 = vadd.f32 %v822_v19, %v125_v22 }
 0x20d   :  { %v141_v27 = vsub.f32 %v1071_v15, %v128_v24  ;;  %v129_v28 = vsub.f32 %v1071_v15, %v124_v25  ;;  %v135_v29 = vsub.f32 %v1071_v15, %v126_v26 }
 0x20f   :  { %v142_v30 = vmax.f32 %v141_v27, 0.0  ;;  %v130_v31 = vmax.f32 %v129_v28, 0.0  ;;  %v136_v34 = vmax.f32 %v135_v29, 0.0 }
 0x211   :  { %v143_v32 = vsel %vm117_vm2, %v142_v30, 0.0  ;;  %v131_v33 = vsel %vm117_vm2, %v130_v31, 0.0  ;;  %v137_v35 = vsel %vm117_vm2, %v136_v34, 0.0 }
 0x212   :  { %144 = vadd.xlane.f32.xlu1 %v143_v32  ;;  %132 = vadd.xlane.f32.xlu0 %v131_v33 }
 0x216   :  { %138 = vadd.xlane.f32.xlu1 %v137_v35 }
 0x29f   :  { %v145_v36 = vpop.xlane.xlu1 %144  ;;  %v133_v37 = vpop.xlane.xlu0 %132 }
 0x2a0   :  { %vm146_vm3 = vcmp.lt.f32.partialorder %v145_v36, 1.0  ;;  %vm134_vm5 = vcmp.lt.f32.partialorder %v133_v37, 1.0 }
 0x2a1   :  { %v147_v39 = vsel %vm146_vm3, %v126_v26, %v128_v24  ;;  %v150_v40 = vsel %vm146_vm3, %v128_v24, %v120_v18 }
 0x2a3   :  { %v139_v38 = vpop.xlane.xlu1 %138 }
 0x2a4   :  { %vm140_vm4 = vcmp.lt.f32.partialorder %v139_v38, 1.0 }
 0x2a5   :  { %v148_v41 = vsel %vm140_vm4, %v124_v25, %v147_v39  ;;  %v151_v42 = vsel %vm140_vm4, %v126_v26, %v150_v40 }
 0x2a6   :  { %v149_v43 = vsel %vm134_vm5, %v822_v19, %v148_v41  ;;  %v152_v44 = vsel %vm134_vm5, %v124_v25, %v151_v42 }
 0x2a7   :  { %v153_v45 = vsub.f32 %v152_v44, %v149_v43 }
 0x2a9   :  { %v158_v46 = vmul.f32 0.75, %v153_v45  ;;  %v156_v47 = vmul.f32 0.5, %v153_v45  ;;  %v154_v48 = vmul.f32 0.25, %v153_v45 }
 0x2ab   :  { %v159_v49 = vadd.f32 %v158_v46, %v149_v43  ;;  %v157_v50 = vadd.f32 %v156_v47, %v149_v43  ;;  %v155_v51 = vadd.f32 %v154_v48, %v149_v43 }
 0x2ad   :  { %v172_v52 = vsub.f32 %v1071_v15, %v159_v49  ;;  %v166_v53 = vsub.f32 %v1071_v15, %v157_v50  ;;  %v160_v54 = vsub.f32 %v1071_v15, %v155_v51 }
 0x2af   :  { %v173_v55 = vmax.f32 %v172_v52, 0.0  ;;  %v167_v56 = vmax.f32 %v166_v53, 0.0  ;;  %v161_v59 = vmax.f32 %v160_v54, 0.0 }
 0x2b1   :  { %v174_v57 = vsel %vm117_vm2, %v173_v55, 0.0  ;;  %v168_v58 = vsel %vm117_vm2, %v167_v56, 0.0  ;;  %v162_v60 = vsel %vm117_vm2, %v161_v59, 0.0 }
 0x2b2   :  { %175 = vadd.xlane.f32.xlu1 %v174_v57  ;;  %169 = vadd.xlane.f32.xlu0 %v168_v58 }
 0x2b6   :  { %163 = vadd.xlane.f32.xlu1 %v162_v60 }
 0x33f   :  { %v176_v61 = vpop.xlane.xlu1 %175  ;;  %v170_v62 = vpop.xlane.xlu0 %169 }
 0x340   :  { %vm177_vm6 = vcmp.lt.f32.partialorder %v176_v61, 1.0  ;;  %vm171_vm7 = vcmp.lt.f32.partialorder %v170_v62, 1.0 }
 0x341   :  { %v178_v63 = vsel %vm177_vm6, %v157_v50, %v159_v49  ;;  %v181_v1 = vsel %vm177_vm6, %v159_v49, %v152_v44 }
 0x342   :  { %v179_v4 = vsel %vm171_vm7, %v155_v51, %v178_v63  ;;  %v182_v5 = vsel %vm171_vm7, %v157_v50, %v181_v1 }
 0x343   :  { %v164_v2 = vpop.xlane.xlu1 %163 }
 0x344   :  { %vm165_vm8 = vcmp.lt.f32.partialorder %v164_v2, 1.0 }
 0x345   :  { %v180_v6 = vsel %vm165_vm8, %v149_v43, %v179_v4  ;;  %v183_v8 = vsel %vm165_vm8, %v155_v51, %v182_v5 }
 0x346   :  { %v184_v9 = vsub.f32 %v183_v8, %v180_v6 }
 0x348   :  { %v185_v10 = vmul.f32 0.25, %v184_v9  ;;  %v187_v11 = vmul.f32 0.5, %v184_v9  ;;  %v189_v12 = vmul.f32 0.75, %v184_v9 }
 0x34a   :  { %v190_v13 = vadd.f32 %v189_v12, %v180_v6  ;;  %v188_v14 = vadd.f32 %v187_v11, %v180_v6  ;;  %v186_v16 = vadd.f32 %v185_v10, %v180_v6 }
 0x34c   :  { %v203_v17 = vsub.f32 %v1071_v15, %v190_v13  ;;  %v197_v18 = vsub.f32 %v1071_v15, %v188_v14  ;;  %v191_v19 = vsub.f32 %v1071_v15, %v186_v16 }
 0x34e   :  { %v204_v20 = vmax.f32 %v203_v17, 0.0  ;;  %v198_v21 = vmax.f32 %v197_v18, 0.0  ;;  %v192_v24 = vmax.f32 %v191_v19, 0.0 }
 0x350   :  { %v205_v22 = vsel %vm117_vm2, %v204_v20, 0.0  ;;  %v199_v23 = vsel %vm117_vm2, %v198_v21, 0.0  ;;  %v193_v25 = vsel %vm117_vm2, %v192_v24, 0.0 }
 0x351   :  { %206 = vadd.xlane.f32.xlu0 %v205_v22  ;;  %200 = vadd.xlane.f32.xlu1 %v199_v23 }
 0x355   :  { %194 = vadd.xlane.f32.xlu0 %v193_v25 }
 0x3de   :  { %v207_v26 = vpop.xlane.xlu0 %206  ;;  %v201_v27 = vpop.xlane.xlu1 %200 }
 0x3df   :  { %vm208_vm9 = vcmp.lt.f32.partialorder %v207_v26, 1.0  ;;  %vm202_vm10 = vcmp.lt.f32.partialorder %v201_v27, 1.0 }
 0x3e0   :  { %v209_v28 = vsel %vm208_vm9, %v188_v14, %v190_v13  ;;  %v212_v29 = vsel %vm208_vm9, %v190_v13, %v183_v8 }
 0x3e1   :  { %v210_v31 = vsel %vm202_vm10, %v186_v16, %v209_v28  ;;  %v213_v32 = vsel %vm202_vm10, %v188_v14, %v212_v29 }
 0x3e2   :  { %v195_v30 = vpop.xlane.xlu0 %194 }
 0x3e3   :  { %vm196_vm11 = vcmp.lt.f32.partialorder %v195_v30, 1.0 }
 0x3e4   :  { %v211_v33 = vsel %vm196_vm11, %v180_v6, %v210_v31  ;;  %v214_v34 = vsel %vm196_vm11, %v186_v16, %v213_v32 }
 0x3e5   :  { %v215_v35 = vsub.f32 %v214_v34, %v211_v33 }
 0x3e7   :  { %v216_v36 = vmul.f32 0.25, %v215_v35  ;;  %v218_v37 = vmul.f32 0.5, %v215_v35  ;;  %v220_v38 = vmul.f32 0.75, %v215_v35 }
 0x3e9   :  { %v221_v39 = vadd.f32 %v220_v38, %v211_v33  ;;  %v219_v40 = vadd.f32 %v218_v37, %v211_v33  ;;  %v217_v41 = vadd.f32 %v216_v36, %v211_v33 }
 0x3eb   :  { %v234_v42 = vsub.f32 %v1071_v15, %v221_v39  ;;  %v228_v43 = vsub.f32 %v1071_v15, %v219_v40  ;;  %v222_v44 = vsub.f32 %v1071_v15, %v217_v41 }
 0x3ed   :  { %v235_v45 = vmax.f32 %v234_v42, 0.0  ;;  %v229_v46 = vmax.f32 %v228_v43, 0.0  ;;  %v223_v49 = vmax.f32 %v222_v44, 0.0 }
 0x3ef   :  { %v236_v47 = vsel %vm117_vm2, %v235_v45, 0.0  ;;  %v230_v48 = vsel %vm117_vm2, %v229_v46, 0.0  ;;  %v224_v50 = vsel %vm117_vm2, %v223_v49, 0.0 }
 0x3f0   :  { %237 = vadd.xlane.f32.xlu1 %v236_v47  ;;  %231 = vadd.xlane.f32.xlu0 %v230_v48 }
 0x3f4   :  { %225 = vadd.xlane.f32.xlu1 %v224_v50 }
 0x47d   :  { %v238_v51 = vpop.xlane.xlu1 %237  ;;  %v232_v52 = vpop.xlane.xlu0 %231 }
 0x47e   :  { %vm239_vm12 = vcmp.lt.f32.partialorder %v238_v51, 1.0  ;;  %vm233_vm13 = vcmp.lt.f32.partialorder %v232_v52, 1.0 }
 0x47f   :  { %v240_v53 = vsel %vm239_vm12, %v219_v40, %v221_v39  ;;  %v243_v54 = vsel %vm239_vm12, %v221_v39, %v214_v34 }
 0x480   :  { %v241_v56 = vsel %vm233_vm13, %v217_v41, %v240_v53  ;;  %v244_v57 = vsel %vm233_vm13, %v219_v40, %v243_v54 }
 0x481   :  { %v226_v55 = vpop.xlane.xlu1 %225 }
 0x482   :  { %vm227_vm14 = vcmp.lt.f32.partialorder %v226_v55, 1.0 }
 0x483   :  { %v242_v58 = vsel %vm227_vm14, %v211_v33, %v241_v56  ;;  %v245_v59 = vsel %vm227_vm14, %v217_v41, %v244_v57 }
 0x484   :  { %v246_v60 = vsub.f32 %v245_v59, %v242_v58 }
 0x486   :  { %v247_v61 = vmul.f32 0.25, %v246_v60  ;;  %v249_v62 = vmul.f32 0.5, %v246_v60  ;;  %v251_v63 = vmul.f32 0.75, %v246_v60 }
 0x488   :  { %v252_v1 = vadd.f32 %v251_v63, %v242_v58  ;;  %v250_v2 = vadd.f32 %v249_v62, %v242_v58  ;;  %v248_v4 = vadd.f32 %v247_v61, %v242_v58 }
 0x48a   :  { %v265_v5 = vsub.f32 %v1071_v15, %v252_v1  ;;  %v259_v6 = vsub.f32 %v1071_v15, %v250_v2  ;;  %v253_v8 = vsub.f32 %v1071_v15, %v248_v4 }
 0x48c   :  { %v266_v9 = vmax.f32 %v265_v5, 0.0  ;;  %v260_v10 = vmax.f32 %v259_v6, 0.0  ;;  %v254_v13 = vmax.f32 %v253_v8, 0.0 }
 0x48e   :  { %v267_v11 = vsel %vm117_vm2, %v266_v9, 0.0  ;;  %v261_v12 = vsel %vm117_vm2, %v260_v10, 0.0  ;;  %v255_v14 = vsel %vm117_vm2, %v254_v13, 0.0 }
 0x48f   :  { %268 = vadd.xlane.f32.xlu0 %v267_v11  ;;  %262 = vadd.xlane.f32.xlu1 %v261_v12 }
 0x493   :  { %256 = vadd.xlane.f32.xlu0 %v255_v14 }
 0x51c   :  { %v269_v16 = vpop.xlane.xlu0 %268  ;;  %v263_v17 = vpop.xlane.xlu1 %262 }
 0x51d   :  { %vm270_vm15 = vcmp.lt.f32.partialorder %v269_v16, 1.0  ;;  %vm264_vm3 = vcmp.lt.f32.partialorder %v263_v17, 1.0 }
 0x51e   :  { %v271_v18 = vsel %vm270_vm15, %v250_v2, %v252_v1  ;;  %v274_v19 = vsel %vm270_vm15, %v252_v1, %v245_v59 }
 0x51f   :  { %v272_v21 = vsel %vm264_vm3, %v248_v4, %v271_v18  ;;  %v275_v22 = vsel %vm264_vm3, %v250_v2, %v274_v19 }
 0x520   :  { %v257_v20 = vpop.xlane.xlu0 %256 }
 0x521   :  { %vm258_vm4 = vcmp.lt.f32.partialorder %v257_v20, 1.0 }
 0x522   :  { %v273_v23 = vsel %vm258_vm4, %v242_v58, %v272_v21  ;;  %v276_v24 = vsel %vm258_vm4, %v248_v4, %v275_v22 }
 0x523   :  { %v277_v25 = vsub.f32 %v276_v24, %v273_v23 }
 0x525   :  { %v278_v26 = vmul.f32 0.25, %v277_v25  ;;  %v280_v27 = vmul.f32 0.5, %v277_v25  ;;  %v282_v28 = vmul.f32 0.75, %v277_v25 }
 0x527   :  { %v283_v29 = vadd.f32 %v282_v28, %v273_v23  ;;  %v281_v30 = vadd.f32 %v280_v27, %v273_v23  ;;  %v279_v31 = vadd.f32 %v278_v26, %v273_v23 }
 0x529   :  { %v296_v32 = vsub.f32 %v1071_v15, %v283_v29  ;;  %v290_v33 = vsub.f32 %v1071_v15, %v281_v30  ;;  %v284_v34 = vsub.f32 %v1071_v15, %v279_v31 }
 0x52b   :  { %v297_v35 = vmax.f32 %v296_v32, 0.0  ;;  %v291_v36 = vmax.f32 %v290_v33, 0.0  ;;  %v285_v39 = vmax.f32 %v284_v34, 0.0 }
 0x52d   :  { %v298_v37 = vsel %vm117_vm2, %v297_v35, 0.0  ;;  %v292_v38 = vsel %vm117_vm2, %v291_v36, 0.0  ;;  %v286_v40 = vsel %vm117_vm2, %v285_v39, 0.0 }
 0x52e   :  { %299 = vadd.xlane.f32.xlu1 %v298_v37  ;;  %293 = vadd.xlane.f32.xlu0 %v292_v38 }
 0x532   :  { %287 = vadd.xlane.f32.xlu1 %v286_v40 }
 0x5bb   :  { %v300_v41 = vpop.xlane.xlu1 %299  ;;  %v294_v42 = vpop.xlane.xlu0 %293 }
 0x5bc   :  { %vm301_vm5 = vcmp.lt.f32.partialorder %v300_v41, 1.0  ;;  %vm295_vm6 = vcmp.lt.f32.partialorder %v294_v42, 1.0 }
 0x5bd   :  { %v302_v43 = vsel %vm301_vm5, %v281_v30, %v283_v29  ;;  %v305_v44 = vsel %vm301_vm5, %v283_v29, %v276_v24 }
 0x5be   :  { %v303_v46 = vsel %vm295_vm6, %v279_v31, %v302_v43  ;;  %v306_v47 = vsel %vm295_vm6, %v281_v30, %v305_v44 }
 0x5bf   :  { %v288_v45 = vpop.xlane.xlu1 %287 }
 0x5c0   :  { %vm289_vm7 = vcmp.lt.f32.partialorder %v288_v45, 1.0 }
 0x5c1   :  { %v304_v48 = vsel %vm289_vm7, %v273_v23, %v303_v46  ;;  %v307_v49 = vsel %vm289_vm7, %v279_v31, %v306_v47 }
 0x5c2   :  { %v308_v50 = vsub.f32 %v307_v49, %v304_v48 }
 0x5c4   :  { %v309_v51 = vmul.f32 0.25, %v308_v50  ;;  %v311_v52 = vmul.f32 0.5, %v308_v50  ;;  %v313_v53 = vmul.f32 0.75, %v308_v50 }
 0x5c6   :  { %v314_v54 = vadd.f32 %v313_v53, %v304_v48  ;;  %v312_v55 = vadd.f32 %v311_v52, %v304_v48  ;;  %v310_v56 = vadd.f32 %v309_v51, %v304_v48 }
 0x5c8   :  { %v327_v57 = vsub.f32 %v1071_v15, %v314_v54  ;;  %v321_v58 = vsub.f32 %v1071_v15, %v312_v55  ;;  %v315_v59 = vsub.f32 %v1071_v15, %v310_v56 }
 0x5ca   :  { %v328_v60 = vmax.f32 %v327_v57, 0.0  ;;  %v322_v61 = vmax.f32 %v321_v58, 0.0  ;;  %v316_v1 = vmax.f32 %v315_v59, 0.0 }
 0x5cc   :  { %v329_v62 = vsel %vm117_vm2, %v328_v60, 0.0  ;;  %v323_v63 = vsel %vm117_vm2, %v322_v61, 0.0  ;;  %v317_v2 = vsel %vm117_vm2, %v316_v1, 0.0 }
 0x5cd   :  { %330 = vadd.xlane.f32.xlu0 %v329_v62  ;;  %324 = vadd.xlane.f32.xlu1 %v323_v63 }
 0x5d1   :  { %318 = vadd.xlane.f32.xlu0 %v317_v2 }
 0x65a   :  { %v331_v4 = vpop.xlane.xlu0 %330  ;;  %v325_v5 = vpop.xlane.xlu1 %324 }
 0x65b   :  { %vm332_vm8 = vcmp.lt.f32.partialorder %v331_v4, 1.0  ;;  %vm326_vm9 = vcmp.lt.f32.partialorder %v325_v5, 1.0 }
 0x65c   :  { %v333_v6 = vsel %vm332_vm8, %v312_v55, %v314_v54  ;;  %v336_v8 = vsel %vm332_vm8, %v314_v54, %v307_v49 }
 0x65d   :  { %v334_v10 = vsel %vm326_vm9, %v310_v56, %v333_v6  ;;  %v337_v11 = vsel %vm326_vm9, %v312_v55, %v336_v8 }
 0x65e   :  { %v319_v9 = vpop.xlane.xlu0 %318 }
 0x65f   :  { %vm320_vm10 = vcmp.lt.f32.partialorder %v319_v9, 1.0 }
 0x660   :  { %v335_v12 = vsel %vm320_vm10, %v304_v48, %v334_v10  ;;  %v338_v13 = vsel %vm320_vm10, %v310_v56, %v337_v11 }
 0x661   :  { %v339_v14 = vsub.f32 %v338_v13, %v335_v12 }
 0x663   :  { %v340_v16 = vmul.f32 0.25, %v339_v14  ;;  %v342_v17 = vmul.f32 0.5, %v339_v14  ;;  %v344_v18 = vmul.f32 0.75, %v339_v14 }
 0x665   :  { %v345_v19 = vadd.f32 %v344_v18, %v335_v12  ;;  %v343_v20 = vadd.f32 %v342_v17, %v335_v12  ;;  %v341_v21 = vadd.f32 %v340_v16, %v335_v12 }
 0x667   :  { %v358_v22 = vsub.f32 %v1071_v15, %v345_v19  ;;  %v352_v23 = vsub.f32 %v1071_v15, %v343_v20  ;;  %v346_v24 = vsub.f32 %v1071_v15, %v341_v21 }
 0x669   :  { %v359_v25 = vmax.f32 %v358_v22, 0.0  ;;  %v353_v26 = vmax.f32 %v352_v23, 0.0  ;;  %v347_v29 = vmax.f32 %v346_v24, 0.0 }
 0x66b   :  { %v360_v27 = vsel %vm117_vm2, %v359_v25, 0.0  ;;  %v354_v28 = vsel %vm117_vm2, %v353_v26, 0.0  ;;  %v348_v30 = vsel %vm117_vm2, %v347_v29, 0.0 }
 0x66c   :  { %361 = vadd.xlane.f32.xlu1 %v360_v27  ;;  %355 = vadd.xlane.f32.xlu0 %v354_v28 }
 0x670   :  { %349 = vadd.xlane.f32.xlu1 %v348_v30 }
 0x6f9   :  { %v362_v31 = vpop.xlane.xlu1 %361  ;;  %v356_v32 = vpop.xlane.xlu0 %355 }
 0x6fa   :  { %vm363_vm11 = vcmp.lt.f32.partialorder %v362_v31, 1.0  ;;  %vm357_vm12 = vcmp.lt.f32.partialorder %v356_v32, 1.0 }
 0x6fb   :  { %v364_v33 = vsel %vm363_vm11, %v343_v20, %v345_v19  ;;  %v367_v34 = vsel %vm363_vm11, %v345_v19, %v338_v13 }
 0x6fc   :  { %v365_v36 = vsel %vm357_vm12, %v341_v21, %v364_v33  ;;  %v368_v37 = vsel %vm357_vm12, %v343_v20, %v367_v34 }
 0x6fd   :  { %v350_v35 = vpop.xlane.xlu1 %349 }
 0x6fe   :  { %vm351_vm13 = vcmp.lt.f32.partialorder %v350_v35, 1.0 }
 0x6ff   :  { %v366_v38 = vsel %vm351_vm13, %v335_v12, %v365_v36  ;;  %v369_v39 = vsel %vm351_vm13, %v341_v21, %v368_v37 }
 0x700   :  { %v370_v40 = vsub.f32 %v369_v39, %v366_v38 }
 0x702   :  { %v371_v41 = vmul.f32 0.25, %v370_v40  ;;  %v373_v42 = vmul.f32 0.5, %v370_v40  ;;  %v375_v43 = vmul.f32 0.75, %v370_v40 }
 0x704   :  { %v376_v44 = vadd.f32 %v375_v43, %v366_v38  ;;  %v374_v45 = vadd.f32 %v373_v42, %v366_v38  ;;  %v372_v46 = vadd.f32 %v371_v41, %v366_v38 }
 0x706   :  { %v389_v47 = vsub.f32 %v1071_v15, %v376_v44  ;;  %v383_v48 = vsub.f32 %v1071_v15, %v374_v45  ;;  %v377_v49 = vsub.f32 %v1071_v15, %v372_v46 }
 0x708   :  { %v390_v50 = vmax.f32 %v389_v47, 0.0  ;;  %v384_v51 = vmax.f32 %v383_v48, 0.0  ;;  %v378_v54 = vmax.f32 %v377_v49, 0.0 }
 0x70a   :  { %v391_v52 = vsel %vm117_vm2, %v390_v50, 0.0  ;;  %v385_v53 = vsel %vm117_vm2, %v384_v51, 0.0  ;;  %v379_v55 = vsel %vm117_vm2, %v378_v54, 0.0 }
 0x70b   :  { %392 = vadd.xlane.f32.xlu0 %v391_v52  ;;  %386 = vadd.xlane.f32.xlu1 %v385_v53 }
 0x70f   :  { %380 = vadd.xlane.f32.xlu0 %v379_v55 }
 0x798   :  { %v393_v56 = vpop.xlane.xlu0 %392  ;;  %v387_v57 = vpop.xlane.xlu1 %386 }
 0x799   :  { %vm394_vm14 = vcmp.lt.f32.partialorder %v393_v56, 1.0  ;;  %vm388_vm15 = vcmp.lt.f32.partialorder %v387_v57, 1.0 }
 0x79a   :  { %v395_v58 = vsel %vm394_vm14, %v374_v45, %v376_v44  ;;  %v398_v59 = vsel %vm394_vm14, %v376_v44, %v369_v39 }
 0x79b   :  { %v396_v61 = vsel %vm388_vm15, %v372_v46, %v395_v58  ;;  %v399_v62 = vsel %vm388_vm15, %v374_v45, %v398_v59 }
 0x79c   :  { %v381_v60 = vpop.xlane.xlu0 %380 }
 0x79d   :  { %vm382_vm3 = vcmp.lt.f32.partialorder %v381_v60, 1.0 }
 0x79e   :  { %v397_v63 = vsel %vm382_vm3, %v366_v38, %v396_v61  ;;  %v400_v1 = vsel %vm382_vm3, %v372_v46, %v399_v62  ;;  %v481_v61 = vld [vmem:[%s1255_s1] sm:$0xff] }
 0x79f   :  { %v401_v2 = vsub.f32 %v400_v1, %v397_v63  ;;  %876 = vmatpush3.msra.mxu0 %v481_v61 }
 0x7a0   :  { %943 = vmatprep.subr.bf16.mxu0 %v986_v3 }
 0x7a1   :  { %v402_v4 = vmul.f32 0.25, %v401_v2  ;;  %v404_v5 = vmul.f32 0.5, %v401_v2  ;;  %v406_v6 = vmul.f32 0.75, %v401_v2 }
 0x7a3   :  { %v407_v8 = vadd.f32 %v406_v6, %v397_v63  ;;  %v405_v9 = vadd.f32 %v404_v5, %v397_v63  ;;  %v403_v10 = vadd.f32 %v402_v4, %v397_v63  ;;  %v559_v6 = vld [vmem:[%s1256_s4] sm:$0xff] }
 0x7a5   :  { %v420_v11 = vsub.f32 %v1071_v15, %v407_v8  ;;  %v414_v12 = vsub.f32 %v1071_v15, %v405_v9  ;;  %v408_v13 = vsub.f32 %v1071_v15, %v403_v10 }
 0x7a7   :  { %v421_v14 = vmax.f32 %v420_v11, 0.0  ;;  %v415_v16 = vmax.f32 %v414_v12, 0.0  ;;  %v409_v19 = vmax.f32 %v408_v13, 0.0  ;;  %v561_v12 = vld [vmem:[%s1256_s4 + $0x10] sm:$0xff]  ;;  %v562_v13 = vld [vmem:[%s1256_s4 + $0x18] sm:$0xff] }
 0x7a9   :  { %v422_v17 = vsel %vm117_vm2, %v421_v14, 0.0  ;;  %v416_v18 = vsel %vm117_vm2, %v415_v16, 0.0  ;;  %v410_v20 = vsel %vm117_vm2, %v409_v19, 0.0  ;;  %v947_v14 = vpack.c.bf16 %v562_v13, %v561_v12  ;;  %v719_v16 = vld [vmem:[%s1257_s6 + $0x8] sm:$0xff]  ;;  %v721_v19 = vld [vmem:[%s1257_s6 + $0x18] sm:$0xff] }
 0x7aa   :  { %423 = vadd.xlane.f32.xlu1 %v422_v17  ;;  %417 = vadd.xlane.f32.xlu0 %v416_v18  ;;  %v720_v17 = vld [vmem:[%s1257_s6 + $0x10] sm:$0xff] }
 0x7ae   :  { %411 = vadd.xlane.f32.xlu1 %v410_v20  ;;  %v959_v20 = vpack.c.bf16 %v721_v19, %v720_v17 }
 0x837   :  { %v424_v21 = vpop.xlane.xlu1 %423  ;;  %v418_v22 = vpop.xlane.xlu0 %417 }
 0x838   :  { %vm425_vm4 = vcmp.lt.f32.partialorder %v424_v21, 1.0  ;;  %vm419_vm5 = vcmp.lt.f32.partialorder %v418_v22, 1.0  ;;  %v722_v21 = vld [vmem:[%s1257_s6 + $0x20] sm:$0xff]  ;;  %v723_v22 = vld [vmem:[%s1257_s6 + $0x28] sm:$0xff] }
 0x839   :  { %v426_v23 = vsel %vm425_vm4, %v405_v9, %v407_v8  ;;  %v429_v24 = vsel %vm425_vm4, %v407_v8, %v400_v1  ;;  %v560_v8 = vld [vmem:[%s1256_s4 + $0x8] sm:$0xff] }
 0x83a   :  { %v427_v26 = vsel %vm419_vm5, %v403_v10, %v426_v23  ;;  %v430_v27 = vsel %vm419_vm5, %v405_v9, %v429_v24  ;;  %v962_v23 = vpack.c.bf16 %v723_v22, %v722_v21  ;;  %v724_v24 = vld [vmem:[%s1257_s6 + $0x30] sm:$0xff] }
 0x83b   :  { %v412_v25 = vpop.xlane.xlu1 %411 }
 0x83c   :  { %vm413_vm6 = vcmp.lt.f32.partialorder %v412_v25, 1.0  ;;  %v725_v25 = vld [vmem:[%s1257_s6 + $0x38] sm:$0xff] }
 0x83d   :  { %v428_v28 = vsel %vm413_vm6, %v397_v63, %v427_v26  ;;  %v431_v29 = vsel %vm413_vm6, %v403_v10, %v430_v27  ;;  %v944_v10 = vpack.c.bf16 %v560_v8, %v559_v6  ;;  %v965_v26 = vpack.c.bf16 %v725_v25, %v724_v24  ;;  %v726_v27 = vld [vmem:[%s1257_s6 + $0x40] sm:$0xff] }
 0x83e   :  { %v432_v30 = vsub.f32 %v431_v29, %v428_v28 }
 0x840   :  { %v433_v31 = vmul.f32 0.25, %v432_v30  ;;  %v435_v32 = vmul.f32 0.5, %v432_v30  ;;  %v437_v33 = vmul.f32 0.75, %v432_v30  ;;  %v555_v30 = vld [vmem:[%s1258_s3] sm:$0xff] }
 0x842   :  { %v438_v34 = vadd.f32 %v437_v33, %v428_v28  ;;  %v436_v35 = vadd.f32 %v435_v32, %v428_v28  ;;  %v434_v36 = vadd.f32 %v433_v31, %v428_v28  ;;  %v556_v31 = vld [vmem:[%s1258_s3 + $0x8] sm:$0xff]  ;;  %v557_v33 = vld [vmem:[%s1258_s3 + $0x10] sm:$0xff] }
 0x843   :  { %v950_v32 = vpack.c.bf16 %v556_v31, %v555_v30 }
 0x844   :  { %v451_v37 = vsub.f32 %v1071_v15, %v438_v34  ;;  %v445_v38 = vsub.f32 %v1071_v15, %v436_v35  ;;  %v439_v39 = vsub.f32 %v1071_v15, %v434_v36 }
 0x846   :  { %v452_v40 = vmax.f32 %v451_v37, 0.0  ;;  %v446_v41 = vmax.f32 %v445_v38, 0.0  ;;  %v440_v44 = vmax.f32 %v439_v39, 0.0  ;;  %v728_v38 = vld [vmem:[%s1257_s6 + $0x50] sm:$0xff]  ;;  %v729_v39 = vld [vmem:[%s1257_s6 + $0x58] sm:$0xff] }
 0x848   :  { %v453_v42 = vsel %vm117_vm2, %v452_v40, 0.0  ;;  %v447_v43 = vsel %vm117_vm2, %v446_v41, 0.0  ;;  %v441_v45 = vsel %vm117_vm2, %v440_v44, 0.0  ;;  %v971_v40 = vpack.c.bf16 %v729_v39, %v728_v38 }
 0x849   :  { %454 = vadd.xlane.f32.xlu0 %v453_v42  ;;  %448 = vadd.xlane.f32.xlu1 %v447_v43  ;;  %v732_v42 = vld [vmem:[%s1257_s6 + $0x70] sm:$0xff]  ;;  %v733_v43 = vld [vmem:[%s1257_s6 + $0x78] sm:$0xff] }
 0x84a   :  { %v977_v44 = vpack.c.bf16 %v733_v43, %v732_v42 }
 0x84d   :  { %442 = vadd.xlane.f32.xlu0 %v441_v45 }
 0x8d6   :  { %v455_v46 = vpop.xlane.xlu0 %454  ;;  %v449_v47 = vpop.xlane.xlu1 %448 }
 0x8d7   :  { %vm456_vm7 = vcmp.lt.f32.partialorder %v455_v46, 1.0  ;;  %vm450_vm8 = vcmp.lt.f32.partialorder %v449_v47, 1.0 }
 0x8d8   :  { %v457_v48 = vsel %vm456_vm7, %v436_v35, %v438_v34  ;;  %v460_v49 = vsel %vm456_vm7, %v438_v34, %v431_v29  ;;  %v558_v34 = vld [vmem:[%s1258_s3 + $0x18] sm:$0xff] }
 0x8d9   :  { %v458_v51 = vsel %vm450_vm8, %v434_v36, %v457_v48  ;;  %v461_v52 = vsel %vm450_vm8, %v436_v35, %v460_v49  ;;  %v953_v37 = vpack.c.bf16 %v558_v34, %v557_v33  ;;  %v828_v48 = vld [vmem:[%s1259_s5] ss:$0 sm:$0xff] }
 0x8da   :  { %v443_v50 = vpop.xlane.xlu0 %442 }
 0x8db   :  { %vm444_vm9 = vcmp.lt.f32.partialorder %v443_v50, 1.0 }
 0x8dc   :  { %v459_v53 = vsel %vm444_vm9, %v428_v28, %v458_v51  ;;  %v462_v54 = vsel %vm444_vm9, %v434_v36, %v461_v52  ;;  %v727_v28 = vld [vmem:[%s1257_s6 + $0x48] sm:$0xff]  ;;  %v829_v52 = vld [vmem:[%s1261_s7] ss:$0 sm:$0xff] }
 0x8dd   :  { %v463_v55 = vadd.f32 %v462_v54, %v459_v53  ;;  %v968_v29 = vpack.c.bf16 %v727_v28, %v726_v27 }
 0x8df   :  { %v464_v56 = vmul.f32 0.5, %v463_v55 }
 0x8e1   :  { %vm465_vm10 = vcmp.gt.f32.partialorder %v1071_v15, %v464_v56 }
 0x8e2   :  { %v823_v57 = vsel %vm465_vm10, 1.0, %v988_v7 }
 0x8e3   :  { %v468_v58 = vsel %vm117_vm2, %v823_v57, 0.0  ;;  %v472_v59 = vmul.f32 %v823_v57, %v1071_v15 }
 0x8e4   :  { %469 = vadd.xlane.f32.xlu1 %v468_v58 }
 0x8e5   :  { %v473_v60 = vsel %vm117_vm2, %v472_v59, 0.0 }
 0x8e6   :  { %474 = vadd.xlane.f32.xlu0 %v473_v60 }
 0x971   :  { %v470_v62 = vpop.xlane.xlu1 %469 }
 0x972   :  { %v471_v63 = vmax.f32 %v470_v62, 1.0 }
 0x973   :  { %v475_v1 = vpop.xlane.xlu0 %474 }
 0x974   :  { %984 = vrcp.f32 %v471_v63  ;;  %v824_v2 = vadd.f32 -1.0, %v475_v1 }
 0x97e   :  { %v985_v4 = vpop.eup %984 }
 0x97f   :  { %v478_v5 = vmul.f32 %v985_v4, %v824_v2 }
 0x981   :  { %v479_v9 = vsub.f32 %v1071_v15, %v478_v5  ;;  %v718_v15 = vld [vmem:[%s1257_s6] sm:$0xff] }
 0x982   :  { %v956_v18 = vpack.c.bf16 %v719_v16, %v718_v15 }
 0x983   :  { %v480_v11 = vmax.f32 %v479_v9, 0.0 }
 0x984   :  { %957 = vmatpush3.bf16.msra.mxu1 %v956_v18 }
 0x985   :  { %878 = vmatmul.mubr.msk.f32.vlgmr.msra.gmra.mrb[2].mxu0 %vm117_vm2, %v480_v11  ;;  %958 = vmatprep.subr.bf16.mxu1 %v986_v3 }
 0x986   :  { %945 = vmatpush3.bf16.msra.mxu0 %v944_v10  ;;  %888 = vmatprep.mubr.msk.f32.mxu0 %vm987_vm1, %v988_v7 }
 0x987   :  { %946 = vmatprep.subr.bf16.mxu0 %v986_v3 }
 0x988   :  { %960 = vmatpush3.bf16.msra.mxu1 %v959_v20 }
 0x989   :  { %961 = vmatprep.subr.bf16.mxu1 %v986_v3 }
 0x98a   :  { %948 = vmatpush3.bf16.msra.mxu0 %v947_v14 }
 0x98b   :  { %949 = vmatprep.subr.bf16.mxu0 %v986_v3 }
 0x98c   :  { %963 = vmatpush3.bf16.msra.mxu1 %v962_v23 }
 0x98d   :  { %964 = vmatprep.subr.bf16.mxu1 %v986_v3 }
 0x990   :  { %966 = vmatpush3.bf16.msra.mxu1 %v965_v26 }
 0x991   :  { %967 = vmatprep.subr.bf16.mxu1 %v986_v3 }
 0x994   :  { %969 = vmatpush3.bf16.msra.mxu1 %v968_v29 }
 0x995   :  { %970 = vmatprep.subr.bf16.mxu1 %v986_v3 }
 0x998   :  { %972 = vmatpush3.bf16.msra.mxu1 %v971_v40 }
 0x999   :  { %973 = vmatprep.subr.bf16.mxu1 %v986_v3 }
 0xa58   :  { %v551_v35 = vpop.f32.mrb[2].mxu0 }
 0xa59   :  { %v879_v36 = vpop.f32.mrb[3].mxu0  ;;  %889 = vmatmul.mubr.msk.f32.vlgmr.msra.gmra.mrb[4].mxu0 %vm33_vm0, %v551_v35 }
 0xa5a   :  { %951 = vmatpush3.bf16.msra.mxu0 %v950_v32  ;;  %899 = vmatprep.mubr.msk.f32.mxu0 %vm987_vm1, %v988_v7  ;;  %v730_v7 = vld [vmem:[%s1257_s6 + $0x60] sm:$0xff] }
 0xa5b   :  { %952 = vmatprep.subr.bf16.mxu0 %v986_v3 }
 0xa5e   :  { %954 = vmatpush3.bf16.msra.mxu0 %v953_v37 }
 0xa61   :  { %900 = vmatmul.mubr.msk.f32.vlgmr.msra.gmra.mrb[6].mxu0 %vm33_vm0, %v1042_v0  ;;  %v731_v0 = vld [vmem:[%s1257_s6 + $0x68] sm:$0xff] }
 0xa62   :  { %v974_v41 = vpack.c.bf16 %v731_v0, %v730_v7 }
 0xa64   :  { %975 = vmatpush3.bf16.msra.mxu1 %v974_v41 }
 0xa65   :  { %976 = vmatprep.subr.bf16.mxu1 %v986_v3 }
 0xa68   :  { %978 = vmatpush3.bf16.msra.mxu1 %v977_v44 }
 0xb2c   :  { %v632_v45 = vpop.f32.mrb[4].mxu0 }
 0xb2d   :  { %v890_v46 = vpop.f32.mrb[5].mxu0 }
 0xb34   :  { %v705_v47 = vpop.f32.mrb[6].mxu0 }
 0xb35   :  { %v706_v49 = vadd.f32 %v705_v47, %v632_v45  ;;  %v901_v50 = vpop.f32.mrb[7].mxu0 }
 0xb37   :  { %v716_v3 = vadd.f32 %v828_v48, %v706_v49 }
 0xb39   :  { %v717_v51 = vmax.f32 %v716_v3, 0.0 }
 0xb3b   :  { %812 = vst [vmem:[%s1260_s9] sm:$0xff] %v717_v51  ;;  %935 = vmatmul.mubr.f32.vlgmr.msra.gmra.mrb[0].mxu1 %v717_v51 }
 0xc0e   :  { %v807_v53 = vpop.f32.mrb[0].mxu1 }
 0xc0f   :  { %v808_v54 = vadd.f32 %v829_v52, %v807_v53  ;;  %v936_v55 = vpop.f32.mrb[1].mxu1 }
 0xc11   :  { %811 = vst [vmem:[%s1262_s8] sm:$0xff] %v808_v54 }

// kernel: _memory_wrap_forward.1
= control target key start
LH: loop header
LB: loop body
LE: loop exit
PB: predicated region body
PF: predicated region fallthrough
CT: control target
= control target key end

     0   :  { %vm33_vm0 = vcmask 261120   ;;  %v986_v3 = vmov 0.0|0.0   ;;  %vm987_vm1 = vmmov 0   ;;  %v988_v7 = vmov 0.0   ;;  %s1253_s0 = inlined_call_operand.vmem [shape: f32[8,32], index: 0, kind: input, shape index: {}]   ;;  %s1254_s2 = inlined_call_operand.vmem [shape: f32[32,8], index: 2, kind: input, shape index: {}]   ;;  %s1255_s1 = inlined_call_operand.vmem [shape: f32[8,32], index: 1, kind: input, shape index: {}]   ;;  %s1256_s4 = inlined_call_operand.vmem [shape: f32[32,128], index: 4, kind: input, shape index: {}]   ;;  %s1257_s6 = inlined_call_operand.vmem [shape: f32[128,128], index: 6, kind: input, shape index: {}]   ;;  %s1258_s3 = inlined_call_operand.vmem [shape: f32[32,128], index: 3, kind: input, shape index: {}]   ;;  %s1259_s5 = inlined_call_operand.vmem [shape: f32[1,128], index: 5, kind: input, shape index: {}]   ;;  %s1260_s9 = inlined_call_operand.vmem [shape: f32[8,128], index: 9, kind: output, shape index: {1}]   ;;  %s1261_s7 = inlined_call_operand.vmem [shape: f32[1,128], index: 7, kind: input, shape index: {}]   ;;  %s1262_s8 = inlined_call_operand.vmem [shape: f32[8,128], index: 8, kind: output, shape index: {0}]  }
   0x1   :  { %v1042_v0 = vld [vmem:[%s1253_s0] sm:$0xff]  ;;  %937 = vmatprep.subr.bf16.mxu0 %v986_v3  ;;  %v41_v5 = vld [vmem:[%s1254_s2 + $0x8] sm:$0xff]  ;;  %v42_v6 = vld [vmem:[%s1254_s2 + $0x10] sm:$0xff]  ;;  %872 = vmatprep.mubr.msk.f32.mxu0 %vm987_vm1, %v988_v7  ;;  %vm117_vm2 = vcmask 64512  }
   0x2   :  { %v32_v1 = vmul.f32 %v1042_v0, %v1042_v0  ;;  %v40_v4 = vld [vmem:[%s1254_s2] sm:$0xff]  ;;  %v43_v9 = vld [vmem:[%s1254_s2 + $0x18] sm:$0xff]  ;;  %955 = vmatprep.subr.bf16.mxu1 %v986_v3  ;;  %934 = vmatprep.mubr.msk.f32.mxu1 %vm987_vm1, %v988_v7 }
   0x3   :  { %v938_v8 = vpack.c.bf16 %v41_v5, %v40_v4  ;;  %v941_v10 = vpack.c.bf16 %v43_v9, %v42_v6 }
   0x4   :  { %v34_v2 = vsel %vm33_vm0, %v32_v1, 0.0 }
   0x5   :  { %35 = vadd.xlane.f32.xlu0 %v34_v2  ;;  %939 = vmatpush3.bf16.msra.mxu0 %v938_v8 }
   0x6   :  { %940 = vmatprep.subr.bf16.mxu0 %v986_v3 }
   0x9   :  { %942 = vmatpush3.bf16.msra.mxu0 %v941_v10 }
   0xa   :  { %875 = vmatprep.subr.mxu0 %v988_v7 }
  0x92   :  { %v36_v11 = vpop.xlane.xlu0 %35 }
  0x93   :  { %v37_v12 = vadd.f32 1e-06, %v36_v11 }
  0x95   :  { %982 = vrsqrt.f32 %v37_v12 }
  0x9f   :  { %v983_v13 = vpop.eup %982 }
  0xa0   :  { %v39_v14 = vmul.f32 %v983_v13, %v1042_v0 }
  0xa2   :  { %873 = vmatmul.mubr.msk.f32.vlgmr.msra.gmra.mrb[0].mxu0 %vm33_vm0, %v39_v14 }
  0xa3   :  { %877 = vmatprep.mubr.msk.f32.mxu0 %vm987_vm1, %v988_v7 }
 0x175   :  { %v1071_v15 = vpop.f32.mrb[0].mxu0 }
 0x176   :  { %v874_v16 = vpop.f32.mrb[1].mxu0  ;;  %v118_v17 = vsel %vm117_vm2, %v1071_v15, -inf }
 0x177   :  { %119 = vmax.xlane.f32.xlu0 %v118_v17 }
 0x204   :  { %v120_v18 = vpop.xlane.xlu0 %119 }
 0x205   :  { %v822_v19 = vadd.f32 -1.0, %v120_v18 }
 0x207   :  { %v122_v20 = vsub.f32 %v120_v18, %v822_v19 }
 0x209   :  { %v123_v21 = vmul.f32 0.25, %v122_v20  ;;  %v125_v22 = vmul.f32 0.5, %v122_v20  ;;  %v127_v23 = vmul.f32 0.75, %v122_v20 }
 0x20b   :  { %v128_v24 = vadd.f32 %v822_v19, %v127_v23  ;;  %v124_v25 = vadd.f32 %v822_v19, %v123_v21  ;;  %v126_v26 = vadd.f32 %v822_v19, %v125_v22 }
 0x20d   :  { %v141_v27 = vsub.f32 %v1071_v15, %v128_v24  ;;  %v129_v28 = vsub.f32 %v1071_v15, %v124_v25  ;;  %v135_v29 = vsub.f32 %v1071_v15, %v126_v26 }
 0x20f   :  { %v142_v30 = vmax.f32 %v141_v27, 0.0  ;;  %v130_v31 = vmax.f32 %v129_v28, 0.0  ;;  %v136_v34 = vmax.f32 %v135_v29, 0.0 }
 0x211   :  { %v143_v32 = vsel %vm117_vm2, %v142_v30, 0.0  ;;  %v131_v33 = vsel %vm117_vm2, %v130_v31, 0.0  ;;  %v137_v35 = vsel %vm117_vm2, %v136_v34, 0.0 }
 0x212   :  { %144 = vadd.xlane.f32.xlu1 %v143_v32  ;;  %132 = vadd.xlane.f32.xlu0 %v131_v33 }
 0x216   :  { %138 = vadd.xlane.f32.xlu1 %v137_v35 }
 0x29f   :  { %v145_v36 = vpop.xlane.xlu1 %144  ;;  %v133_v37 = vpop.xlane.xlu0 %132 }
 0x2a0   :  { %vm146_vm3 = vcmp.lt.f32.partialorder %v145_v36, 1.0  ;;  %vm134_vm5 = vcmp.lt.f32.partialorder %v133_v37, 1.0 }
 0x2a1   :  { %v147_v39 = vsel %vm146_vm3, %v126_v26, %v128_v24  ;;  %v150_v40 = vsel %vm146_vm3, %v128_v24, %v120_v18 }
 0x2a3   :  { %v139_v38 = vpop.xlane.xlu1 %138 }
 0x2a4   :  { %vm140_vm4 = vcmp.lt.f32.partialorder %v139_v38, 1.0 }
 0x2a5   :  { %v148_v41 = vsel %vm140_vm4, %v124_v25, %v147_v39  ;;  %v151_v42 = vsel %vm140_vm4, %v126_v26, %v150_v40 }
 0x2a6   :  { %v149_v43 = vsel %vm134_vm5, %v822_v19, %v148_v41  ;;  %v152_v44 = vsel %vm134_vm5, %v124_v25, %v151_v42 }
 0x2a7   :  { %v153_v45 = vsub.f32 %v152_v44, %v149_v43 }
 0x2a9   :  { %v158_v46 = vmul.f32 0.75, %v153_v45  ;;  %v156_v47 = vmul.f32 0.5, %v153_v45  ;;  %v154_v48 = vmul.f32 0.25, %v153_v45 }
 0x2ab   :  { %v159_v49 = vadd.f32 %v158_v46, %v149_v43  ;;  %v157_v50 = vadd.f32 %v156_v47, %v149_v43  ;;  %v155_v51 = vadd.f32 %v154_v48, %v149_v43 }
 0x2ad   :  { %v172_v52 = vsub.f32 %v1071_v15, %v159_v49  ;;  %v166_v53 = vsub.f32 %v1071_v15, %v157_v50  ;;  %v160_v54 = vsub.f32 %v1071_v15, %v155_v51 }
 0x2af   :  { %v173_v55 = vmax.f32 %v172_v52, 0.0  ;;  %v167_v56 = vmax.f32 %v166_v53, 0.0  ;;  %v161_v59 = vmax.f32 %v160_v54, 0.0 }
 0x2b1   :  { %v174_v57 = vsel %vm117_vm2, %v173_v55, 0.0  ;;  %v168_v58 = vsel %vm117_vm2, %v167_v56, 0.0  ;;  %v162_v60 = vsel %vm117_vm2, %v161_v59, 0.0 }
 0x2b2   :  { %175 = vadd.xlane.f32.xlu1 %v174_v57  ;;  %169 = vadd.xlane.f32.xlu0 %v168_v58 }
 0x2b6   :  { %163 = vadd.xlane.f32.xlu1 %v162_v60 }
 0x33f   :  { %v176_v61 = vpop.xlane.xlu1 %175  ;;  %v170_v62 = vpop.xlane.xlu0 %169 }
 0x340   :  { %vm177_vm6 = vcmp.lt.f32.partialorder %v176_v61, 1.0  ;;  %vm171_vm7 = vcmp.lt.f32.partialorder %v170_v62, 1.0 }
 0x341   :  { %v178_v63 = vsel %vm177_vm6, %v157_v50, %v159_v49  ;;  %v181_v1 = vsel %vm177_vm6, %v159_v49, %v152_v44 }
 0x342   :  { %v179_v4 = vsel %vm171_vm7, %v155_v51, %v178_v63  ;;  %v182_v5 = vsel %vm171_vm7, %v157_v50, %v181_v1 }
 0x343   :  { %v164_v2 = vpop.xlane.xlu1 %163 }
 0x344   :  { %vm165_vm8 = vcmp.lt.f32.partialorder %v164_v2, 1.0 }
 0x345   :  { %v180_v6 = vsel %vm165_vm8, %v149_v43, %v179_v4  ;;  %v183_v8 = vsel %vm165_vm8, %v155_v51, %v182_v5 }
 0x346   :  { %v184_v9 = vsub.f32 %v183_v8, %v180_v6 }
 0x348   :  { %v185_v10 = vmul.f32 0.25, %v184_v9  ;;  %v187_v11 = vmul.f32 0.5, %v184_v9  ;;  %v189_v12 = vmul.f32 0.75, %v184_v9 }
 0x34a   :  { %v190_v13 = vadd.f32 %v189_v12, %v180_v6  ;;  %v188_v14 = vadd.f32 %v187_v11, %v180_v6  ;;  %v186_v16 = vadd.f32 %v185_v10, %v180_v6 }
 0x34c   :  { %v203_v17 = vsub.f32 %v1071_v15, %v190_v13  ;;  %v197_v18 = vsub.f32 %v1071_v15, %v188_v14  ;;  %v191_v19 = vsub.f32 %v1071_v15, %v186_v16 }
 0x34e   :  { %v204_v20 = vmax.f32 %v203_v17, 0.0  ;;  %v198_v21 = vmax.f32 %v197_v18, 0.0  ;;  %v192_v24 = vmax.f32 %v191_v19, 0.0 }
 0x350   :  { %v205_v22 = vsel %vm117_vm2, %v204_v20, 0.0  ;;  %v199_v23 = vsel %vm117_vm2, %v198_v21, 0.0  ;;  %v193_v25 = vsel %vm117_vm2, %v192_v24, 0.0 }
 0x351   :  { %206 = vadd.xlane.f32.xlu0 %v205_v22  ;;  %200 = vadd.xlane.f32.xlu1 %v199_v23 }
 0x355   :  { %194 = vadd.xlane.f32.xlu0 %v193_v25 }
 0x3de   :  { %v207_v26 = vpop.xlane.xlu0 %206  ;;  %v201_v27 = vpop.xlane.xlu1 %200 }
 0x3df   :  { %vm208_vm9 = vcmp.lt.f32.partialorder %v207_v26, 1.0  ;;  %vm202_vm10 = vcmp.lt.f32.partialorder %v201_v27, 1.0 }
 0x3e0   :  { %v209_v28 = vsel %vm208_vm9, %v188_v14, %v190_v13  ;;  %v212_v29 = vsel %vm208_vm9, %v190_v13, %v183_v8 }
 0x3e1   :  { %v210_v31 = vsel %vm202_vm10, %v186_v16, %v209_v28  ;;  %v213_v32 = vsel %vm202_vm10, %v188_v14, %v212_v29 }
 0x3e2   :  { %v195_v30 = vpop.xlane.xlu0 %194 }
 0x3e3   :  { %vm196_vm11 = vcmp.lt.f32.partialorder %v195_v30, 1.0 }
 0x3e4   :  { %v211_v33 = vsel %vm196_vm11, %v180_v6, %v210_v31  ;;  %v214_v34 = vsel %vm196_vm11, %v186_v16, %v213_v32 }
 0x3e5   :  { %v215_v35 = vsub.f32 %v214_v34, %v211_v33 }
 0x3e7   :  { %v216_v36 = vmul.f32 0.25, %v215_v35  ;;  %v218_v37 = vmul.f32 0.5, %v215_v35  ;;  %v220_v38 = vmul.f32 0.75, %v215_v35 }
 0x3e9   :  { %v221_v39 = vadd.f32 %v220_v38, %v211_v33  ;;  %v219_v40 = vadd.f32 %v218_v37, %v211_v33  ;;  %v217_v41 = vadd.f32 %v216_v36, %v211_v33 }
 0x3eb   :  { %v234_v42 = vsub.f32 %v1071_v15, %v221_v39  ;;  %v228_v43 = vsub.f32 %v1071_v15, %v219_v40  ;;  %v222_v44 = vsub.f32 %v1071_v15, %v217_v41 }
 0x3ed   :  { %v235_v45 = vmax.f32 %v234_v42, 0.0  ;;  %v229_v46 = vmax.f32 %v228_v43, 0.0  ;;  %v223_v49 = vmax.f32 %v222_v44, 0.0 }
 0x3ef   :  { %v236_v47 = vsel %vm117_vm2, %v235_v45, 0.0  ;;  %v230_v48 = vsel %vm117_vm2, %v229_v46, 0.0  ;;  %v224_v50 = vsel %vm117_vm2, %v223_v49, 0.0 }
 0x3f0   :  { %237 = vadd.xlane.f32.xlu1 %v236_v47  ;;  %231 = vadd.xlane.f32.xlu0 %v230_v48 }
 0x3f4   :  { %225 = vadd.xlane.f32.xlu1 %v224_v50 }
 0x47d   :  { %v238_v51 = vpop.xlane.xlu1 %237  ;;  %v232_v52 = vpop.xlane.xlu0 %231 }
 0x47e   :  { %vm239_vm12 = vcmp.lt.f32.partialorder %v238_v51, 1.0  ;;  %vm233_vm13 = vcmp.lt.f32.partialorder %v232_v52, 1.0 }
 0x47f   :  { %v240_v53 = vsel %vm239_vm12, %v219_v40, %v221_v39  ;;  %v243_v54 = vsel %vm239_vm12, %v221_v39, %v214_v34 }
 0x480   :  { %v241_v56 = vsel %vm233_vm13, %v217_v41, %v240_v53  ;;  %v244_v57 = vsel %vm233_vm13, %v219_v40, %v243_v54 }
 0x481   :  { %v226_v55 = vpop.xlane.xlu1 %225 }
 0x482   :  { %vm227_vm14 = vcmp.lt.f32.partialorder %v226_v55, 1.0 }
 0x483   :  { %v242_v58 = vsel %vm227_vm14, %v211_v33, %v241_v56  ;;  %v245_v59 = vsel %vm227_vm14, %v217_v41, %v244_v57 }
 0x484   :  { %v246_v60 = vsub.f32 %v245_v59, %v242_v58 }
 0x486   :  { %v247_v61 = vmul.f32 0.25, %v246_v60  ;;  %v249_v62 = vmul.f32 0.5, %v246_v60  ;;  %v251_v63 = vmul.f32 0.75, %v246_v60 }
 0x488   :  { %v252_v1 = vadd.f32 %v251_v63, %v242_v58  ;;  %v250_v2 = vadd.f32 %v249_v62, %v242_v58  ;;  %v248_v4 = vadd.f32 %v247_v61, %v242_v58 }
 0x48a   :  { %v265_v5 = vsub.f32 %v1071_v15, %v252_v1  ;;  %v259_v6 = vsub.f32 %v1071_v15, %v250_v2  ;;  %v253_v8 = vsub.f32 %v1071_v15, %v248_v4 }
 0x48c   :  { %v266_v9 = vmax.f32 %v265_v5, 0.0  ;;  %v260_v10 = vmax.f32 %v259_v6, 0.0  ;;  %v254_v13 = vmax.f32 %v253_v8, 0.0 }
 0x48e   :  { %v267_v11 = vsel %vm117_vm2, %v266_v9, 0.0  ;;  %v261_v12 = vsel %vm117_vm2, %v260_v10, 0.0  ;;  %v255_v14 = vsel %vm117_vm2, %v254_v13, 0.0 }
 0x48f   :  { %268 = vadd.xlane.f32.xlu0 %v267_v11  ;;  %262 = vadd.xlane.f32.xlu1 %v261_v12 }
 0x493   :  { %256 = vadd.xlane.f32.xlu0 %v255_v14 }
 0x51c   :  { %v269_v16 = vpop.xlane.xlu0 %268  ;;  %v263_v17 = vpop.xlane.xlu1 %262 }
 0x51d   :  { %vm270_vm15 = vcmp.lt.f32.partialorder %v269_v16, 1.0  ;;  %vm264_vm3 = vcmp.lt.f32.partialorder %v263_v17, 1.0 }
 0x51e   :  { %v271_v18 = vsel %vm270_vm15, %v250_v2, %v252_v1  ;;  %v274_v19 = vsel %vm270_vm15, %v252_v1, %v245_v59 }
 0x51f   :  { %v272_v21 = vsel %vm264_vm3, %v248_v4, %v271_v18  ;;  %v275_v22 = vsel %vm264_vm3, %v250_v2, %v274_v19 }
 0x520   :  { %v257_v20 = vpop.xlane.xlu0 %256 }
 0x521   :  { %vm258_vm4 = vcmp.lt.f32.partialorder %v257_v20, 1.0 }
 0x522   :  { %v273_v23 = vsel %vm258_vm4, %v242_v58, %v272_v21  ;;  %v276_v24 = vsel %vm258_vm4, %v248_v4, %v275_v22 }
 0x523   :  { %v277_v25 = vsub.f32 %v276_v24, %v273_v23 }
 0x525   :  { %v278_v26 = vmul.f32 0.25, %v277_v25  ;;  %v280_v27 = vmul.f32 0.5, %v277_v25  ;;  %v282_v28 = vmul.f32 0.75, %v277_v25 }
 0x527   :  { %v283_v29 = vadd.f32 %v282_v28, %v273_v23  ;;  %v281_v30 = vadd.f32 %v280_v27, %v273_v23  ;;  %v279_v31 = vadd.f32 %v278_v26, %v273_v23 }
 0x529   :  { %v296_v32 = vsub.f32 %v1071_v15, %v283_v29  ;;  %v290_v33 = vsub.f32 %v1071_v15, %v281_v30  ;;  %v284_v34 = vsub.f32 %v1071_v15, %v279_v31 }
 0x52b   :  { %v297_v35 = vmax.f32 %v296_v32, 0.0  ;;  %v291_v36 = vmax.f32 %v290_v33, 0.0  ;;  %v285_v39 = vmax.f32 %v284_v34, 0.0 }
 0x52d   :  { %v298_v37 = vsel %vm117_vm2, %v297_v35, 0.0  ;;  %v292_v38 = vsel %vm117_vm2, %v291_v36, 0.0  ;;  %v286_v40 = vsel %vm117_vm2, %v285_v39, 0.0 }
 0x52e   :  { %299 = vadd.xlane.f32.xlu1 %v298_v37  ;;  %293 = vadd.xlane.f32.xlu0 %v292_v38 }
 0x532   :  { %287 = vadd.xlane.f32.xlu1 %v286_v40 }
 0x5bb   :  { %v300_v41 = vpop.xlane.xlu1 %299  ;;  %v294_v42 = vpop.xlane.xlu0 %293 }
 0x5bc   :  { %vm301_vm5 = vcmp.lt.f32.partialorder %v300_v41, 1.0  ;;  %vm295_vm6 = vcmp.lt.f32.partialorder %v294_v42, 1.0 }
 0x5bd   :  { %v302_v43 = vsel %vm301_vm5, %v281_v30, %v283_v29  ;;  %v305_v44 = vsel %vm301_vm5, %v283_v29, %v276_v24 }
 0x5be   :  { %v303_v46 = vsel %vm295_vm6, %v279_v31, %v302_v43  ;;  %v306_v47 = vsel %vm295_vm6, %v281_v30, %v305_v44 }
 0x5bf   :  { %v288_v45 = vpop.xlane.xlu1 %287 }
 0x5c0   :  { %vm289_vm7 = vcmp.lt.f32.partialorder %v288_v45, 1.0 }
 0x5c1   :  { %v304_v48 = vsel %vm289_vm7, %v273_v23, %v303_v46  ;;  %v307_v49 = vsel %vm289_vm7, %v279_v31, %v306_v47 }
 0x5c2   :  { %v308_v50 = vsub.f32 %v307_v49, %v304_v48 }
 0x5c4   :  { %v309_v51 = vmul.f32 0.25, %v308_v50  ;;  %v311_v52 = vmul.f32 0.5, %v308_v50  ;;  %v313_v53 = vmul.f32 0.75, %v308_v50 }
 0x5c6   :  { %v314_v54 = vadd.f32 %v313_v53, %v304_v48  ;;  %v312_v55 = vadd.f32 %v311_v52, %v304_v48  ;;  %v310_v56 = vadd.f32 %v309_v51, %v304_v48 }
 0x5c8   :  { %v327_v57 = vsub.f32 %v1071_v15, %v314_v54  ;;  %v321_v58 = vsub.f32 %v1071_v15, %v312_v55  ;;  %v315_v59 = vsub.f32 %v1071_v15, %v310_v56 }
 0x5ca   :  { %v328_v60 = vmax.f32 %v327_v57, 0.0  ;;  %v322_v61 = vmax.f32 %v321_v58, 0.0  ;;  %v316_v1 = vmax.f32 %v315_v59, 0.0 }
 0x5cc   :  { %v329_v62 = vsel %vm117_vm2, %v328_v60, 0.0  ;;  %v323_v63 = vsel %vm117_vm2, %v322_v61, 0.0  ;;  %v317_v2 = vsel %vm117_vm2, %v316_v1, 0.0 }
 0x5cd   :  { %330 = vadd.xlane.f32.xlu0 %v329_v62  ;;  %324 = vadd.xlane.f32.xlu1 %v323_v63 }
 0x5d1   :  { %318 = vadd.xlane.f32.xlu0 %v317_v2 }
 0x65a   :  { %v331_v4 = vpop.xlane.xlu0 %330  ;;  %v325_v5 = vpop.xlane.xlu1 %324 }
 0x65b   :  { %vm332_vm8 = vcmp.lt.f32.partialorder %v331_v4, 1.0  ;;  %vm326_vm9 = vcmp.lt.f32.partialorder %v325_v5, 1.0 }
 0x65c   :  { %v333_v6 = vsel %vm332_vm8, %v312_v55, %v314_v54  ;;  %v336_v8 = vsel %vm332_vm8, %v314_v54, %v307_v49 }
 0x65d   :  { %v334_v10 = vsel %vm326_vm9, %v310_v56, %v333_v6  ;;  %v337_v11 = vsel %vm326_vm9, %v312_v55, %v336_v8 }
 0x65e   :  { %v319_v9 = vpop.xlane.xlu0 %318 }
 0x65f   :  { %vm320_vm10 = vcmp.lt.f32.partialorder %v319_v9, 1.0 }
 0x660   :  { %v335_v12 = vsel %vm320_vm10, %v304_v48, %v334_v10  ;;  %v338_v13 = vsel %vm320_vm10, %v310_v56, %v337_v11 }
 0x661   :  { %v339_v14 = vsub.f32 %v338_v13, %v335_v12 }
 0x663   :  { %v340_v16 = vmul.f32 0.25, %v339_v14  ;;  %v342_v17 = vmul.f32 0.5, %v339_v14  ;;  %v344_v18 = vmul.f32 0.75, %v339_v14 }
 0x665   :  { %v345_v19 = vadd.f32 %v344_v18, %v335_v12  ;;  %v343_v20 = vadd.f32 %v342_v17, %v335_v12  ;;  %v341_v21 = vadd.f32 %v340_v16, %v335_v12 }
 0x667   :  { %v358_v22 = vsub.f32 %v1071_v15, %v345_v19  ;;  %v352_v23 = vsub.f32 %v1071_v15, %v343_v20  ;;  %v346_v24 = vsub.f32 %v1071_v15, %v341_v21 }
 0x669   :  { %v359_v25 = vmax.f32 %v358_v22, 0.0  ;;  %v353_v26 = vmax.f32 %v352_v23, 0.0  ;;  %v347_v29 = vmax.f32 %v346_v24, 0.0 }
 0x66b   :  { %v360_v27 = vsel %vm117_vm2, %v359_v25, 0.0  ;;  %v354_v28 = vsel %vm117_vm2, %v353_v26, 0.0  ;;  %v348_v30 = vsel %vm117_vm2, %v347_v29, 0.0 }
 0x66c   :  { %361 = vadd.xlane.f32.xlu1 %v360_v27  ;;  %355 = vadd.xlane.f32.xlu0 %v354_v28 }
 0x670   :  { %349 = vadd.xlane.f32.xlu1 %v348_v30 }
 0x6f9   :  { %v362_v31 = vpop.xlane.xlu1 %361  ;;  %v356_v32 = vpop.xlane.xlu0 %355 }
 0x6fa   :  { %vm363_vm11 = vcmp.lt.f32.partialorder %v362_v31, 1.0  ;;  %vm357_vm12 = vcmp.lt.f32.partialorder %v356_v32, 1.0 }
 0x6fb   :  { %v364_v33 = vsel %vm363_vm11, %v343_v20, %v345_v19  ;;  %v367_v34 = vsel %vm363_vm11, %v345_v19, %v338_v13 }
 0x6fc   :  { %v365_v36 = vsel %vm357_vm12, %v341_v21, %v364_v33  ;;  %v368_v37 = vsel %vm357_vm12, %v343_v20, %v367_v34 }
 0x6fd   :  { %v350_v35 = vpop.xlane.xlu1 %349 }
 0x6fe   :  { %vm351_vm13 = vcmp.lt.f32.partialorder %v350_v35, 1.0 }
 0x6ff   :  { %v366_v38 = vsel %vm351_vm13, %v335_v12, %v365_v36  ;;  %v369_v39 = vsel %vm351_vm13, %v341_v21, %v368_v37 }
 0x700   :  { %v370_v40 = vsub.f32 %v369_v39, %v366_v38 }
 0x702   :  { %v371_v41 = vmul.f32 0.25, %v370_v40  ;;  %v373_v42 = vmul.f32 0.5, %v370_v40  ;;  %v375_v43 = vmul.f32 0.75, %v370_v40 }
 0x704   :  { %v376_v44 = vadd.f32 %v375_v43, %v366_v38  ;;  %v374_v45 = vadd.f32 %v373_v42, %v366_v38  ;;  %v372_v46 = vadd.f32 %v371_v41, %v366_v38 }
 0x706   :  { %v389_v47 = vsub.f32 %v1071_v15, %v376_v44  ;;  %v383_v48 = vsub.f32 %v1071_v15, %v374_v45  ;;  %v377_v49 = vsub.f32 %v1071_v15, %v372_v46 }
 0x708   :  { %v390_v50 = vmax.f32 %v389_v47, 0.0  ;;  %v384_v51 = vmax.f32 %v383_v48, 0.0  ;;  %v378_v54 = vmax.f32 %v377_v49, 0.0 }
 0x70a   :  { %v391_v52 = vsel %vm117_vm2, %v390_v50, 0.0  ;;  %v385_v53 = vsel %vm117_vm2, %v384_v51, 0.0  ;;  %v379_v55 = vsel %vm117_vm2, %v378_v54, 0.0 }
 0x70b   :  { %392 = vadd.xlane.f32.xlu0 %v391_v52  ;;  %386 = vadd.xlane.f32.xlu1 %v385_v53 }
 0x70f   :  { %380 = vadd.xlane.f32.xlu0 %v379_v55 }
 0x798   :  { %v393_v56 = vpop.xlane.xlu0 %392  ;;  %v387_v57 = vpop.xlane.xlu1 %386 }
 0x799   :  { %vm394_vm14 = vcmp.lt.f32.partialorder %v393_v56, 1.0  ;;  %vm388_vm15 = vcmp.lt.f32.partialorder %v387_v57, 1.0 }
 0x79a   :  { %v395_v58 = vsel %vm394_vm14, %v374_v45, %v376_v44  ;;  %v398_v59 = vsel %vm394_vm14, %v376_v44, %v369_v39 }
 0x79b   :  { %v396_v61 = vsel %vm388_vm15, %v372_v46, %v395_v58  ;;  %v399_v62 = vsel %vm388_vm15, %v374_v45, %v398_v59 }
 0x79c   :  { %v381_v60 = vpop.xlane.xlu0 %380 }
 0x79d   :  { %vm382_vm3 = vcmp.lt.f32.partialorder %v381_v60, 1.0 }
 0x79e   :  { %v397_v63 = vsel %vm382_vm3, %v366_v38, %v396_v61  ;;  %v400_v1 = vsel %vm382_vm3, %v372_v46, %v399_v62  ;;  %v481_v61 = vld [vmem:[%s1255_s1] sm:$0xff] }
 0x79f   :  { %v401_v2 = vsub.f32 %v400_v1, %v397_v63  ;;  %876 = vmatpush3.msra.mxu0 %v481_v61 }
 0x7a0   :  { %943 = vmatprep.subr.bf16.mxu0 %v986_v3 }
 0x7a1   :  { %v402_v4 = vmul.f32 0.25, %v401_v2  ;;  %v404_v5 = vmul.f32 0.5, %v401_v2  ;;  %v406_v6 = vmul.f32 0.75, %v401_v2 }
 0x7a3   :  { %v407_v8 = vadd.f32 %v406_v6, %v397_v63  ;;  %v405_v9 = vadd.f32 %v404_v5, %v397_v63  ;;  %v403_v10 = vadd.f32 %v402_v4, %v397_v63  ;;  %v559_v6 = vld [vmem:[%s1256_s4] sm:$0xff] }
 0x7a5   :  { %v420_v11 = vsub.f32 %v1071_v15, %v407_v8  ;;  %v414_v12 = vsub.f32 %v1071_v15, %v405_v9  ;;  %v408_v13 = vsub.f32 %v1071_v15, %v403_v10 }
 0x7a7   :  { %v421_v14 = vmax.f32 %v420_v11, 0.0  ;;  %v415_v16 = vmax.f32 %v414_v12, 0.0  ;;  %v409_v19 = vmax.f32 %v408_v13, 0.0  ;;  %v561_v12 = vld [vmem:[%s1256_s4 + $0x10] sm:$0xff]  ;;  %v562_v13 = vld [vmem:[%s1256_s4 + $0x18] sm:$0xff] }
 0x7a9   :  { %v422_v17 = vsel %vm117_vm2, %v421_v14, 0.0  ;;  %v416_v18 = vsel %vm117_vm2, %v415_v16, 0.0  ;;  %v410_v20 = vsel %vm117_vm2, %v409_v19, 0.0  ;;  %v947_v14 = vpack.c.bf16 %v562_v13, %v561_v12  ;;  %v719_v16 = vld [vmem:[%s1257_s6 + $0x8] sm:$0xff]  ;;  %v721_v19 = vld [vmem:[%s1257_s6 + $0x18] sm:$0xff] }
 0x7aa   :  { %423 = vadd.xlane.f32.xlu1 %v422_v17  ;;  %417 = vadd.xlane.f32.xlu0 %v416_v18  ;;  %v720_v17 = vld [vmem:[%s1257_s6 + $0x10] sm:$0xff] }
 0x7ae   :  { %411 = vadd.xlane.f32.xlu1 %v410_v20  ;;  %v959_v20 = vpack.c.bf16 %v721_v19, %v720_v17 }
 0x837   :  { %v424_v21 = vpop.xlane.xlu1 %423  ;;  %v418_v22 = vpop.xlane.xlu0 %417 }
 0x838   :  { %vm425_vm4 = vcmp.lt.f32.partialorder %v424_v21, 1.0  ;;  %vm419_vm5 = vcmp.lt.f32.partialorder %v418_v22, 1.0  ;;  %v722_v21 = vld [vmem:[%s1257_s6 + $0x20] sm:$0xff]  ;;  %v723_v22 = vld [vmem:[%s1257_s6 + $0x28] sm:$0xff] }
 0x839   :  { %v426_v23 = vsel %vm425_vm4, %v405_v9, %v407_v8  ;;  %v429_v24 = vsel %vm425_vm4, %v407_v8, %v400_v1  ;;  %v560_v8 = vld [vmem:[%s1256_s4 + $0x8] sm:$0xff] }
 0x83a   :  { %v427_v26 = vsel %vm419_vm5, %v403_v10, %v426_v23  ;;  %v430_v27 = vsel %vm419_vm5, %v405_v9, %v429_v24  ;;  %v962_v23 = vpack.c.bf16 %v723_v22, %v722_v21  ;;  %v724_v24 = vld [vmem:[%s1257_s6 + $0x30] sm:$0xff] }
 0x83b   :  { %v412_v25 = vpop.xlane.xlu1 %411 }
 0x83c   :  { %vm413_vm6 = vcmp.lt.f32.partialorder %v412_v25, 1.0  ;;  %v725_v25 = vld [vmem:[%s1257_s6 + $0x38] sm:$0xff] }
 0x83d   :  { %v428_v28 = vsel %vm413_vm6, %v397_v63, %v427_v26  ;;  %v431_v29 = vsel %vm413_vm6, %v403_v10, %v430_v27  ;;  %v944_v10 = vpack.c.bf16 %v560_v8, %v559_v6  ;;  %v965_v26 = vpack.c.bf16 %v725_v25, %v724_v24  ;;  %v726_v27 = vld [vmem:[%s1257_s6 + $0x40] sm:$0xff] }
 0x83e   :  { %v432_v30 = vsub.f32 %v431_v29, %v428_v28 }
 0x840   :  { %v433_v31 = vmul.f32 0.25, %v432_v30  ;;  %v435_v32 = vmul.f32 0.5, %v432_v30  ;;  %v437_v33 = vmul.f32 0.75, %v432_v30  ;;  %v555_v30 = vld [vmem:[%s1258_s3] sm:$0xff] }
 0x842   :  { %v438_v34 = vadd.f32 %v437_v33, %v428_v28  ;;  %v436_v35 = vadd.f32 %v435_v32, %v428_v28  ;;  %v434_v36 = vadd.f32 %v433_v31, %v428_v28  ;;  %v556_v31 = vld [vmem:[%s1258_s3 + $0x8] sm:$0xff]  ;;  %v557_v33 = vld [vmem:[%s1258_s3 + $0x10] sm:$0xff] }
 0x843   :  { %v950_v32 = vpack.c.bf16 %v556_v31, %v555_v30 }
 0x844   :  { %v451_v37 = vsub.f32 %v1071_v15, %v438_v34  ;;  %v445_v38 = vsub.f32 %v1071_v15, %v436_v35  ;;  %v439_v39 = vsub.f32 %v1071_v15, %v434_v36 }
 0x846   :  { %v452_v40 = vmax.f32 %v451_v37, 0.0  ;;  %v446_v41 = vmax.f32 %v445_v38, 0.0  ;;  %v440_v44 = vmax.f32 %v439_v39, 0.0  ;;  %v728_v38 = vld [vmem:[%s1257_s6 + $0x50] sm:$0xff]  ;;  %v729_v39 = vld [vmem:[%s1257_s6 + $0x58] sm:$0xff] }
 0x848   :  { %v453_v42 = vsel %vm117_vm2, %v452_v40, 0.0  ;;  %v447_v43 = vsel %vm117_vm2, %v446_v41, 0.0  ;;  %v441_v45 = vsel %vm117_vm2, %v440_v44, 0.0  ;;  %v971_v40 = vpack.c.bf16 %v729_v39, %v728_v38 }
 0x849   :  { %454 = vadd.xlane.f32.xlu0 %v453_v42  ;;  %448 = vadd.xlane.f32.xlu1 %v447_v43  ;;  %v732_v42 = vld [vmem:[%s1257_s6 + $0x70] sm:$0xff]  ;;  %v733_v43 = vld [vmem:[%s1257_s6 + $0x78] sm:$0xff] }
 0x84a   :  { %v977_v44 = vpack.c.bf16 %v733_v43, %v732_v42 }
 0x84d   :  { %442 = vadd.xlane.f32.xlu0 %v441_v45 }
 0x8d6   :  { %v455_v46 = vpop.xlane.xlu0 %454  ;;  %v449_v47 = vpop.xlane.xlu1 %448 }
 0x8d7   :  { %vm456_vm7 = vcmp.lt.f32.partialorder %v455_v46, 1.0  ;;  %vm450_vm8 = vcmp.lt.f32.partialorder %v449_v47, 1.0 }
 0x8d8   :  { %v457_v48 = vsel %vm456_vm7, %v436_v35, %v438_v34  ;;  %v460_v49 = vsel %vm456_vm7, %v438_v34, %v431_v29  ;;  %v558_v34 = vld [vmem:[%s1258_s3 + $0x18] sm:$0xff] }
 0x8d9   :  { %v458_v51 = vsel %vm450_vm8, %v434_v36, %v457_v48  ;;  %v461_v52 = vsel %vm450_vm8, %v436_v35, %v460_v49  ;;  %v953_v37 = vpack.c.bf16 %v558_v34, %v557_v33  ;;  %v828_v48 = vld [vmem:[%s1259_s5] ss:$0 sm:$0xff] }
 0x8da   :  { %v443_v50 = vpop.xlane.xlu0 %442 }
 0x8db   :  { %vm444_vm9 = vcmp.lt.f32.partialorder %v443_v50, 1.0 }
 0x8dc   :  { %v459_v53 = vsel %vm444_vm9, %v428_v28, %v458_v51  ;;  %v462_v54 = vsel %vm444_vm9, %v434_v36, %v461_v52  ;;  %v727_v28 = vld [vmem:[%s1257_s6 + $0x48] sm:$0xff]  ;;  %v829_v52 = vld [vmem:[%s1261_s7] ss:$0 sm:$0xff] }
 0x8dd   :  { %v463_v55 = vadd.f32 %v462_v54, %v459_v53  ;;  %v968_v29 = vpack.c.bf16 %v727_v28, %v726_v27 }
 0x8df   :  { %v464_v56 = vmul.f32 0.5, %v463_v55 }
 0x8e1   :  { %vm465_vm10 = vcmp.gt.f32.partialorder %v1071_v15, %v464_v56 }
 0x8e2   :  { %v823_v57 = vsel %vm465_vm10, 1.0, %v988_v7 }
 0x8e3   :  { %v468_v58 = vsel %vm117_vm2, %v823_v57, 0.0  ;;  %v472_v59 = vmul.f32 %v823_v57, %v1071_v15 }
 0x8e4   :  { %469 = vadd.xlane.f32.xlu1 %v468_v58 }
 0x8e5   :  { %v473_v60 = vsel %vm117_vm2, %v472_v59, 0.0 }
 0x8e6   :  { %474 = vadd.xlane.f32.xlu0 %v473_v60 }
 0x971   :  { %v470_v62 = vpop.xlane.xlu1 %469 }
 0x972   :  { %v471_v63 = vmax.f32 %v470_v62, 1.0 }
 0x973   :  { %v475_v1 = vpop.xlane.xlu0 %474 }
 0x974   :  { %984 = vrcp.f32 %v471_v63  ;;  %v824_v2 = vadd.f32 -1.0, %v475_v1 }
 0x97e   :  { %v985_v4 = vpop.eup %984 }
 0x97f   :  { %v478_v5 = vmul.f32 %v985_v4, %v824_v2 }
 0x981   :  { %v479_v9 = vsub.f32 %v1071_v15, %v478_v5  ;;  %v718_v15 = vld [vmem:[%s1257_s6] sm:$0xff] }
 0x982   :  { %v956_v18 = vpack.c.bf16 %v719_v16, %v718_v15 }
 0x983   :  { %v480_v11 = vmax.f32 %v479_v9, 0.0 }
 0x984   :  { %957 = vmatpush3.bf16.msra.mxu1 %v956_v18 }
 0x985   :  { %878 = vmatmul.mubr.msk.f32.vlgmr.msra.gmra.mrb[2].mxu0 %vm117_vm2, %v480_v11  ;;  %958 = vmatprep.subr.bf16.mxu1 %v986_v3 }
 0x986   :  { %945 = vmatpush3.bf16.msra.mxu0 %v944_v10  ;;  %888 = vmatprep.mubr.msk.f32.mxu0 %vm987_vm1, %v988_v7 }
 0x987   :  { %946 = vmatprep.subr.bf16.mxu0 %v986_v3 }
 0x988   :  { %960 = vmatpush3.bf16.msra.mxu1 %v959_v20 }
 0x989   :  { %961 = vmatprep.subr.bf16.mxu1 %v986_v3 }
 0x98a   :  { %948 = vmatpush3.bf16.msra.mxu0 %v947_v14 }
 0x98b   :  { %949 = vmatprep.subr.bf16.mxu0 %v986_v3 }
 0x98c   :  { %963 = vmatpush3.bf16.msra.mxu1 %v962_v23 }
 0x98d   :  { %964 = vmatprep.subr.bf16.mxu1 %v986_v3 }
 0x990   :  { %966 = vmatpush3.bf16.msra.mxu1 %v965_v26 }
 0x991   :  { %967 = vmatprep.subr.bf16.mxu1 %v986_v3 }
 0x994   :  { %969 = vmatpush3.bf16.msra.mxu1 %v968_v29 }
 0x995   :  { %970 = vmatprep.subr.bf16.mxu1 %v986_v3 }
 0x998   :  { %972 = vmatpush3.bf16.msra.mxu1 %v971_v40 }
 0x999   :  { %973 = vmatprep.subr.bf16.mxu1 %v986_v3 }
 0xa58   :  { %v551_v35 = vpop.f32.mrb[2].mxu0 }
 0xa59   :  { %v879_v36 = vpop.f32.mrb[3].mxu0  ;;  %889 = vmatmul.mubr.msk.f32.vlgmr.msra.gmra.mrb[4].mxu0 %vm33_vm0, %v551_v35 }
 0xa5a   :  { %951 = vmatpush3.bf16.msra.mxu0 %v950_v32  ;;  %899 = vmatprep.mubr.msk.f32.mxu0 %vm987_vm1, %v988_v7  ;;  %v730_v7 = vld [vmem:[%s1257_s6 + $0x60] sm:$0xff] }
 0xa5b   :  { %952 = vmatprep.subr.bf16.mxu0 %v986_v3 }
 0xa5e   :  { %954 = vmatpush3.bf16.msra.mxu0 %v953_v37 }
 0xa61   :  { %900 = vmatmul.mubr.msk.f32.vlgmr.msra.gmra.mrb[6].mxu0 %vm33_vm0, %v1042_v0  ;;  %v731_v0 = vld [vmem:[%s1257_s6 + $0x68] sm:$0xff] }
 0xa62   :  { %v974_v41 = vpack.c.bf16 %v731_v0, %v730_v7 }
 0xa64   :  { %975 = vmatpush3.bf16.msra.mxu1 %v974_v41 }
 0xa65   :  { %976 = vmatprep.subr.bf16.mxu1 %v986_v3 }
 0xa68   :  { %978 = vmatpush3.bf16.msra.mxu1 %v977_v44 }
 0xb2c   :  { %v632_v45 = vpop.f32.mrb[4].mxu0 }
 0xb2d   :  { %v890_v46 = vpop.f32.mrb[5].mxu0 }
 0xb34   :  { %v705_v47 = vpop.f32.mrb[6].mxu0 }
 0xb35   :  { %v706_v49 = vadd.f32 %v705_v47, %v632_v45  ;;  %v901_v50 = vpop.f32.mrb[7].mxu0 }
 0xb37   :  { %v716_v3 = vadd.f32 %v828_v48, %v706_v49 }
 0xb39   :  { %v717_v51 = vmax.f32 %v716_v3, 0.0 }
 0xb3b   :  { %812 = vst [vmem:[%s1260_s9] sm:$0xff] %v717_v51  ;;  %935 = vmatmul.mubr.f32.vlgmr.msra.gmra.mrb[0].mxu1 %v717_v51 }
 0xc0e   :  { %v807_v53 = vpop.f32.mrb[0].mxu1 }
 0xc0f   :  { %v808_v54 = vadd.f32 %v829_v52, %v807_v53  ;;  %v936_v55 = vpop.f32.mrb[1].mxu1 }
 0xc11   :  { %811 = vst [vmem:[%s1262_s8] sm:$0xff] %v808_v54 }

</bundles_post_ra>
